<compile_context>
chip_gen: v7x
topology: tpu7x:2x2x1
jax: 0.10.0
libtpu: 0.0.40
codegen_flags: <defaults>
</compile_context>

<pallas_src>
import functools

import jax
import jax.numpy as jnp
import numpy as np
from jax.experimental import pallas as pl
from jax.experimental.pallas import tpu as pltpu


@functools.lru_cache(maxsize=None)
def _vmem_limit_bytes():
    """Scoped-VMEM budget derived from the actual chip, not a hard-coded 32 MiB."""
    try:
        cap = getattr(pltpu.get_tpu_info(), "vmem_capacity_bytes", None)
    except Exception:
        cap = None
    if not cap:
        cap = 64 * 1024 * 1024          # conservative fallback (v7x physical)
    return int(cap) * 3 // 4


# -----------------------------------------------------------------------------
# conv1 / conv2: tap-folded dense matmul + bias + ReLU + BN(eval) + maxpool 2x2
# -----------------------------------------------------------------------------
def _conv_pool_kernel(x_ref, w_ref, p_ref, o_ref, ybuf, *, TP, W):
    """One (image, pooled-row-tile) step.

    x_ref : (2*TP*W, 9*Cin) bf16   im2col rows (taps folded into K) for 2*TP conv rows
    w_ref : (9*Cin, Cout)   bf16   folded 3x3 weights
    p_ref : (3, Cout)       f32    packed [bias, bn_scale, bn_shift]
    o_ref : (TP, W//2, Cout)       pooled output rows for this tile
    ybuf  : (2*TP*W, Cout)  f32    post-epilogue conv rows, rows = (h, w) flattened
    """
    # ONE MXU matmul per tile (taps folded into K) -> ONE accumulator write.
    acc = jnp.dot(x_ref[...], w_ref[...], preferred_element_type=jnp.float32)

    bias = p_ref[pl.ds(0, 1), :]
    scale = p_ref[pl.ds(1, 1), :]
    shift = p_ref[pl.ds(2, 1), :]
    # bias + ReLU + BN(eval) as a single contiguous (unmasked) epilogue pass.
    ybuf[...] = jnp.maximum(acc + bias, 0.0) * scale + shift

    # 2x2 max-pool: max-only strided reads of the already-transformed buffer.
    W2 = W // 2
    for p in range(TP):
        r0 = (2 * p) * W
        r1 = (2 * p + 1) * W
        tl = ybuf[pl.ds(r0, W2, stride=2), :]
        tr = ybuf[pl.ds(r0 + 1, W2, stride=2), :]
        bl = ybuf[pl.ds(r1, W2, stride=2), :]
        br = ybuf[pl.ds(r1 + 1, W2, stride=2), :]
        o_ref[p] = jnp.maximum(jnp.maximum(tl, tr),
                               jnp.maximum(bl, br)).astype(o_ref.dtype)


def _im2col_3x3(x):
    """(N, H, W, C) -> (N, H*W, 9*C): 3x3/pad1 taps folded into the channel dim
    (tap-major, channel-minor).  This is the K-folding asked for in the review;
    it also removes the conv halo so row tiles never overlap."""
    N, H, W, C = x.shape
    xp = jnp.pad(x, ((0, 0), (1, 1), (1, 1), (0, 0)))
    taps = [xp[:, kh:kh + H, kw:kw + W, :] for kh in range(3) for kw in range(3)]
    return jnp.concatenate(taps, axis=-1).reshape(N, H * W, 9 * C)


def conv_bn_relu_pool(x, w_fold, pack):
    """x: (N, H, W, Cin) bf16; w_fold: (9*Cin, Cout) bf16; pack: (3, Cout) f32.
    Returns pooled activations (N, H//2, W//2, Cout) bf16."""
    N, H, W, _ = x.shape
    Cout = w_fold.shape[-1]
    assert H % 2 == 0 and W % 2 == 0, "maxpool 2x2 assumes even H and W"
    H2, W2 = H // 2, W // 2
    TP = max(d for d in range(1, min(H2, 8) + 1) if H2 % d == 0)

    x_col = _im2col_3x3(x)                     # (N, H*W, 9*Cin)
    K = x_col.shape[-1]
    R = 2 * TP * W                             # im2col rows per tile (no halo)

    kernel = functools.partial(_conv_pool_kernel, TP=TP, W=W)
    return pl.pallas_call(
        kernel,
        out_shape=jax.ShapeDtypeStruct((N, H2, W2, Cout), jnp.bfloat16),
        grid=(N, H2 // TP),
        in_specs=[
            pl.BlockSpec((None, R, K), lambda n, t: (n, t, 0)),
            pl.BlockSpec((K, Cout), lambda n, t: (0, 0)),
            pl.BlockSpec((3, Cout), lambda n, t: (0, 0)),
        ],
        out_specs=pl.BlockSpec((None, TP, W2, Cout), lambda n, t: (n, t, 0, 0)),
        scratch_shapes=[pltpu.VMEM((R, Cout), jnp.float32)],
        # Both axes parallel: on v7x the partitioner may split either batch or
        # the row-tile axis across the two TensorCores (row tiles when batch=1).
        compiler_params=pltpu.CompilerParams(
            dimension_semantics=("parallel", "parallel"),
            vmem_limit_bytes=_vmem_limit_bytes()),
    )(x_col, w_fold, pack)


# -----------------------------------------------------------------------------
# Fused tail: conv3 -> pool -> conv4 -> pool -> fc1 -> fc2 -> fc3 (one image/step)
# -----------------------------------------------------------------------------
def _tail_kernel(x_ref, w3_ref, p3_ref, w4_ref, p4_ref,
                 fw1_ref, fb1_ref, fw2_ref, fb2_ref, fw3_ref, fb3_ref,
                 o_ref, ybuf3, pad4, ybuf4, *, H4, W4):
    """x_ref : ((H4+3)*(W4+2), 64) bf16  conv2 output, halo-padded, rows = (h, w')
    w*_ref : (9, Cin, Cout) bf16 per-tap conv weights; p*_ref: (3, Cout) f32
    fw*/fb*: fc weights (bf16) / biases (f32); fw1 rows are in NHWC order.
    o_ref  : (1, 18) f32 logits for this image."""
    W4p = W4 + 2
    H8, W8 = H4 // 2, W4 // 2
    W8p = W8 + 2
    H16, W16 = H8 // 2, W8 // 2
    C4 = w4_ref.shape[-1]                       # 128

    def epilogue(acc, p_ref):                   # bias + ReLU + BN(eval), one pass
        bias = p_ref[pl.ds(0, 1), :]
        scale = p_ref[pl.ds(1, 1), :]
        shift = p_ref[pl.ds(2, 1), :]
        return jnp.maximum(acc + bias, 0.0) * scale + shift

    def conv3x3(src, w_ref, n_rows, wp, cast_bf16):
        # 9 shifted-slab matmuls chained into ONE value-level accumulator
        # (single scratch write, no per-tap read-modify-write of the scratch).
        acc = None
        for tap in range(9):
            kh, kw = divmod(tap, 3)
            lhs = src[pl.ds(kh * wp + kw, n_rows), :]
            if cast_bf16:
                lhs = lhs.astype(jnp.bfloat16)
            d = jnp.dot(lhs, w_ref[tap], preferred_element_type=jnp.float32)
            acc = d if acc is None else acc + d
        return acc

    def pool_rows(buf, h, w_in, wp):            # 2x2 max of conv rows 2h / 2h+1
        r0 = (2 * h) * wp
        r1 = (2 * h + 1) * wp
        w_out = w_in // 2
        tl = buf[pl.ds(r0, w_out, stride=2), :]
        tr = buf[pl.ds(r0 + 1, w_out, stride=2), :]
        bl = buf[pl.ds(r1, w_out, stride=2), :]
        br = buf[pl.ds(r1 + 1, w_out, stride=2), :]
        return jnp.maximum(jnp.maximum(tl, tr), jnp.maximum(bl, br))

    # ---- conv3 + bias/ReLU/BN ------------------------------------------------
    ybuf3[...] = epilogue(conv3x3(x_ref, w3_ref, H4 * W4p, W4p, False), p3_ref)

    # ---- pool3 -> zero-padded conv4 input (VMEM only, never hits HBM) --------
    pad4[...] = jnp.zeros(pad4.shape, pad4.dtype)
    for h in range(H8):
        pooled = pool_rows(ybuf3, h, W4, W4p)                  # (W8, 128) f32
        pad4[pl.ds((h + 1) * W8p + 1, W8), :] = pooled

    # ---- conv4 + bias/ReLU/BN ------------------------------------------------
    # TODO(synk): pad4 stays f32 (simple aligned partial stores); the per-tap
    #             bf16 cast of the small conv4 slabs is the accepted trade-off.
    ybuf4[...] = epilogue(conv3x3(pad4, w4_ref, H8 * W8p, W8p, True), p4_ref)

    # ---- pool4 -> fc1 (features consumed in NHWC order, never flattened) ----
    h1 = fb1_ref[...]                                          # (1, 128) f32
    for h in range(H16):
        feats = pool_rows(ybuf4, h, W8, W8p).astype(jnp.bfloat16)   # (W16, C4)
        for w in range(W16):
            row = (h * W16 + w) * C4
            h1 = h1 + jnp.dot(feats[w:w + 1, :],
                              fw1_ref[pl.ds(row, C4), :],
                              preferred_element_type=jnp.float32)
    h1 = jnp.maximum(h1, 0.0)
    # TODO(synk): Dropout (p=0.5) is identity in this inference-mode forward.
    h2 = jnp.dot(h1.astype(jnp.bfloat16), fw2_ref[...],
                 preferred_element_type=jnp.float32) + fb2_ref[...]
    h2 = jnp.maximum(h2, 0.0)
    out = jnp.dot(h2.astype(jnp.bfloat16), fw3_ref[...],
                  preferred_element_type=jnp.float32) + fb3_ref[...]
    o_ref[...] = out.astype(o_ref.dtype)


def tail_block(x2, w3, p3, w4, p4, fw1, fb1, fw2, fb2, fw3, fb3):
    """x2: (N, H4, W4, 64) bf16 conv2 pooled output.  Returns logits (N, 18) f32."""
    N, H4, W4, C = x2.shape
    assert H4 % 4 == 0 and W4 % 4 == 0
    W4p = W4 + 2
    rows3 = (H4 + 3) * W4p
    # Single small pad+flatten before the fused tail (the only remaining
    # inter-layer relayout; conv3->conv4->fc never leave VMEM).
    xpad = jnp.pad(x2, ((0, 0), (1, 2), (1, 1), (0, 0))).reshape(N, rows3, C)
    H8, W8 = H4 // 2, W4 // 2
    W8p = W8 + 2
    c3, c4 = w3.shape[-1], w4.shape[-1]

    kernel = functools.partial(_tail_kernel, H4=H4, W4=W4)
    out = pl.pallas_call(
        kernel,
        out_shape=jax.ShapeDtypeStruct((N, 1, 18), jnp.float32),
        grid=(N,),
        in_specs=[
            pl.BlockSpec((None, rows3, C), lambda n: (n, 0, 0)),
            pl.BlockSpec(w3.shape, lambda n: (0, 0, 0)),
            pl.BlockSpec(p3.shape, lambda n: (0, 0)),
            pl.BlockSpec(w4.shape, lambda n: (0, 0, 0)),
            pl.BlockSpec(p4.shape, lambda n: (0, 0)),
            pl.BlockSpec(fw1.shape, lambda n: (0, 0)),
            pl.BlockSpec(fb1.shape, lambda n: (0, 0)),
            pl.BlockSpec(fw2.shape, lambda n: (0, 0)),
            pl.BlockSpec(fb2.shape, lambda n: (0, 0)),
            pl.BlockSpec(fw3.shape, lambda n: (0, 0)),
            pl.BlockSpec(fb3.shape, lambda n: (0, 0)),
        ],
        out_specs=pl.BlockSpec((None, 1, 18), lambda n: (n, 0, 0)),
        scratch_shapes=[
            pltpu.VMEM((H4 * W4p, c3), jnp.float32),          # conv3 rows
            pltpu.VMEM(((H8 + 3) * W8p, c3), jnp.float32),    # padded conv4 input
            pltpu.VMEM((H8 * W8p, c4), jnp.float32),          # conv4 rows
        ],
        compiler_params=pltpu.CompilerParams(
            dimension_semantics=("parallel",),
            vmem_limit_bytes=_vmem_limit_bytes()),
    )(xpad, w3, p3, w4, p4, fw1, fb1, fw2, fb2, fw3, fb3)
    return out.reshape(N, 18)


# -----------------------------------------------------------------------------
# Full forward pass
# -----------------------------------------------------------------------------
def pointnet_forward(x_nchw, params):
    # NCHW (PyTorch) -> NHWC once; activations bf16, all accumulation f32.
    x = jnp.transpose(x_nchw, (0, 2, 3, 1)).astype(jnp.bfloat16)
    _, H, W, _ = x.shape
    assert H % 16 == 0 and W % 16 == 0, "four 2x2 max-pools need /16 spatial dims"

    def fold_conv_w(w_pt):      # (Cout,Cin,3,3) -> (9*Cin, Cout), tap-major / cin-minor
        cout, cin = w_pt.shape[0], w_pt.shape[1]
        return jnp.transpose(w_pt, (2, 3, 1, 0)).reshape(9 * cin, cout).astype(jnp.bfloat16)

    def tap_conv_w(w_pt):       # (Cout,Cin,3,3) -> (9, Cin, Cout)
        cout, cin = w_pt.shape[0], w_pt.shape[1]
        return jnp.transpose(w_pt, (2, 3, 1, 0)).reshape(9, cin, cout).astype(jnp.bfloat16)

    def pack_bn(i):
        return jnp.stack([params[f"conv{i}_b"], params[f"bn{i}_scale"],
                          params[f"bn{i}_shift"]], axis=0).astype(jnp.float32)

    # conv1 / conv2: one tap-folded bf16 MXU matmul per tile (K = 27 / 288).
    x = conv_bn_relu_pool(x, fold_conv_w(params["conv1_w"]), pack_bn(1))
    x = conv_bn_relu_pool(x, fold_conv_w(params["conv2_w"]), pack_bn(2))

    # conv3 + conv4 + MLP head fused into a single call per image.
    H16, W16 = H // 16, W // 16
    c4 = params["conv4_w"].shape[0]
    d1 = params["fc1_w"].shape[0]
    # Permute fc1 weight rows from NCHW-flatten order to NHWC (h, w, c) order so
    # no transpose of the conv4 activations is needed before fc1.
    fw1 = (params["fc1_w"].reshape(d1, c4, H16, W16)
           .transpose(2, 3, 1, 0).reshape(H16 * W16 * c4, d1).astype(jnp.bfloat16))
    fw2 = params["fc2_w"].T.astype(jnp.bfloat16)
    fw3 = params["fc3_w"].T.astype(jnp.bfloat16)
    fb1 = params["fc1_b"].reshape(1, -1).astype(jnp.float32)
    fb2 = params["fc2_b"].reshape(1, -1).astype(jnp.float32)
    fb3 = params["fc3_b"].reshape(1, -1).astype(jnp.float32)
    return tail_block(x, tap_conv_w(params["conv3_w"]), pack_bn(3),
                      tap_conv_w(params["conv4_w"]), pack_bn(4),
                      fw1, fb1, fw2, fb2, fw3, fb3)


# -----------------------------------------------------------------------------
# Deterministic synthetic parameters (shapes follow the PyTorch module; fc1's
# in_features is derived from the test spatial resolution).
# -----------------------------------------------------------------------------
def init_params(key, h, w):
    keys = iter(jax.random.split(key, 32))

    def nrm(shape, fan_in):
        return jax.random.normal(next(keys), shape, jnp.float32) / np.sqrt(fan_in)

    p = {}
    conv_specs = [(3, 32), (32, 64), (64, 128), (128, 128)]
    for i, (cin, cout) in enumerate(conv_specs, 1):
        p[f"conv{i}_w"] = nrm((cout, cin, 3, 3), cin * 9)
        p[f"conv{i}_b"] = nrm((cout,), cin * 9)
        gamma = 1.0 + 0.1 * jax.random.normal(next(keys), (cout,), jnp.float32)
        beta = 0.1 * jax.random.normal(next(keys), (cout,), jnp.float32)
        rmean = 0.1 * jax.random.normal(next(keys), (cout,), jnp.float32)
        rvar = jnp.abs(1.0 + 0.1 * jax.random.normal(next(keys), (cout,), jnp.float32))
        scale = gamma * jax.lax.rsqrt(rvar + 1e-5)          # eval-mode BN folded
        p[f"bn{i}_scale"] = scale
        p[f"bn{i}_shift"] = beta - rmean * scale

    fc1_in = 128 * (h // 16) * (w // 16)
    fc_specs = [(fc1_in, 128), (128, 64), (64, 18)]
    for i, (fin, fout) in enumerate(fc_specs, 1):
        p[f"fc{i}_w"] = nrm((fout, fin), fin)               # PyTorch Linear: (out, in)
        p[f"fc{i}_b"] = nrm((fout,), fin)
    return p


if __name__ == "__main__":
    key = jax.random.PRNGKey(0)
    kx, kp, kx2, kp2 = jax.random.split(key, 4)

    # Small test shape: (batch=2, channels=3, 16, 16).  Four 2x2 max-pools take
    # 16 -> 8 -> 4 -> 2 -> 1, so fc1 in_features = 128*1*1 (the module's
    # 128*26*26 corresponds to a 416x416 input).
    x = jax.random.normal(kx, (2, 3, 16, 16), jnp.float32)
    params = init_params(kp, h=16, w=16)

    fwd = jax.jit(pointnet_forward)
    out = fwd(x, params)
    jax.block_until_ready(out)
    assert out.shape == (2, 18), out.shape
    assert out.dtype == jnp.float32
    assert bool(jnp.all(jnp.isfinite(out)))

    # Lock in the indexing at a non-trivial resolution (multi-tile grid, >1
    # pooled row per tail stage), per the review's correctness note.
    x_big = jax.random.normal(kx2, (1, 3, 32, 32), jnp.float32)
    params_big = init_params(kp2, h=32, w=32)
    out_big = jax.jit(pointnet_forward)(x_big, params_big)
    jax.block_until_ready(out_big)
    assert out_big.shape == (1, 18), out_big.shape
    assert bool(jnp.all(jnp.isfinite(out_big)))

    print("KERNEL_OK")
</pallas_src>

<mosaic_0001>
module attributes {stable_mosaic.version = 11 : i64} {
  func.func @_conv_pool_kernel(%arg0: i32, %arg1: i32, %arg2: memref<1x256x27xbf16, #tpu.memory_space<vmem>>, %arg3: memref<27x32xbf16, #tpu.memory_space<vmem>>, %arg4: memref<3x32xf32, #tpu.memory_space<vmem>>, %arg5: memref<1x8x8x32xbf16, #tpu.memory_space<vmem>>, %arg6: memref<256x32xf32, #tpu.memory_space<vmem>>) attributes {dimension_semantics = [#tpu.dimension_semantics<parallel>, #tpu.dimension_semantics<parallel>], iteration_bounds = array<i64: 2, 1>, scalar_prefetch = 0 : i64, scratch_operands = 1 : i64, tpu.core_type = #tpu.core_type<tc>, window_params = [{transform_indices = @transform_0, window_bounds = array<i64: 1, 256, 27>}, {pipeline_mode = #tpu.pipeline_mode<synchronous>, transform_indices = @transform_1, window_bounds = array<i64: 27, 32>}, {pipeline_mode = #tpu.pipeline_mode<synchronous>, transform_indices = @transform_2, window_bounds = array<i64: 3, 32>}, {transform_indices = @transform_3, window_bounds = array<i64: 1, 8, 8, 32>}]} {
    %c0 = arith.constant 0 : index
    %c0_0 = arith.constant 0 : index
    %c0_1 = arith.constant 0 : index
    %0 = vector.load %arg2[%c0, %c0_0, %c0_1] : memref<1x256x27xbf16, #tpu.memory_space<vmem>>, vector<1x256x27xbf16>
    %1 = vector.shape_cast %0 : vector<1x256x27xbf16> to vector<256x27xbf16>
    %c0_2 = arith.constant 0 : index
    %c0_3 = arith.constant 0 : index
    %2 = vector.load %arg3[%c0_2, %c0_3] : memref<27x32xbf16, #tpu.memory_space<vmem>>, vector<27x32xbf16>
    %cst = arith.constant dense<0.000000e+00> : vector<256x32xf32>
    %3 = tpu.matmul %1, %2, %cst {dimension_numbers = #tpu.dot_dimension_numbers<[1], [0], [0], [1], [0, 0, 1, 1], [], []>} : vector<256x27xbf16>, vector<27x32xbf16>, vector<256x32xf32> -> vector<256x32xf32>
    %c0_4 = arith.constant 0 : index
    %c0_5 = arith.constant 0 : index
    %4 = vector.load %arg4[%c0_4, %c0_5] : memref<3x32xf32, #tpu.memory_space<vmem>>, vector<1x32xf32>
    %c1 = arith.constant 1 : index
    %c0_6 = arith.constant 0 : index
    %5 = vector.load %arg4[%c1, %c0_6] : memref<3x32xf32, #tpu.memory_space<vmem>>, vector<1x32xf32>
    %c2 = arith.constant 2 : index
    %c0_7 = arith.constant 0 : index
    %6 = vector.load %arg4[%c2, %c0_7] : memref<3x32xf32, #tpu.memory_space<vmem>>, vector<1x32xf32>
    %7 = vector.broadcast %4 : vector<1x32xf32> to vector<256x32xf32>
    %8 = arith.addf %3, %7 : vector<256x32xf32>
    %cst_8 = arith.constant 0.000000e+00 : f32
    %9 = vector.broadcast %cst_8 : f32 to vector<256x32xf32>
    %10 = arith.maximumf %8, %9 : vector<256x32xf32>
    %11 = vector.broadcast %5 : vector<1x32xf32> to vector<256x32xf32>
    %12 = arith.mulf %10, %11 : vector<256x32xf32>
    %13 = vector.broadcast %6 : vector<1x32xf32> to vector<256x32xf32>
    %14 = arith.addf %12, %13 : vector<256x32xf32>
    %c0_9 = arith.constant 0 : index
    %c0_10 = arith.constant 0 : index
    %15 = vector.load %arg6[%c0_9, %c0_10] : memref<256x32xf32, #tpu.memory_space<vmem>>, vector<256x32xf32>
    tpu.vector_store %arg6[%c0_9, %c0_10], %14 {strides = array<i32>} : memref<256x32xf32, #tpu.memory_space<vmem>>, vector<256x32xf32>,
    %c0_11 = arith.constant 0 : index
    %c0_12 = arith.constant 0 : index
    %16 = tpu.strided_load %arg6[%c0_11, %c0_12] {strides = array<i32: 2, 1>} : memref<256x32xf32, #tpu.memory_space<vmem>>, vector<8x32xf32>
    %c1_13 = arith.constant 1 : index
    %c0_14 = arith.constant 0 : index
    %17 = tpu.strided_load %arg6[%c1_13, %c0_14] {strides = array<i32: 2, 1>} : memref<256x32xf32, #tpu.memory_space<vmem>>, vector<8x32xf32>
    %c16 = arith.constant 16 : index
    %c0_15 = arith.constant 0 : index
    %18 = tpu.strided_load %arg6[%c16, %c0_15] {strides = array<i32: 2, 1>} : memref<256x32xf32, #tpu.memory_space<vmem>>, vector<8x32xf32>
    %c17 = arith.constant 17 : index
    %c0_16 = arith.constant 0 : index
    %19 = tpu.strided_load %arg6[%c17, %c0_16] {strides = array<i32: 2, 1>} : memref<256x32xf32, #tpu.memory_space<vmem>>, vector<8x32xf32>
    %20 = arith.maximumf %16, %17 : vector<8x32xf32>
    %21 = arith.maximumf %18, %19 : vector<8x32xf32>
    %22 = arith.maximumf %20, %21 : vector<8x32xf32>
    %23 = arith.truncf %22 : vector<8x32xf32> to vector<8x32xbf16>
    %c0_17 = arith.constant 0 : index
    %c0_18 = arith.constant 0 : index
    %c0_19 = arith.constant 0 : index
    %c0_20 = arith.constant 0 : index
    %24 = vector.load %arg5[%c0_17, %c0_18, %c0_19, %c0_20] : memref<1x8x8x32xbf16, #tpu.memory_space<vmem>>, vector<1x1x8x32xbf16>
    %25 = vector.shape_cast %24 : vector<1x1x8x32xbf16> to vector<8x32xbf16>
    %26 = vector.shape_cast %23 : vector<8x32xbf16> to vector<1x1x8x32xbf16>
    tpu.vector_store %arg5[%c0_17, %c0_18, %c0_19, %c0_20], %26 {strides = array<i32>} : memref<1x8x8x32xbf16, #tpu.memory_space<vmem>>, vector<1x1x8x32xbf16>,
    %c32 = arith.constant 32 : index
    %c0_21 = arith.constant 0 : index
    %27 = tpu.strided_load %arg6[%c32, %c0_21] {strides = array<i32: 2, 1>} : memref<256x32xf32, #tpu.memory_space<vmem>>, vector<8x32xf32>
    %c33 = arith.constant 33 : index
    %c0_22 = arith.constant 0 : index
    %28 = tpu.strided_load %arg6[%c33, %c0_22] {strides = array<i32: 2, 1>} : memref<256x32xf32, #tpu.memory_space<vmem>>, vector<8x32xf32>
    %c48 = arith.constant 48 : index
    %c0_23 = arith.constant 0 : index
    %29 = tpu.strided_load %arg6[%c48, %c0_23] {strides = array<i32: 2, 1>} : memref<256x32xf32, #tpu.memory_space<vmem>>, vector<8x32xf32>
    %c49 = arith.constant 49 : index
    %c0_24 = arith.constant 0 : index
    %30 = tpu.strided_load %arg6[%c49, %c0_24] {strides = array<i32: 2, 1>} : memref<256x32xf32, #tpu.memory_space<vmem>>, vector<8x32xf32>
    %31 = arith.maximumf %27, %28 : vector<8x32xf32>
    %32 = arith.maximumf %29, %30 : vector<8x32xf32>
    %33 = arith.maximumf %31, %32 : vector<8x32xf32>
    %34 = arith.truncf %33 : vector<8x32xf32> to vector<8x32xbf16>
    %c0_25 = arith.constant 0 : index
    %c1_26 = arith.constant 1 : index
    %c0_27 = arith.constant 0 : index
    %c0_28 = arith.constant 0 : index
    %35 = vector.load %arg5[%c0_25, %c1_26, %c0_27, %c0_28] : memref<1x8x8x32xbf16, #tpu.memory_space<vmem>>, vector<1x1x8x32xbf16>
    %36 = vector.shape_cast %35 : vector<1x1x8x32xbf16> to vector<8x32xbf16>
    %37 = vector.shape_cast %34 : vector<8x32xbf16> to vector<1x1x8x32xbf16>
    tpu.vector_store %arg5[%c0_25, %c1_26, %c0_27, %c0_28], %37 {strides = array<i32>} : memref<1x8x8x32xbf16, #tpu.memory_space<vmem>>, vector<1x1x8x32xbf16>,
    %c64 = arith.constant 64 : index
    %c0_29 = arith.constant 0 : index
    %38 = tpu.strided_load %arg6[%c64, %c0_29] {strides = array<i32: 2, 1>} : memref<256x32xf32, #tpu.memory_space<vmem>>, vector<8x32xf32>
    %c65 = arith.constant 65 : index
    %c0_30 = arith.constant 0 : index
    %39 = tpu.strided_load %arg6[%c65, %c0_30] {strides = array<i32: 2, 1>} : memref<256x32xf32, #tpu.memory_space<vmem>>, vector<8x32xf32>
    %c80 = arith.constant 80 : index
    %c0_31 = arith.constant 0 : index
    %40 = tpu.strided_load %arg6[%c80, %c0_31] {strides = array<i32: 2, 1>} : memref<256x32xf32, #tpu.memory_space<vmem>>, vector<8x32xf32>
    %c81 = arith.constant 81 : index
    %c0_32 = arith.constant 0 : index
    %41 = tpu.strided_load %arg6[%c81, %c0_32] {strides = array<i32: 2, 1>} : memref<256x32xf32, #tpu.memory_space<vmem>>, vector<8x32xf32>
    %42 = arith.maximumf %38, %39 : vector<8x32xf32>
    %43 = arith.maximumf %40, %41 : vector<8x32xf32>
    %44 = arith.maximumf %42, %43 : vector<8x32xf32>
    %45 = arith.truncf %44 : vector<8x32xf32> to vector<8x32xbf16>
    %c0_33 = arith.constant 0 : index
    %c2_34 = arith.constant 2 : index
    %c0_35 = arith.constant 0 : index
    %c0_36 = arith.constant 0 : index
    %46 = vector.load %arg5[%c0_33, %c2_34, %c0_35, %c0_36] : memref<1x8x8x32xbf16, #tpu.memory_space<vmem>>, vector<1x1x8x32xbf16>
    %47 = vector.shape_cast %46 : vector<1x1x8x32xbf16> to vector<8x32xbf16>
    %48 = vector.shape_cast %45 : vector<8x32xbf16> to vector<1x1x8x32xbf16>
    tpu.vector_store %arg5[%c0_33, %c2_34, %c0_35, %c0_36], %48 {strides = array<i32>} : memref<1x8x8x32xbf16, #tpu.memory_space<vmem>>, vector<1x1x8x32xbf16>,
    %c96 = arith.constant 96 : index
    %c0_37 = arith.constant 0 : index
    %49 = tpu.strided_load %arg6[%c96, %c0_37] {strides = array<i32: 2, 1>} : memref<256x32xf32, #tpu.memory_space<vmem>>, vector<8x32xf32>
    %c97 = arith.constant 97 : index
    %c0_38 = arith.constant 0 : index
    %50 = tpu.strided_load %arg6[%c97, %c0_38] {strides = array<i32: 2, 1>} : memref<256x32xf32, #tpu.memory_space<vmem>>, vector<8x32xf32>
    %c112 = arith.constant 112 : index
    %c0_39 = arith.constant 0 : index
    %51 = tpu.strided_load %arg6[%c112, %c0_39] {strides = array<i32: 2, 1>} : memref<256x32xf32, #tpu.memory_space<vmem>>, vector<8x32xf32>
    %c113 = arith.constant 113 : index
    %c0_40 = arith.constant 0 : index
    %52 = tpu.strided_load %arg6[%c113, %c0_40] {strides = array<i32: 2, 1>} : memref<256x32xf32, #tpu.memory_space<vmem>>, vector<8x32xf32>
    %53 = arith.maximumf %49, %50 : vector<8x32xf32>
    %54 = arith.maximumf %51, %52 : vector<8x32xf32>
    %55 = arith.maximumf %53, %54 : vector<8x32xf32>
    %56 = arith.truncf %55 : vector<8x32xf32> to vector<8x32xbf16>
    %c0_41 = arith.constant 0 : index
    %c3 = arith.constant 3 : index
    %c0_42 = arith.constant 0 : index
    %c0_43 = arith.constant 0 : index
    %57 = vector.load %arg5[%c0_41, %c3, %c0_42, %c0_43] : memref<1x8x8x32xbf16, #tpu.memory_space<vmem>>, vector<1x1x8x32xbf16>
    %58 = vector.shape_cast %57 : vector<1x1x8x32xbf16> to vector<8x32xbf16>
    %59 = vector.shape_cast %56 : vector<8x32xbf16> to vector<1x1x8x32xbf16>
    tpu.vector_store %arg5[%c0_41, %c3, %c0_42, %c0_43], %59 {strides = array<i32>} : memref<1x8x8x32xbf16, #tpu.memory_space<vmem>>, vector<1x1x8x32xbf16>,
    %c128 = arith.constant 128 : index
    %c0_44 = arith.constant 0 : index
    %60 = tpu.strided_load %arg6[%c128, %c0_44] {strides = array<i32: 2, 1>} : memref<256x32xf32, #tpu.memory_space<vmem>>, vector<8x32xf32>
    %c129 = arith.constant 129 : index
    %c0_45 = arith.constant 0 : index
    %61 = tpu.strided_load %arg6[%c129, %c0_45] {strides = array<i32: 2, 1>} : memref<256x32xf32, #tpu.memory_space<vmem>>, vector<8x32xf32>
    %c144 = arith.constant 144 : index
    %c0_46 = arith.constant 0 : index
    %62 = tpu.strided_load %arg6[%c144, %c0_46] {strides = array<i32: 2, 1>} : memref<256x32xf32, #tpu.memory_space<vmem>>, vector<8x32xf32>
    %c145 = arith.constant 145 : index
    %c0_47 = arith.constant 0 : index
    %63 = tpu.strided_load %arg6[%c145, %c0_47] {strides = array<i32: 2, 1>} : memref<256x32xf32, #tpu.memory_space<vmem>>, vector<8x32xf32>
    %64 = arith.maximumf %60, %61 : vector<8x32xf32>
    %65 = arith.maximumf %62, %63 : vector<8x32xf32>
    %66 = arith.maximumf %64, %65 : vector<8x32xf32>
    %67 = arith.truncf %66 : vector<8x32xf32> to vector<8x32xbf16>
    %c0_48 = arith.constant 0 : index
    %c4 = arith.constant 4 : index
    %c0_49 = arith.constant 0 : index
    %c0_50 = arith.constant 0 : index
    %68 = vector.load %arg5[%c0_48, %c4, %c0_49, %c0_50] : memref<1x8x8x32xbf16, #tpu.memory_space<vmem>>, vector<1x1x8x32xbf16>
    %69 = vector.shape_cast %68 : vector<1x1x8x32xbf16> to vector<8x32xbf16>
    %70 = vector.shape_cast %67 : vector<8x32xbf16> to vector<1x1x8x32xbf16>
    tpu.vector_store %arg5[%c0_48, %c4, %c0_49, %c0_50], %70 {strides = array<i32>} : memref<1x8x8x32xbf16, #tpu.memory_space<vmem>>, vector<1x1x8x32xbf16>,
    %c160 = arith.constant 160 : index
    %c0_51 = arith.constant 0 : index
    %71 = tpu.strided_load %arg6[%c160, %c0_51] {strides = array<i32: 2, 1>} : memref<256x32xf32, #tpu.memory_space<vmem>>, vector<8x32xf32>
    %c161 = arith.constant 161 : index
    %c0_52 = arith.constant 0 : index
    %72 = tpu.strided_load %arg6[%c161, %c0_52] {strides = array<i32: 2, 1>} : memref<256x32xf32, #tpu.memory_space<vmem>>, vector<8x32xf32>
    %c176 = arith.constant 176 : index
    %c0_53 = arith.constant 0 : index
    %73 = tpu.strided_load %arg6[%c176, %c0_53] {strides = array<i32: 2, 1>} : memref<256x32xf32, #tpu.memory_space<vmem>>, vector<8x32xf32>
    %c177 = arith.constant 177 : index
    %c0_54 = arith.constant 0 : index
    %74 = tpu.strided_load %arg6[%c177, %c0_54] {strides = array<i32: 2, 1>} : memref<256x32xf32, #tpu.memory_space<vmem>>, vector<8x32xf32>
    %75 = arith.maximumf %71, %72 : vector<8x32xf32>
    %76 = arith.maximumf %73, %74 : vector<8x32xf32>
    %77 = arith.maximumf %75, %76 : vector<8x32xf32>
    %78 = arith.truncf %77 : vector<8x32xf32> to vector<8x32xbf16>
    %c0_55 = arith.constant 0 : index
    %c5 = arith.constant 5 : index
    %c0_56 = arith.constant 0 : index
    %c0_57 = arith.constant 0 : index
    %79 = vector.load %arg5[%c0_55, %c5, %c0_56, %c0_57] : memref<1x8x8x32xbf16, #tpu.memory_space<vmem>>, vector<1x1x8x32xbf16>
    %80 = vector.shape_cast %79 : vector<1x1x8x32xbf16> to vector<8x32xbf16>
    %81 = vector.shape_cast %78 : vector<8x32xbf16> to vector<1x1x8x32xbf16>
    tpu.vector_store %arg5[%c0_55, %c5, %c0_56, %c0_57], %81 {strides = array<i32>} : memref<1x8x8x32xbf16, #tpu.memory_space<vmem>>, vector<1x1x8x32xbf16>,
    %c192 = arith.constant 192 : index
    %c0_58 = arith.constant 0 : index
    %82 = tpu.strided_load %arg6[%c192, %c0_58] {strides = array<i32: 2, 1>} : memref<256x32xf32, #tpu.memory_space<vmem>>, vector<8x32xf32>
    %c193 = arith.constant 193 : index
    %c0_59 = arith.constant 0 : index
    %83 = tpu.strided_load %arg6[%c193, %c0_59] {strides = array<i32: 2, 1>} : memref<256x32xf32, #tpu.memory_space<vmem>>, vector<8x32xf32>
    %c208 = arith.constant 208 : index
    %c0_60 = arith.constant 0 : index
    %84 = tpu.strided_load %arg6[%c208, %c0_60] {strides = array<i32: 2, 1>} : memref<256x32xf32, #tpu.memory_space<vmem>>, vector<8x32xf32>
    %c209 = arith.constant 209 : index
    %c0_61 = arith.constant 0 : index
    %85 = tpu.strided_load %arg6[%c209, %c0_61] {strides = array<i32: 2, 1>} : memref<256x32xf32, #tpu.memory_space<vmem>>, vector<8x32xf32>
    %86 = arith.maximumf %82, %83 : vector<8x32xf32>
    %87 = arith.maximumf %84, %85 : vector<8x32xf32>
    %88 = arith.maximumf %86, %87 : vector<8x32xf32>
    %89 = arith.truncf %88 : vector<8x32xf32> to vector<8x32xbf16>
    %c0_62 = arith.constant 0 : index
    %c6 = arith.constant 6 : index
    %c0_63 = arith.constant 0 : index
    %c0_64 = arith.constant 0 : index
    %90 = vector.load %arg5[%c0_62, %c6, %c0_63, %c0_64] : memref<1x8x8x32xbf16, #tpu.memory_space<vmem>>, vector<1x1x8x32xbf16>
    %91 = vector.shape_cast %90 : vector<1x1x8x32xbf16> to vector<8x32xbf16>
    %92 = vector.shape_cast %89 : vector<8x32xbf16> to vector<1x1x8x32xbf16>
    tpu.vector_store %arg5[%c0_62, %c6, %c0_63, %c0_64], %92 {strides = array<i32>} : memref<1x8x8x32xbf16, #tpu.memory_space<vmem>>, vector<1x1x8x32xbf16>,
    %c224 = arith.constant 224 : index
    %c0_65 = arith.constant 0 : index
    %93 = tpu.strided_load %arg6[%c224, %c0_65] {strides = array<i32: 2, 1>} : memref<256x32xf32, #tpu.memory_space<vmem>>, vector<8x32xf32>
    %c225 = arith.constant 225 : index
    %c0_66 = arith.constant 0 : index
    %94 = tpu.strided_load %arg6[%c225, %c0_66] {strides = array<i32: 2, 1>} : memref<256x32xf32, #tpu.memory_space<vmem>>, vector<8x32xf32>
    %c240 = arith.constant 240 : index
    %c0_67 = arith.constant 0 : index
    %95 = tpu.strided_load %arg6[%c240, %c0_67] {strides = array<i32: 2, 1>} : memref<256x32xf32, #tpu.memory_space<vmem>>, vector<8x32xf32>
    %c241 = arith.constant 241 : index
    %c0_68 = arith.constant 0 : index
    %96 = tpu.strided_load %arg6[%c241, %c0_68] {strides = array<i32: 2, 1>} : memref<256x32xf32, #tpu.memory_space<vmem>>, vector<8x32xf32>
    %97 = arith.maximumf %93, %94 : vector<8x32xf32>
    %98 = arith.maximumf %95, %96 : vector<8x32xf32>
    %99 = arith.maximumf %97, %98 : vector<8x32xf32>
    %100 = arith.truncf %99 : vector<8x32xf32> to vector<8x32xbf16>
    %c0_69 = arith.constant 0 : index
    %c7 = arith.constant 7 : index
    %c0_70 = arith.constant 0 : index
    %c0_71 = arith.constant 0 : index
    %101 = vector.load %arg5[%c0_69, %c7, %c0_70, %c0_71] : memref<1x8x8x32xbf16, #tpu.memory_space<vmem>>, vector<1x1x8x32xbf16>
    %102 = vector.shape_cast %101 : vector<1x1x8x32xbf16> to vector<8x32xbf16>
    %103 = vector.shape_cast %100 : vector<8x32xbf16> to vector<1x1x8x32xbf16>
    tpu.vector_store %arg5[%c0_69, %c7, %c0_70, %c0_71], %103 {strides = array<i32>} : memref<1x8x8x32xbf16, #tpu.memory_space<vmem>>, vector<1x1x8x32xbf16>,
    return
  }
  func.func @transform_0(%arg0: i32, %arg1: i32) -> (i32, i32, i32) {
    %c0_i32 = arith.constant 0 : i32
    %c0_i32_0 = arith.constant 0 : i32
    return %arg0, %arg1, %c0_i32 : i32, i32, i32
  }
  func.func @transform_1(%arg0: i32, %arg1: i32) -> (i32, i32) {
    %c0_i32 = arith.constant 0 : i32
    %c0_i32_0 = arith.constant 0 : i32
    %c0_i32_1 = arith.constant 0 : i32
    return %c0_i32, %c0_i32_0 : i32, i32
  }
  func.func @transform_2(%arg0: i32, %arg1: i32) -> (i32, i32) {
    %c0_i32 = arith.constant 0 : i32
    %c0_i32_0 = arith.constant 0 : i32
    %c0_i32_1 = arith.constant 0 : i32
    return %c0_i32, %c0_i32_0 : i32, i32
  }
  func.func @transform_3(%arg0: i32, %arg1: i32) -> (i32, i32, i32, i32) {
    %c0_i32 = arith.constant 0 : i32
    %c0_i32_0 = arith.constant 0 : i32
    %c0_i32_1 = arith.constant 0 : i32
    return %arg0, %arg1, %c0_i32, %c0_i32_0 : i32, i32, i32, i32
  }
}

module attributes {stable_mosaic.version = 11 : i64} {
  func.func @_conv_pool_kernel(%arg0: i32, %arg1: i32, %arg2: memref<1x64x288xbf16, #tpu.memory_space<vmem>>, %arg3: memref<288x64xbf16, #tpu.memory_space<vmem>>, %arg4: memref<3x64xf32, #tpu.memory_space<vmem>>, %arg5: memref<1x4x4x64xbf16, #tpu.memory_space<vmem>>, %arg6: memref<64x64xf32, #tpu.memory_space<vmem>>) attributes {dimension_semantics = [#tpu.dimension_semantics<parallel>, #tpu.dimension_semantics<parallel>], iteration_bounds = array<i64: 2, 1>, scalar_prefetch = 0 : i64, scratch_operands = 1 : i64, tpu.core_type = #tpu.core_type<tc>, window_params = [{transform_indices = @transform_0, window_bounds = array<i64: 1, 64, 288>}, {pipeline_mode = #tpu.pipeline_mode<synchronous>, transform_indices = @transform_1, window_bounds = array<i64: 288, 64>}, {pipeline_mode = #tpu.pipeline_mode<synchronous>, transform_indices = @transform_2, window_bounds = array<i64: 3, 64>}, {transform_indices = @transform_3, window_bounds = array<i64: 1, 4, 4, 64>}]} {
    %c0 = arith.constant 0 : index
    %c0_0 = arith.constant 0 : index
    %c0_1 = arith.constant 0 : index
    %0 = vector.load %arg2[%c0, %c0_0, %c0_1] : memref<1x64x288xbf16, #tpu.memory_space<vmem>>, vector<1x64x288xbf16>
    %1 = vector.shape_cast %0 : vector<1x64x288xbf16> to vector<64x288xbf16>
    %c0_2 = arith.constant 0 : index
    %c0_3 = arith.constant 0 : index
    %2 = vector.load %arg3[%c0_2, %c0_3] : memref<288x64xbf16, #tpu.memory_space<vmem>>, vector<288x64xbf16>
    %cst = arith.constant dense<0.000000e+00> : vector<64x64xf32>
    %3 = tpu.matmul %1, %2, %cst {dimension_numbers = #tpu.dot_dimension_numbers<[1], [0], [0], [1], [0, 0, 1, 1], [], []>} : vector<64x288xbf16>, vector<288x64xbf16>, vector<64x64xf32> -> vector<64x64xf32>
    %c0_4 = arith.constant 0 : index
    %c0_5 = arith.constant 0 : index
    %4 = vector.load %arg4[%c0_4, %c0_5] : memref<3x64xf32, #tpu.memory_space<vmem>>, vector<1x64xf32>
    %c1 = arith.constant 1 : index
    %c0_6 = arith.constant 0 : index
    %5 = vector.load %arg4[%c1, %c0_6] : memref<3x64xf32, #tpu.memory_space<vmem>>, vector<1x64xf32>
    %c2 = arith.constant 2 : index
    %c0_7 = arith.constant 0 : index
    %6 = vector.load %arg4[%c2, %c0_7] : memref<3x64xf32, #tpu.memory_space<vmem>>, vector<1x64xf32>
    %7 = vector.broadcast %4 : vector<1x64xf32> to vector<64x64xf32>
    %8 = arith.addf %3, %7 : vector<64x64xf32>
    %cst_8 = arith.constant 0.000000e+00 : f32
    %9 = vector.broadcast %cst_8 : f32 to vector<64x64xf32>
    %10 = arith.maximumf %8, %9 : vector<64x64xf32>
    %11 = vector.broadcast %5 : vector<1x64xf32> to vector<64x64xf32>
    %12 = arith.mulf %10, %11 : vector<64x64xf32>
    %13 = vector.broadcast %6 : vector<1x64xf32> to vector<64x64xf32>
    %14 = arith.addf %12, %13 : vector<64x64xf32>
    %c0_9 = arith.constant 0 : index
    %c0_10 = arith.constant 0 : index
    %15 = vector.load %arg6[%c0_9, %c0_10] : memref<64x64xf32, #tpu.memory_space<vmem>>, vector<64x64xf32>
    tpu.vector_store %arg6[%c0_9, %c0_10], %14 {strides = array<i32>} : memref<64x64xf32, #tpu.memory_space<vmem>>, vector<64x64xf32>,
    %c0_11 = arith.constant 0 : index
    %c0_12 = arith.constant 0 : index
    %16 = tpu.strided_load %arg6[%c0_11, %c0_12] {strides = array<i32: 2, 1>} : memref<64x64xf32, #tpu.memory_space<vmem>>, vector<4x64xf32>
    %c1_13 = arith.constant 1 : index
    %c0_14 = arith.constant 0 : index
    %17 = tpu.strided_load %arg6[%c1_13, %c0_14] {strides = array<i32: 2, 1>} : memref<64x64xf32, #tpu.memory_space<vmem>>, vector<4x64xf32>
    %c8 = arith.constant 8 : index
    %c0_15 = arith.constant 0 : index
    %18 = tpu.strided_load %arg6[%c8, %c0_15] {strides = array<i32: 2, 1>} : memref<64x64xf32, #tpu.memory_space<vmem>>, vector<4x64xf32>
    %c9 = arith.constant 9 : index
    %c0_16 = arith.constant 0 : index
    %19 = tpu.strided_load %arg6[%c9, %c0_16] {strides = array<i32: 2, 1>} : memref<64x64xf32, #tpu.memory_space<vmem>>, vector<4x64xf32>
    %20 = arith.maximumf %16, %17 : vector<4x64xf32>
    %21 = arith.maximumf %18, %19 : vector<4x64xf32>
    %22 = arith.maximumf %20, %21 : vector<4x64xf32>
    %23 = arith.truncf %22 : vector<4x64xf32> to vector<4x64xbf16>
    %c0_17 = arith.constant 0 : index
    %c0_18 = arith.constant 0 : index
    %c0_19 = arith.constant 0 : index
    %c0_20 = arith.constant 0 : index
    %24 = vector.load %arg5[%c0_17, %c0_18, %c0_19, %c0_20] : memref<1x4x4x64xbf16, #tpu.memory_space<vmem>>, vector<1x1x4x64xbf16>
    %25 = vector.shape_cast %24 : vector<1x1x4x64xbf16> to vector<4x64xbf16>
    %26 = vector.shape_cast %23 : vector<4x64xbf16> to vector<1x1x4x64xbf16>
    tpu.vector_store %arg5[%c0_17, %c0_18, %c0_19, %c0_20], %26 {strides = array<i32>} : memref<1x4x4x64xbf16, #tpu.memory_space<vmem>>, vector<1x1x4x64xbf16>,
    %c16 = arith.constant 16 : index
    %c0_21 = arith.constant 0 : index
    %27 = tpu.strided_load %arg6[%c16, %c0_21] {strides = array<i32: 2, 1>} : memref<64x64xf32, #tpu.memory_space<vmem>>, vector<4x64xf32>
    %c17 = arith.constant 17 : index
    %c0_22 = arith.constant 0 : index
    %28 = tpu.strided_load %arg6[%c17, %c0_22] {strides = array<i32: 2, 1>} : memref<64x64xf32, #tpu.memory_space<vmem>>, vector<4x64xf32>
    %c24 = arith.constant 24 : index
    %c0_23 = arith.constant 0 : index
    %29 = tpu.strided_load %arg6[%c24, %c0_23] {strides = array<i32: 2, 1>} : memref<64x64xf32, #tpu.memory_space<vmem>>, vector<4x64xf32>
    %c25 = arith.constant 25 : index
    %c0_24 = arith.constant 0 : index
    %30 = tpu.strided_load %arg6[%c25, %c0_24] {strides = array<i32: 2, 1>} : memref<64x64xf32, #tpu.memory_space<vmem>>, vector<4x64xf32>
    %31 = arith.maximumf %27, %28 : vector<4x64xf32>
    %32 = arith.maximumf %29, %30 : vector<4x64xf32>
    %33 = arith.maximumf %31, %32 : vector<4x64xf32>
    %34 = arith.truncf %33 : vector<4x64xf32> to vector<4x64xbf16>
    %c0_25 = arith.constant 0 : index
    %c1_26 = arith.constant 1 : index
    %c0_27 = arith.constant 0 : index
    %c0_28 = arith.constant 0 : index
    %35 = vector.load %arg5[%c0_25, %c1_26, %c0_27, %c0_28] : memref<1x4x4x64xbf16, #tpu.memory_space<vmem>>, vector<1x1x4x64xbf16>
    %36 = vector.shape_cast %35 : vector<1x1x4x64xbf16> to vector<4x64xbf16>
    %37 = vector.shape_cast %34 : vector<4x64xbf16> to vector<1x1x4x64xbf16>
    tpu.vector_store %arg5[%c0_25, %c1_26, %c0_27, %c0_28], %37 {strides = array<i32>} : memref<1x4x4x64xbf16, #tpu.memory_space<vmem>>, vector<1x1x4x64xbf16>,
    %c32 = arith.constant 32 : index
    %c0_29 = arith.constant 0 : index
    %38 = tpu.strided_load %arg6[%c32, %c0_29] {strides = array<i32: 2, 1>} : memref<64x64xf32, #tpu.memory_space<vmem>>, vector<4x64xf32>
    %c33 = arith.constant 33 : index
    %c0_30 = arith.constant 0 : index
    %39 = tpu.strided_load %arg6[%c33, %c0_30] {strides = array<i32: 2, 1>} : memref<64x64xf32, #tpu.memory_space<vmem>>, vector<4x64xf32>
    %c40 = arith.constant 40 : index
    %c0_31 = arith.constant 0 : index
    %40 = tpu.strided_load %arg6[%c40, %c0_31] {strides = array<i32: 2, 1>} : memref<64x64xf32, #tpu.memory_space<vmem>>, vector<4x64xf32>
    %c41 = arith.constant 41 : index
    %c0_32 = arith.constant 0 : index
    %41 = tpu.strided_load %arg6[%c41, %c0_32] {strides = array<i32: 2, 1>} : memref<64x64xf32, #tpu.memory_space<vmem>>, vector<4x64xf32>
    %42 = arith.maximumf %38, %39 : vector<4x64xf32>
    %43 = arith.maximumf %40, %41 : vector<4x64xf32>
    %44 = arith.maximumf %42, %43 : vector<4x64xf32>
    %45 = arith.truncf %44 : vector<4x64xf32> to vector<4x64xbf16>
    %c0_33 = arith.constant 0 : index
    %c2_34 = arith.constant 2 : index
    %c0_35 = arith.constant 0 : index
    %c0_36 = arith.constant 0 : index
    %46 = vector.load %arg5[%c0_33, %c2_34, %c0_35, %c0_36] : memref<1x4x4x64xbf16, #tpu.memory_space<vmem>>, vector<1x1x4x64xbf16>
    %47 = vector.shape_cast %46 : vector<1x1x4x64xbf16> to vector<4x64xbf16>
    %48 = vector.shape_cast %45 : vector<4x64xbf16> to vector<1x1x4x64xbf16>
    tpu.vector_store %arg5[%c0_33, %c2_34, %c0_35, %c0_36], %48 {strides = array<i32>} : memref<1x4x4x64xbf16, #tpu.memory_space<vmem>>, vector<1x1x4x64xbf16>,
    %c48 = arith.constant 48 : index
    %c0_37 = arith.constant 0 : index
    %49 = tpu.strided_load %arg6[%c48, %c0_37] {strides = array<i32: 2, 1>} : memref<64x64xf32, #tpu.memory_space<vmem>>, vector<4x64xf32>
    %c49 = arith.constant 49 : index
    %c0_38 = arith.constant 0 : index
    %50 = tpu.strided_load %arg6[%c49, %c0_38] {strides = array<i32: 2, 1>} : memref<64x64xf32, #tpu.memory_space<vmem>>, vector<4x64xf32>
    %c56 = arith.constant 56 : index
    %c0_39 = arith.constant 0 : index
    %51 = tpu.strided_load %arg6[%c56, %c0_39] {strides = array<i32: 2, 1>} : memref<64x64xf32, #tpu.memory_space<vmem>>, vector<4x64xf32>
    %c57 = arith.constant 57 : index
    %c0_40 = arith.constant 0 : index
    %52 = tpu.strided_load %arg6[%c57, %c0_40] {strides = array<i32: 2, 1>} : memref<64x64xf32, #tpu.memory_space<vmem>>, vector<4x64xf32>
    %53 = arith.maximumf %49, %50 : vector<4x64xf32>
    %54 = arith.maximumf %51, %52 : vector<4x64xf32>
    %55 = arith.maximumf %53, %54 : vector<4x64xf32>
    %56 = arith.truncf %55 : vector<4x64xf32> to vector<4x64xbf16>
    %c0_41 = arith.constant 0 : index
    %c3 = arith.constant 3 : index
    %c0_42 = arith.constant 0 : index
    %c0_43 = arith.constant 0 : index
    %57 = vector.load %arg5[%c0_41, %c3, %c0_42, %c0_43] : memref<1x4x4x64xbf16, #tpu.memory_space<vmem>>, vector<1x1x4x64xbf16>
    %58 = vector.shape_cast %57 : vector<1x1x4x64xbf16> to vector<4x64xbf16>
    %59 = vector.shape_cast %56 : vector<4x64xbf16> to vector<1x1x4x64xbf16>
    tpu.vector_store %arg5[%c0_41, %c3, %c0_42, %c0_43], %59 {strides = array<i32>} : memref<1x4x4x64xbf16, #tpu.memory_space<vmem>>, vector<1x1x4x64xbf16>,
    return
  }
  func.func @transform_0(%arg0: i32, %arg1: i32) -> (i32, i32, i32) {
    %c0_i32 = arith.constant 0 : i32
    %c0_i32_0 = arith.constant 0 : i32
    return %arg0, %arg1, %c0_i32 : i32, i32, i32
  }
  func.func @transform_1(%arg0: i32, %arg1: i32) -> (i32, i32) {
    %c0_i32 = arith.constant 0 : i32
    %c0_i32_0 = arith.constant 0 : i32
    %c0_i32_1 = arith.constant 0 : i32
    return %c0_i32, %c0_i32_0 : i32, i32
  }
  func.func @transform_2(%arg0: i32, %arg1: i32) -> (i32, i32) {
    %c0_i32 = arith.constant 0 : i32
    %c0_i32_0 = arith.constant 0 : i32
    %c0_i32_1 = arith.constant 0 : i32
    return %c0_i32, %c0_i32_0 : i32, i32
  }
  func.func @transform_3(%arg0: i32, %arg1: i32) -> (i32, i32, i32, i32) {
    %c0_i32 = arith.constant 0 : i32
    %c0_i32_0 = arith.constant 0 : i32
    %c0_i32_1 = arith.constant 0 : i32
    return %arg0, %arg1, %c0_i32, %c0_i32_0 : i32, i32, i32, i32
  }
}

module attributes {stable_mosaic.version = 11 : i64} {
  func.func @_tail_kernel(%arg0: i32, %arg1: memref<1x42x64xbf16, #tpu.memory_space<vmem>>, %arg2: memref<9x64x128xbf16, #tpu.memory_space<vmem>>, %arg3: memref<3x128xf32, #tpu.memory_space<vmem>>, %arg4: memref<9x128x128xbf16, #tpu.memory_space<vmem>>, %arg5: memref<3x128xf32, #tpu.memory_space<vmem>>, %arg6: memref<128x128xbf16, #tpu.memory_space<vmem>>, %arg7: memref<1x128xf32, #tpu.memory_space<vmem>>, %arg8: memref<128x64xbf16, #tpu.memory_space<vmem>>, %arg9: memref<1x64xf32, #tpu.memory_space<vmem>>, %arg10: memref<64x18xbf16, #tpu.memory_space<vmem>>, %arg11: memref<1x18xf32, #tpu.memory_space<vmem>>, %arg12: memref<1x1x18xf32, #tpu.memory_space<vmem>>, %arg13: memref<24x128xf32, #tpu.memory_space<vmem>>, %arg14: memref<20x128xf32, #tpu.memory_space<vmem>>, %arg15: memref<8x128xf32, #tpu.memory_space<vmem>>) attributes {dimension_semantics = [#tpu.dimension_semantics<parallel>], iteration_bounds = array<i64: 2>, scalar_prefetch = 0 : i64, scratch_operands = 3 : i64, tpu.core_type = #tpu.core_type<tc>, window_params = [{transform_indices = @transform_0, window_bounds = array<i64: 1, 42, 64>}, {pipeline_mode = #tpu.pipeline_mode<synchronous>, transform_indices = @transform_1, window_bounds = array<i64: 9, 64, 128>}, {pipeline_mode = #tpu.pipeline_mode<synchronous>, transform_indices = @transform_2, window_bounds = array<i64: 3, 128>}, {pipeline_mode = #tpu.pipeline_mode<synchronous>, transform_indices = @transform_3, window_bounds = array<i64: 9, 128, 128>}, {pipeline_mode = #tpu.pipeline_mode<synchronous>, transform_indices = @transform_4, window_bounds = array<i64: 3, 128>}, {pipeline_mode = #tpu.pipeline_mode<synchronous>, transform_indices = @transform_5, window_bounds = array<i64: 128, 128>}, {pipeline_mode = #tpu.pipeline_mode<synchronous>, transform_indices = @transform_6, window_bounds = array<i64: 1, 128>}, {pipeline_mode = #tpu.pipeline_mode<synchronous>, transform_indices = @transform_7, window_bounds = array<i64: 128, 64>}, {pipeline_mode = #tpu.pipeline_mode<synchronous>, transform_indices = @transform_8, window_bounds = array<i64: 1, 64>}, {pipeline_mode = #tpu.pipeline_mode<synchronous>, transform_indices = @transform_9, window_bounds = array<i64: 64, 18>}, {pipeline_mode = #tpu.pipeline_mode<synchronous>, transform_indices = @transform_10, window_bounds = array<i64: 1, 18>}, {transform_indices = @transform_11, window_bounds = array<i64: 1, 1, 18>}]} {
    %c0 = arith.constant 0 : index
    %c0_0 = arith.constant 0 : index
    %c0_1 = arith.constant 0 : index
    %0 = vector.load %arg1[%c0, %c0_0, %c0_1] : memref<1x42x64xbf16, #tpu.memory_space<vmem>>, vector<1x24x64xbf16>
    %1 = vector.shape_cast %0 : vector<1x24x64xbf16> to vector<24x64xbf16>
    %c0_2 = arith.constant 0 : index
    %c0_3 = arith.constant 0 : index
    %c0_4 = arith.constant 0 : index
    %2 = vector.load %arg2[%c0_2, %c0_3, %c0_4] : memref<9x64x128xbf16, #tpu.memory_space<vmem>>, vector<1x64x128xbf16>
    %3 = vector.shape_cast %2 : vector<1x64x128xbf16> to vector<64x128xbf16>
    %cst = arith.constant dense<0.000000e+00> : vector<24x128xf32>
    %4 = tpu.matmul %1, %3, %cst {dimension_numbers = #tpu.dot_dimension_numbers<[1], [0], [0], [1], [0, 0, 1, 1], [], []>} : vector<24x64xbf16>, vector<64x128xbf16>, vector<24x128xf32> -> vector<24x128xf32>
    %c0_5 = arith.constant 0 : index
    %c1 = arith.constant 1 : index
    %c0_6 = arith.constant 0 : index
    %5 = vector.load %arg1[%c0_5, %c1, %c0_6] : memref<1x42x64xbf16, #tpu.memory_space<vmem>>, vector<1x24x64xbf16>
    %6 = vector.shape_cast %5 : vector<1x24x64xbf16> to vector<24x64xbf16>
    %c1_7 = arith.constant 1 : index
    %c0_8 = arith.constant 0 : index
    %c0_9 = arith.constant 0 : index
    %7 = vector.load %arg2[%c1_7, %c0_8, %c0_9] : memref<9x64x128xbf16, #tpu.memory_space<vmem>>, vector<1x64x128xbf16>
    %8 = vector.shape_cast %7 : vector<1x64x128xbf16> to vector<64x128xbf16>
    %cst_10 = arith.constant dense<0.000000e+00> : vector<24x128xf32>
    %9 = tpu.matmul %6, %8, %cst_10 {dimension_numbers = #tpu.dot_dimension_numbers<[1], [0], [0], [1], [0, 0, 1, 1], [], []>} : vector<24x64xbf16>, vector<64x128xbf16>, vector<24x128xf32> -> vector<24x128xf32>
    %10 = arith.addf %4, %9 : vector<24x128xf32>
    %c0_11 = arith.constant 0 : index
    %c2 = arith.constant 2 : index
    %c0_12 = arith.constant 0 : index
    %11 = vector.load %arg1[%c0_11, %c2, %c0_12] : memref<1x42x64xbf16, #tpu.memory_space<vmem>>, vector<1x24x64xbf16>
    %12 = vector.shape_cast %11 : vector<1x24x64xbf16> to vector<24x64xbf16>
    %c2_13 = arith.constant 2 : index
    %c0_14 = arith.constant 0 : index
    %c0_15 = arith.constant 0 : index
    %13 = vector.load %arg2[%c2_13, %c0_14, %c0_15] : memref<9x64x128xbf16, #tpu.memory_space<vmem>>, vector<1x64x128xbf16>
    %14 = vector.shape_cast %13 : vector<1x64x128xbf16> to vector<64x128xbf16>
    %cst_16 = arith.constant dense<0.000000e+00> : vector<24x128xf32>
    %15 = tpu.matmul %12, %14, %cst_16 {dimension_numbers = #tpu.dot_dimension_numbers<[1], [0], [0], [1], [0, 0, 1, 1], [], []>} : vector<24x64xbf16>, vector<64x128xbf16>, vector<24x128xf32> -> vector<24x128xf32>
    %16 = arith.addf %10, %15 : vector<24x128xf32>
    %c0_17 = arith.constant 0 : index
    %c6 = arith.constant 6 : index
    %c0_18 = arith.constant 0 : index
    %17 = vector.load %arg1[%c0_17, %c6, %c0_18] : memref<1x42x64xbf16, #tpu.memory_space<vmem>>, vector<1x24x64xbf16>
    %18 = vector.shape_cast %17 : vector<1x24x64xbf16> to vector<24x64xbf16>
    %c3 = arith.constant 3 : index
    %c0_19 = arith.constant 0 : index
    %c0_20 = arith.constant 0 : index
    %19 = vector.load %arg2[%c3, %c0_19, %c0_20] : memref<9x64x128xbf16, #tpu.memory_space<vmem>>, vector<1x64x128xbf16>
    %20 = vector.shape_cast %19 : vector<1x64x128xbf16> to vector<64x128xbf16>
    %cst_21 = arith.constant dense<0.000000e+00> : vector<24x128xf32>
    %21 = tpu.matmul %18, %20, %cst_21 {dimension_numbers = #tpu.dot_dimension_numbers<[1], [0], [0], [1], [0, 0, 1, 1], [], []>} : vector<24x64xbf16>, vector<64x128xbf16>, vector<24x128xf32> -> vector<24x128xf32>
    %22 = arith.addf %16, %21 : vector<24x128xf32>
    %c0_22 = arith.constant 0 : index
    %c7 = arith.constant 7 : index
    %c0_23 = arith.constant 0 : index
    %23 = vector.load %arg1[%c0_22, %c7, %c0_23] : memref<1x42x64xbf16, #tpu.memory_space<vmem>>, vector<1x24x64xbf16>
    %24 = vector.shape_cast %23 : vector<1x24x64xbf16> to vector<24x64xbf16>
    %c4 = arith.constant 4 : index
    %c0_24 = arith.constant 0 : index
    %c0_25 = arith.constant 0 : index
    %25 = vector.load %arg2[%c4, %c0_24, %c0_25] : memref<9x64x128xbf16, #tpu.memory_space<vmem>>, vector<1x64x128xbf16>
    %26 = vector.shape_cast %25 : vector<1x64x128xbf16> to vector<64x128xbf16>
    %cst_26 = arith.constant dense<0.000000e+00> : vector<24x128xf32>
    %27 = tpu.matmul %24, %26, %cst_26 {dimension_numbers = #tpu.dot_dimension_numbers<[1], [0], [0], [1], [0, 0, 1, 1], [], []>} : vector<24x64xbf16>, vector<64x128xbf16>, vector<24x128xf32> -> vector<24x128xf32>
    %28 = arith.addf %22, %27 : vector<24x128xf32>
    %c0_27 = arith.constant 0 : index
    %c8 = arith.constant 8 : index
    %c0_28 = arith.constant 0 : index
    %29 = vector.load %arg1[%c0_27, %c8, %c0_28] : memref<1x42x64xbf16, #tpu.memory_space<vmem>>, vector<1x24x64xbf16>
    %30 = vector.shape_cast %29 : vector<1x24x64xbf16> to vector<24x64xbf16>
    %c5 = arith.constant 5 : index
    %c0_29 = arith.constant 0 : index
    %c0_30 = arith.constant 0 : index
    %31 = vector.load %arg2[%c5, %c0_29, %c0_30] : memref<9x64x128xbf16, #tpu.memory_space<vmem>>, vector<1x64x128xbf16>
    %32 = vector.shape_cast %31 : vector<1x64x128xbf16> to vector<64x128xbf16>
    %cst_31 = arith.constant dense<0.000000e+00> : vector<24x128xf32>
    %33 = tpu.matmul %30, %32, %cst_31 {dimension_numbers = #tpu.dot_dimension_numbers<[1], [0], [0], [1], [0, 0, 1, 1], [], []>} : vector<24x64xbf16>, vector<64x128xbf16>, vector<24x128xf32> -> vector<24x128xf32>
    %34 = arith.addf %28, %33 : vector<24x128xf32>
    %c0_32 = arith.constant 0 : index
    %c12 = arith.constant 12 : index
    %c0_33 = arith.constant 0 : index
    %35 = vector.load %arg1[%c0_32, %c12, %c0_33] : memref<1x42x64xbf16, #tpu.memory_space<vmem>>, vector<1x24x64xbf16>
    %36 = vector.shape_cast %35 : vector<1x24x64xbf16> to vector<24x64xbf16>
    %c6_34 = arith.constant 6 : index
    %c0_35 = arith.constant 0 : index
    %c0_36 = arith.constant 0 : index
    %37 = vector.load %arg2[%c6_34, %c0_35, %c0_36] : memref<9x64x128xbf16, #tpu.memory_space<vmem>>, vector<1x64x128xbf16>
    %38 = vector.shape_cast %37 : vector<1x64x128xbf16> to vector<64x128xbf16>
    %cst_37 = arith.constant dense<0.000000e+00> : vector<24x128xf32>
    %39 = tpu.matmul %36, %38, %cst_37 {dimension_numbers = #tpu.dot_dimension_numbers<[1], [0], [0], [1], [0, 0, 1, 1], [], []>} : vector<24x64xbf16>, vector<64x128xbf16>, vector<24x128xf32> -> vector<24x128xf32>
    %40 = arith.addf %34, %39 : vector<24x128xf32>
    %c0_38 = arith.constant 0 : index
    %c13 = arith.constant 13 : index
    %c0_39 = arith.constant 0 : index
    %41 = vector.load %arg1[%c0_38, %c13, %c0_39] : memref<1x42x64xbf16, #tpu.memory_space<vmem>>, vector<1x24x64xbf16>
    %42 = vector.shape_cast %41 : vector<1x24x64xbf16> to vector<24x64xbf16>
    %c7_40 = arith.constant 7 : index
    %c0_41 = arith.constant 0 : index
    %c0_42 = arith.constant 0 : index
    %43 = vector.load %arg2[%c7_40, %c0_41, %c0_42] : memref<9x64x128xbf16, #tpu.memory_space<vmem>>, vector<1x64x128xbf16>
    %44 = vector.shape_cast %43 : vector<1x64x128xbf16> to vector<64x128xbf16>
    %cst_43 = arith.constant dense<0.000000e+00> : vector<24x128xf32>
    %45 = tpu.matmul %42, %44, %cst_43 {dimension_numbers = #tpu.dot_dimension_numbers<[1], [0], [0], [1], [0, 0, 1, 1], [], []>} : vector<24x64xbf16>, vector<64x128xbf16>, vector<24x128xf32> -> vector<24x128xf32>
    %46 = arith.addf %40, %45 : vector<24x128xf32>
    %c0_44 = arith.constant 0 : index
    %c14 = arith.constant 14 : index
    %c0_45 = arith.constant 0 : index
    %47 = vector.load %arg1[%c0_44, %c14, %c0_45] : memref<1x42x64xbf16, #tpu.memory_space<vmem>>, vector<1x24x64xbf16>
    %48 = vector.shape_cast %47 : vector<1x24x64xbf16> to vector<24x64xbf16>
    %c8_46 = arith.constant 8 : index
    %c0_47 = arith.constant 0 : index
    %c0_48 = arith.constant 0 : index
    %49 = vector.load %arg2[%c8_46, %c0_47, %c0_48] : memref<9x64x128xbf16, #tpu.memory_space<vmem>>, vector<1x64x128xbf16>
    %50 = vector.shape_cast %49 : vector<1x64x128xbf16> to vector<64x128xbf16>
    %cst_49 = arith.constant dense<0.000000e+00> : vector<24x128xf32>
    %51 = tpu.matmul %48, %50, %cst_49 {dimension_numbers = #tpu.dot_dimension_numbers<[1], [0], [0], [1], [0, 0, 1, 1], [], []>} : vector<24x64xbf16>, vector<64x128xbf16>, vector<24x128xf32> -> vector<24x128xf32>
    %52 = arith.addf %46, %51 : vector<24x128xf32>
    %c0_50 = arith.constant 0 : index
    %c0_51 = arith.constant 0 : index
    %53 = vector.load %arg3[%c0_50, %c0_51] : memref<3x128xf32, #tpu.memory_space<vmem>>, vector<1x128xf32>
    %c1_52 = arith.constant 1 : index
    %c0_53 = arith.constant 0 : index
    %54 = vector.load %arg3[%c1_52, %c0_53] : memref<3x128xf32, #tpu.memory_space<vmem>>, vector<1x128xf32>
    %c2_54 = arith.constant 2 : index
    %c0_55 = arith.constant 0 : index
    %55 = vector.load %arg3[%c2_54, %c0_55] : memref<3x128xf32, #tpu.memory_space<vmem>>, vector<1x128xf32>
    %56 = vector.broadcast %53 : vector<1x128xf32> to vector<24x128xf32>
    %57 = arith.addf %52, %56 : vector<24x128xf32>
    %cst_56 = arith.constant 0.000000e+00 : f32
    %58 = vector.broadcast %cst_56 : f32 to vector<24x128xf32>
    %59 = arith.maximumf %57, %58 : vector<24x128xf32>
    %60 = vector.broadcast %54 : vector<1x128xf32> to vector<24x128xf32>
    %61 = arith.mulf %59, %60 : vector<24x128xf32>
    %62 = vector.broadcast %55 : vector<1x128xf32> to vector<24x128xf32>
    %63 = arith.addf %61, %62 : vector<24x128xf32>
    %c0_57 = arith.constant 0 : index
    %c0_58 = arith.constant 0 : index
    %64 = vector.load %arg13[%c0_57, %c0_58] : memref<24x128xf32, #tpu.memory_space<vmem>>, vector<24x128xf32>
    tpu.vector_store %arg13[%c0_57, %c0_58], %63 {strides = array<i32>} : memref<24x128xf32, #tpu.memory_space<vmem>>, vector<24x128xf32>,
    %cst_59 = arith.constant 0.000000e+00 : f32
    %65 = vector.broadcast %cst_59 : f32 to vector<20x128xf32>
    %c0_60 = arith.constant 0 : index
    %c0_61 = arith.constant 0 : index
    %66 = vector.load %arg14[%c0_60, %c0_61] : memref<20x128xf32, #tpu.memory_space<vmem>>, vector<20x128xf32>
    tpu.vector_store %arg14[%c0_60, %c0_61], %65 {strides = array<i32>} : memref<20x128xf32, #tpu.memory_space<vmem>>, vector<20x128xf32>,
    %c0_62 = arith.constant 0 : index
    %c0_63 = arith.constant 0 : index
    %67 = tpu.strided_load %arg13[%c0_62, %c0_63] {strides = array<i32: 2, 1>} : memref<24x128xf32, #tpu.memory_space<vmem>>, vector<2x128xf32>
    %c1_64 = arith.constant 1 : index
    %c0_65 = arith.constant 0 : index
    %68 = tpu.strided_load %arg13[%c1_64, %c0_65] {strides = array<i32: 2, 1>} : memref<24x128xf32, #tpu.memory_space<vmem>>, vector<2x128xf32>
    %c6_66 = arith.constant 6 : index
    %c0_67 = arith.constant 0 : index
    %69 = tpu.strided_load %arg13[%c6_66, %c0_67] {strides = array<i32: 2, 1>} : memref<24x128xf32, #tpu.memory_space<vmem>>, vector<2x128xf32>
    %c7_68 = arith.constant 7 : index
    %c0_69 = arith.constant 0 : index
    %70 = tpu.strided_load %arg13[%c7_68, %c0_69] {strides = array<i32: 2, 1>} : memref<24x128xf32, #tpu.memory_space<vmem>>, vector<2x128xf32>
    %71 = arith.maximumf %67, %68 : vector<2x128xf32>
    %72 = arith.maximumf %69, %70 : vector<2x128xf32>
    %73 = arith.maximumf %71, %72 : vector<2x128xf32>
    %c5_70 = arith.constant 5 : index
    %c0_71 = arith.constant 0 : index
    %74 = vector.load %arg14[%c5_70, %c0_71] : memref<20x128xf32, #tpu.memory_space<vmem>>, vector<2x128xf32>
    tpu.vector_store %arg14[%c5_70, %c0_71], %73 {strides = array<i32>} : memref<20x128xf32, #tpu.memory_space<vmem>>, vector<2x128xf32>,
    %c12_72 = arith.constant 12 : index
    %c0_73 = arith.constant 0 : index
    %75 = tpu.strided_load %arg13[%c12_72, %c0_73] {strides = array<i32: 2, 1>} : memref<24x128xf32, #tpu.memory_space<vmem>>, vector<2x128xf32>
    %c13_74 = arith.constant 13 : index
    %c0_75 = arith.constant 0 : index
    %76 = tpu.strided_load %arg13[%c13_74, %c0_75] {strides = array<i32: 2, 1>} : memref<24x128xf32, #tpu.memory_space<vmem>>, vector<2x128xf32>
    %c18 = arith.constant 18 : index
    %c0_76 = arith.constant 0 : index
    %77 = tpu.strided_load %arg13[%c18, %c0_76] {strides = array<i32: 2, 1>} : memref<24x128xf32, #tpu.memory_space<vmem>>, vector<2x128xf32>
    %c19 = arith.constant 19 : index
    %c0_77 = arith.constant 0 : index
    %78 = tpu.strided_load %arg13[%c19, %c0_77] {strides = array<i32: 2, 1>} : memref<24x128xf32, #tpu.memory_space<vmem>>, vector<2x128xf32>
    %79 = arith.maximumf %75, %76 : vector<2x128xf32>
    %80 = arith.maximumf %77, %78 : vector<2x128xf32>
    %81 = arith.maximumf %79, %80 : vector<2x128xf32>
    %c9 = arith.constant 9 : index
    %c0_78 = arith.constant 0 : index
    %82 = vector.load %arg14[%c9, %c0_78] : memref<20x128xf32, #tpu.memory_space<vmem>>, vector<2x128xf32>
    tpu.vector_store %arg14[%c9, %c0_78], %81 {strides = array<i32>} : memref<20x128xf32, #tpu.memory_space<vmem>>, vector<2x128xf32>,
    %c0_79 = arith.constant 0 : index
    %c0_80 = arith.constant 0 : index
    %83 = vector.load %arg14[%c0_79, %c0_80] : memref<20x128xf32, #tpu.memory_space<vmem>>, vector<8x128xf32>
    %84 = arith.truncf %83 : vector<8x128xf32> to vector<8x128xbf16>
    %c0_81 = arith.constant 0 : index
    %c0_82 = arith.constant 0 : index
    %c0_83 = arith.constant 0 : index
    %85 = vector.load %arg4[%c0_81, %c0_82, %c0_83] : memref<9x128x128xbf16, #tpu.memory_space<vmem>>, vector<1x128x128xbf16>
    %86 = vector.shape_cast %85 : vector<1x128x128xbf16> to vector<128x128xbf16>
    %cst_84 = arith.constant dense<0.000000e+00> : vector<8x128xf32>
    %87 = tpu.matmul %84, %86, %cst_84 {dimension_numbers = #tpu.dot_dimension_numbers<[1], [0], [0], [1], [0, 0, 1, 1], [], []>} : vector<8x128xbf16>, vector<128x128xbf16>, vector<8x128xf32> -> vector<8x128xf32>
    %c1_85 = arith.constant 1 : index
    %c0_86 = arith.constant 0 : index
    %88 = vector.load %arg14[%c1_85, %c0_86] : memref<20x128xf32, #tpu.memory_space<vmem>>, vector<8x128xf32>
    %89 = arith.truncf %88 : vector<8x128xf32> to vector<8x128xbf16>
    %c1_87 = arith.constant 1 : index
    %c0_88 = arith.constant 0 : index
    %c0_89 = arith.constant 0 : index
    %90 = vector.load %arg4[%c1_87, %c0_88, %c0_89] : memref<9x128x128xbf16, #tpu.memory_space<vmem>>, vector<1x128x128xbf16>
    %91 = vector.shape_cast %90 : vector<1x128x128xbf16> to vector<128x128xbf16>
    %cst_90 = arith.constant dense<0.000000e+00> : vector<8x128xf32>
    %92 = tpu.matmul %89, %91, %cst_90 {dimension_numbers = #tpu.dot_dimension_numbers<[1], [0], [0], [1], [0, 0, 1, 1], [], []>} : vector<8x128xbf16>, vector<128x128xbf16>, vector<8x128xf32> -> vector<8x128xf32>
    %93 = arith.addf %87, %92 : vector<8x128xf32>
    %c2_91 = arith.constant 2 : index
    %c0_92 = arith.constant 0 : index
    %94 = vector.load %arg14[%c2_91, %c0_92] : memref<20x128xf32, #tpu.memory_space<vmem>>, vector<8x128xf32>
    %95 = arith.truncf %94 : vector<8x128xf32> to vector<8x128xbf16>
    %c2_93 = arith.constant 2 : index
    %c0_94 = arith.constant 0 : index
    %c0_95 = arith.constant 0 : index
    %96 = vector.load %arg4[%c2_93, %c0_94, %c0_95] : memref<9x128x128xbf16, #tpu.memory_space<vmem>>, vector<1x128x128xbf16>
    %97 = vector.shape_cast %96 : vector<1x128x128xbf16> to vector<128x128xbf16>
    %cst_96 = arith.constant dense<0.000000e+00> : vector<8x128xf32>
    %98 = tpu.matmul %95, %97, %cst_96 {dimension_numbers = #tpu.dot_dimension_numbers<[1], [0], [0], [1], [0, 0, 1, 1], [], []>} : vector<8x128xbf16>, vector<128x128xbf16>, vector<8x128xf32> -> vector<8x128xf32>
    %99 = arith.addf %93, %98 : vector<8x128xf32>
    %c4_97 = arith.constant 4 : index
    %c0_98 = arith.constant 0 : index
    %100 = vector.load %arg14[%c4_97, %c0_98] : memref<20x128xf32, #tpu.memory_space<vmem>>, vector<8x128xf32>
    %101 = arith.truncf %100 : vector<8x128xf32> to vector<8x128xbf16>
    %c3_99 = arith.constant 3 : index
    %c0_100 = arith.constant 0 : index
    %c0_101 = arith.constant 0 : index
    %102 = vector.load %arg4[%c3_99, %c0_100, %c0_101] : memref<9x128x128xbf16, #tpu.memory_space<vmem>>, vector<1x128x128xbf16>
    %103 = vector.shape_cast %102 : vector<1x128x128xbf16> to vector<128x128xbf16>
    %cst_102 = arith.constant dense<0.000000e+00> : vector<8x128xf32>
    %104 = tpu.matmul %101, %103, %cst_102 {dimension_numbers = #tpu.dot_dimension_numbers<[1], [0], [0], [1], [0, 0, 1, 1], [], []>} : vector<8x128xbf16>, vector<128x128xbf16>, vector<8x128xf32> -> vector<8x128xf32>
    %105 = arith.addf %99, %104 : vector<8x128xf32>
    %c5_103 = arith.constant 5 : index
    %c0_104 = arith.constant 0 : index
    %106 = vector.load %arg14[%c5_103, %c0_104] : memref<20x128xf32, #tpu.memory_space<vmem>>, vector<8x128xf32>
    %107 = arith.truncf %106 : vector<8x128xf32> to vector<8x128xbf16>
    %c4_105 = arith.constant 4 : index
    %c0_106 = arith.constant 0 : index
    %c0_107 = arith.constant 0 : index
    %108 = vector.load %arg4[%c4_105, %c0_106, %c0_107] : memref<9x128x128xbf16, #tpu.memory_space<vmem>>, vector<1x128x128xbf16>
    %109 = vector.shape_cast %108 : vector<1x128x128xbf16> to vector<128x128xbf16>
    %cst_108 = arith.constant dense<0.000000e+00> : vector<8x128xf32>
    %110 = tpu.matmul %107, %109, %cst_108 {dimension_numbers = #tpu.dot_dimension_numbers<[1], [0], [0], [1], [0, 0, 1, 1], [], []>} : vector<8x128xbf16>, vector<128x128xbf16>, vector<8x128xf32> -> vector<8x128xf32>
    %111 = arith.addf %105, %110 : vector<8x128xf32>
    %c6_109 = arith.constant 6 : index
    %c0_110 = arith.constant 0 : index
    %112 = vector.load %arg14[%c6_109, %c0_110] : memref<20x128xf32, #tpu.memory_space<vmem>>, vector<8x128xf32>
    %113 = arith.truncf %112 : vector<8x128xf32> to vector<8x128xbf16>
    %c5_111 = arith.constant 5 : index
    %c0_112 = arith.constant 0 : index
    %c0_113 = arith.constant 0 : index
    %114 = vector.load %arg4[%c5_111, %c0_112, %c0_113] : memref<9x128x128xbf16, #tpu.memory_space<vmem>>, vector<1x128x128xbf16>
    %115 = vector.shape_cast %114 : vector<1x128x128xbf16> to vector<128x128xbf16>
    %cst_114 = arith.constant dense<0.000000e+00> : vector<8x128xf32>
    %116 = tpu.matmul %113, %115, %cst_114 {dimension_numbers = #tpu.dot_dimension_numbers<[1], [0], [0], [1], [0, 0, 1, 1], [], []>} : vector<8x128xbf16>, vector<128x128xbf16>, vector<8x128xf32> -> vector<8x128xf32>
    %117 = arith.addf %111, %116 : vector<8x128xf32>
    %c8_115 = arith.constant 8 : index
    %c0_116 = arith.constant 0 : index
    %118 = vector.load %arg14[%c8_115, %c0_116] : memref<20x128xf32, #tpu.memory_space<vmem>>, vector<8x128xf32>
    %119 = arith.truncf %118 : vector<8x128xf32> to vector<8x128xbf16>
    %c6_117 = arith.constant 6 : index
    %c0_118 = arith.constant 0 : index
    %c0_119 = arith.constant 0 : index
    %120 = vector.load %arg4[%c6_117, %c0_118, %c0_119] : memref<9x128x128xbf16, #tpu.memory_space<vmem>>, vector<1x128x128xbf16>
    %121 = vector.shape_cast %120 : vector<1x128x128xbf16> to vector<128x128xbf16>
    %cst_120 = arith.constant dense<0.000000e+00> : vector<8x128xf32>
    %122 = tpu.matmul %119, %121, %cst_120 {dimension_numbers = #tpu.dot_dimension_numbers<[1], [0], [0], [1], [0, 0, 1, 1], [], []>} : vector<8x128xbf16>, vector<128x128xbf16>, vector<8x128xf32> -> vector<8x128xf32>
    %123 = arith.addf %117, %122 : vector<8x128xf32>
    %c9_121 = arith.constant 9 : index
    %c0_122 = arith.constant 0 : index
    %124 = vector.load %arg14[%c9_121, %c0_122] : memref<20x128xf32, #tpu.memory_space<vmem>>, vector<8x128xf32>
    %125 = arith.truncf %124 : vector<8x128xf32> to vector<8x128xbf16>
    %c7_123 = arith.constant 7 : index
    %c0_124 = arith.constant 0 : index
    %c0_125 = arith.constant 0 : index
    %126 = vector.load %arg4[%c7_123, %c0_124, %c0_125] : memref<9x128x128xbf16, #tpu.memory_space<vmem>>, vector<1x128x128xbf16>
    %127 = vector.shape_cast %126 : vector<1x128x128xbf16> to vector<128x128xbf16>
    %cst_126 = arith.constant dense<0.000000e+00> : vector<8x128xf32>
    %128 = tpu.matmul %125, %127, %cst_126 {dimension_numbers = #tpu.dot_dimension_numbers<[1], [0], [0], [1], [0, 0, 1, 1], [], []>} : vector<8x128xbf16>, vector<128x128xbf16>, vector<8x128xf32> -> vector<8x128xf32>
    %129 = arith.addf %123, %128 : vector<8x128xf32>
    %c10 = arith.constant 10 : index
    %c0_127 = arith.constant 0 : index
    %130 = vector.load %arg14[%c10, %c0_127] : memref<20x128xf32, #tpu.memory_space<vmem>>, vector<8x128xf32>
    %131 = arith.truncf %130 : vector<8x128xf32> to vector<8x128xbf16>
    %c8_128 = arith.constant 8 : index
    %c0_129 = arith.constant 0 : index
    %c0_130 = arith.constant 0 : index
    %132 = vector.load %arg4[%c8_128, %c0_129, %c0_130] : memref<9x128x128xbf16, #tpu.memory_space<vmem>>, vector<1x128x128xbf16>
    %133 = vector.shape_cast %132 : vector<1x128x128xbf16> to vector<128x128xbf16>
    %cst_131 = arith.constant dense<0.000000e+00> : vector<8x128xf32>
    %134 = tpu.matmul %131, %133, %cst_131 {dimension_numbers = #tpu.dot_dimension_numbers<[1], [0], [0], [1], [0, 0, 1, 1], [], []>} : vector<8x128xbf16>, vector<128x128xbf16>, vector<8x128xf32> -> vector<8x128xf32>
    %135 = arith.addf %129, %134 : vector<8x128xf32>
    %c0_132 = arith.constant 0 : index
    %c0_133 = arith.constant 0 : index
    %136 = vector.load %arg5[%c0_132, %c0_133] : memref<3x128xf32, #tpu.memory_space<vmem>>, vector<1x128xf32>
    %c1_134 = arith.constant 1 : index
    %c0_135 = arith.constant 0 : index
    %137 = vector.load %arg5[%c1_134, %c0_135] : memref<3x128xf32, #tpu.memory_space<vmem>>, vector<1x128xf32>
    %c2_136 = arith.constant 2 : index
    %c0_137 = arith.constant 0 : index
    %138 = vector.load %arg5[%c2_136, %c0_137] : memref<3x128xf32, #tpu.memory_space<vmem>>, vector<1x128xf32>
    %139 = vector.broadcast %136 : vector<1x128xf32> to vector<8x128xf32>
    %140 = arith.addf %135, %139 : vector<8x128xf32>
    %cst_138 = arith.constant 0.000000e+00 : f32
    %141 = vector.broadcast %cst_138 : f32 to vector<8x128xf32>
    %142 = arith.maximumf %140, %141 : vector<8x128xf32>
    %143 = vector.broadcast %137 : vector<1x128xf32> to vector<8x128xf32>
    %144 = arith.mulf %142, %143 : vector<8x128xf32>
    %145 = vector.broadcast %138 : vector<1x128xf32> to vector<8x128xf32>
    %146 = arith.addf %144, %145 : vector<8x128xf32>
    %c0_139 = arith.constant 0 : index
    %c0_140 = arith.constant 0 : index
    %147 = vector.load %arg15[%c0_139, %c0_140] : memref<8x128xf32, #tpu.memory_space<vmem>>, vector<8x128xf32>
    tpu.vector_store %arg15[%c0_139, %c0_140], %146 {strides = array<i32>} : memref<8x128xf32, #tpu.memory_space<vmem>>, vector<8x128xf32>,
    %c0_141 = arith.constant 0 : index
    %c0_142 = arith.constant 0 : index
    %148 = vector.load %arg7[%c0_141, %c0_142] : memref<1x128xf32, #tpu.memory_space<vmem>>, vector<1x128xf32>
    %c0_143 = arith.constant 0 : index
    %c0_144 = arith.constant 0 : index
    %149 = tpu.strided_load %arg15[%c0_143, %c0_144] {strides = array<i32: 2, 1>} : memref<8x128xf32, #tpu.memory_space<vmem>>, vector<1x128xf32>
    %c1_145 = arith.constant 1 : index
    %c0_146 = arith.constant 0 : index
    %150 = tpu.strided_load %arg15[%c1_145, %c0_146] {strides = array<i32: 2, 1>} : memref<8x128xf32, #tpu.memory_space<vmem>>, vector<1x128xf32>
    %c4_147 = arith.constant 4 : index
    %c0_148 = arith.constant 0 : index
    %151 = tpu.strided_load %arg15[%c4_147, %c0_148] {strides = array<i32: 2, 1>} : memref<8x128xf32, #tpu.memory_space<vmem>>, vector<1x128xf32>
    %c5_149 = arith.constant 5 : index
    %c0_150 = arith.constant 0 : index
    %152 = tpu.strided_load %arg15[%c5_149, %c0_150] {strides = array<i32: 2, 1>} : memref<8x128xf32, #tpu.memory_space<vmem>>, vector<1x128xf32>
    %153 = arith.maximumf %149, %150 : vector<1x128xf32>
    %154 = arith.maximumf %151, %152 : vector<1x128xf32>
    %155 = arith.maximumf %153, %154 : vector<1x128xf32>
    %156 = arith.truncf %155 : vector<1x128xf32> to vector<1x128xbf16>
    %c0_151 = arith.constant 0 : index
    %c0_152 = arith.constant 0 : index
    %157 = vector.load %arg6[%c0_151, %c0_152] : memref<128x128xbf16, #tpu.memory_space<vmem>>, vector<128x128xbf16>
    %cst_153 = arith.constant dense<0.000000e+00> : vector<1x128xf32>
    %158 = tpu.matmul %156, %157, %cst_153 {dimension_numbers = #tpu.dot_dimension_numbers<[1], [0], [0], [1], [0, 0, 1, 1], [], []>} : vector<1x128xbf16>, vector<128x128xbf16>, vector<1x128xf32> -> vector<1x128xf32>
    %159 = arith.addf %148, %158 : vector<1x128xf32>
    %cst_154 = arith.constant 0.000000e+00 : f32
    %160 = vector.broadcast %cst_154 : f32 to vector<1x128xf32>
    %161 = arith.maximumf %159, %160 : vector<1x128xf32>
    %162 = arith.truncf %161 : vector<1x128xf32> to vector<1x128xbf16>
    %c0_155 = arith.constant 0 : index
    %c0_156 = arith.constant 0 : index
    %163 = vector.load %arg8[%c0_155, %c0_156] : memref<128x64xbf16, #tpu.memory_space<vmem>>, vector<128x64xbf16>
    %cst_157 = arith.constant dense<0.000000e+00> : vector<1x64xf32>
    %164 = tpu.matmul %162, %163, %cst_157 {dimension_numbers = #tpu.dot_dimension_numbers<[1], [0], [0], [1], [0, 0, 1, 1], [], []>} : vector<1x128xbf16>, vector<128x64xbf16>, vector<1x64xf32> -> vector<1x64xf32>
    %c0_158 = arith.constant 0 : index
    %c0_159 = arith.constant 0 : index
    %165 = vector.load %arg9[%c0_158, %c0_159] : memref<1x64xf32, #tpu.memory_space<vmem>>, vector<1x64xf32>
    %166 = arith.addf %164, %165 : vector<1x64xf32>
    %cst_160 = arith.constant 0.000000e+00 : f32
    %167 = vector.broadcast %cst_160 : f32 to vector<1x64xf32>
    %168 = arith.maximumf %166, %167 : vector<1x64xf32>
    %169 = arith.truncf %168 : vector<1x64xf32> to vector<1x64xbf16>
    %c0_161 = arith.constant 0 : index
    %c0_162 = arith.constant 0 : index
    %170 = vector.load %arg10[%c0_161, %c0_162] : memref<64x18xbf16, #tpu.memory_space<vmem>>, vector<64x18xbf16>
    %cst_163 = arith.constant dense<0.000000e+00> : vector<1x18xf32>
    %171 = tpu.matmul %169, %170, %cst_163 {dimension_numbers = #tpu.dot_dimension_numbers<[1], [0], [0], [1], [0, 0, 1, 1], [], []>} : vector<1x64xbf16>, vector<64x18xbf16>, vector<1x18xf32> -> vector<1x18xf32>
    %c0_164 = arith.constant 0 : index
    %c0_165 = arith.constant 0 : index
    %172 = vector.load %arg11[%c0_164, %c0_165] : memref<1x18xf32, #tpu.memory_space<vmem>>, vector<1x18xf32>
    %173 = arith.addf %171, %172 : vector<1x18xf32>
    %c0_166 = arith.constant 0 : index
    %c0_167 = arith.constant 0 : index
    %c0_168 = arith.constant 0 : index
    %174 = vector.load %arg12[%c0_166, %c0_167, %c0_168] : memref<1x1x18xf32, #tpu.memory_space<vmem>>, vector<1x1x18xf32>
    %175 = vector.shape_cast %174 : vector<1x1x18xf32> to vector<1x18xf32>
    %176 = vector.shape_cast %173 : vector<1x18xf32> to vector<1x1x18xf32>
    tpu.vector_store %arg12[%c0_166, %c0_167, %c0_168], %176 {strides = array<i32>} : memref<1x1x18xf32, #tpu.memory_space<vmem>>, vector<1x1x18xf32>,
    return
  }
  func.func @transform_0(%arg0: i32) -> (i32, i32, i32) {
    %c0_i32 = arith.constant 0 : i32
    %c0_i32_0 = arith.constant 0 : i32
    %c0_i32_1 = arith.constant 0 : i32
    return %arg0, %c0_i32, %c0_i32_0 : i32, i32, i32
  }
  func.func @transform_1(%arg0: i32) -> (i32, i32, i32) {
    %c0_i32 = arith.constant 0 : i32
    %c0_i32_0 = arith.constant 0 : i32
    %c0_i32_1 = arith.constant 0 : i32
    %c0_i32_2 = arith.constant 0 : i32
    return %c0_i32, %c0_i32_0, %c0_i32_1 : i32, i32, i32
  }
  func.func @transform_2(%arg0: i32) -> (i32, i32) {
    %c0_i32 = arith.constant 0 : i32
    %c0_i32_0 = arith.constant 0 : i32
    %c0_i32_1 = arith.constant 0 : i32
    return %c0_i32, %c0_i32_0 : i32, i32
  }
  func.func @transform_3(%arg0: i32) -> (i32, i32, i32) {
    %c0_i32 = arith.constant 0 : i32
    %c0_i32_0 = arith.constant 0 : i32
    %c0_i32_1 = arith.constant 0 : i32
    %c0_i32_2 = arith.constant 0 : i32
    return %c0_i32, %c0_i32_0, %c0_i32_1 : i32, i32, i32
  }
  func.func @transform_4(%arg0: i32) -> (i32, i32) {
    %c0_i32 = arith.constant 0 : i32
    %c0_i32_0 = arith.constant 0 : i32
    %c0_i32_1 = arith.constant 0 : i32
    return %c0_i32, %c0_i32_0 : i32, i32
  }
  func.func @transform_5(%arg0: i32) -> (i32, i32) {
    %c0_i32 = arith.constant 0 : i32
    %c0_i32_0 = arith.constant 0 : i32
    %c0_i32_1 = arith.constant 0 : i32
    return %c0_i32, %c0_i32_0 : i32, i32
  }
  func.func @transform_6(%arg0: i32) -> (i32, i32) {
    %c0_i32 = arith.constant 0 : i32
    %c0_i32_0 = arith.constant 0 : i32
    %c0_i32_1 = arith.constant 0 : i32
    return %c0_i32, %c0_i32_0 : i32, i32
  }
  func.func @transform_7(%arg0: i32) -> (i32, i32) {
    %c0_i32 = arith.constant 0 : i32
    %c0_i32_0 = arith.constant 0 : i32
    %c0_i32_1 = arith.constant 0 : i32
    return %c0_i32, %c0_i32_0 : i32, i32
  }
  func.func @transform_8(%arg0: i32) -> (i32, i32) {
    %c0_i32 = arith.constant 0 : i32
    %c0_i32_0 = arith.constant 0 : i32
    %c0_i32_1 = arith.constant 0 : i32
    return %c0_i32, %c0_i32_0 : i32, i32
  }
  func.func @transform_9(%arg0: i32) -> (i32, i32) {
    %c0_i32 = arith.constant 0 : i32
    %c0_i32_0 = arith.constant 0 : i32
    %c0_i32_1 = arith.constant 0 : i32
    return %c0_i32, %c0_i32_0 : i32, i32
  }
  func.func @transform_10(%arg0: i32) -> (i32, i32) {
    %c0_i32 = arith.constant 0 : i32
    %c0_i32_0 = arith.constant 0 : i32
    %c0_i32_1 = arith.constant 0 : i32
    return %c0_i32, %c0_i32_0 : i32, i32
  }
  func.func @transform_11(%arg0: i32) -> (i32, i32, i32) {
    %c0_i32 = arith.constant 0 : i32
    %c0_i32_0 = arith.constant 0 : i32
    %c0_i32_1 = arith.constant 0 : i32
    return %arg0, %c0_i32, %c0_i32_0 : i32, i32, i32
  }
}

</mosaic_0001>

<bundles_post_ra>
// kernel: pointnet_forward.3
= control target key start
LH: loop header
LB: loop body
LE: loop exit
PB: predicated region body
PF: predicated region fallthrough
CT: control target
= control target key end

     0   :  { %s1100_s12 = smov 0   ;;  %s1102_s13 = smov 0   ;;  %s1338_s0 = inlined_call_operand.vmem [shape: bf16[2,256,27], index: 0, kind: input, shape index: {}]   ;;  %s1339_s1 = inlined_call_operand.vmem [shape: bf16[27,32], index: 1, kind: input, shape index: {}]   ;;  %s1340_s2 = inlined_call_operand.vmem [shape: f32[3,32], index: 2, kind: input, shape index: {}]   ;;  %s1341_s3 = inlined_call_operand.vmem [shape: bf16[2,8,8,32], index: 3, kind: output, shape index: {}]  }
   0x1   :  { %s1104_s14 = smov 0  }
   0x2 LB: > { %s25_s15 = sadd.s32 1, %s1073_s13  ;;  %p901_p0 = scmp.ge.s32.totalorder %s1077_s14, 1  ;;  %s1077_s14 = sphi %s1104_s14, %s13_s14   ;;  %s1073_s13 = sphi %s1102_s13, %s1343_s13   ;;  %s1069_s12 = sphi %s1100_s12, %s1342_s12  }
   0x3   : > { %p27_p1 = scmp.ge.s32.totalorder %s25_s15, 2  ;;  %p158_p2 = scmp.lt.s32.totalorder %s1077_s14, 3 }
   0x5   : > { %s1345_s15 = smov (%p27_p1, %s25_s15), 0  ;;  %p159_p3 = pnand %p901_p0, %p158_p2 }
   0x6   : > { %v1037_v0 = vld [vmem:[%s1339_s1] sm:$0xff] (!%p159_p3)   ;;  %vm394_vm0 = vcmask (!%p159_p3), 1044480   ;;  %v1038_v1 = vld [vmem:[%s1339_s1 + $0x8] sm:$0x3f] (!%p159_p3)   ;;  %vm395_vm1 = vcmask (!%p159_p3), 1045504   ;;  %p191_p4 = scmp.lt.s32.totalorder (!%p159_p3), %s1069_s12, 1 }
   0x7   : > { %162 = sbr.rel (%p159_p3) target bundleno = 291 (0x123), region = 32  ;;  %972 = vmatprep.subr.bf16.mxu0 (!%p159_p3), %v1037_v0  ;;  %1008 = vmatprep.subr.bf16.mxu1 (!%p159_p3), %v1037_v0  ;;  %v1079_v2 = vmov (!%p159_p3), 65535   ;;  %vm345_vm2 = vcmask (!%p159_p3), 220160   ;;  %v1167_v22 = vld [vmem:[%s1340_s2] ss:$0 sm:$0xff] (!%p159_p3)  ;;  %vm666_vm3 = vcmask (!%p159_p3), 261120  }
   0x8   : > { %973 = vmatpush3.bf16.msra.mxu0 (!%p159_p3), %v1037_v0  ;;  %1010 = vmatpush3.bf16.msra.mxu1 (!%p159_p3), %v1037_v0  ;;  %v396_v3 = vsel (!%p159_p3), %vm394_vm0, 4294967295, %v1079_v2  ;;  %v1173_v27 = vld [vmem:[%s1340_s2 + $0x1] ss:$0 sm:$0xff] (!%p159_p3)  ;;  %v1182_v37 = vld [vmem:[%s1340_s2 + $0x2] ss:$0 sm:$0xff] (!%p159_p3)  ;;  %vm710_vm4 = vcmask (!%p159_p3), 257024  }
   0x9   : > { %v397_v4 = vsel (!%p159_p3), %vm395_vm1, %v396_v3, 0 }
   0xa   : > { %v399_v5 = vand.u32 (!%p159_p3), %v1038_v1, %v397_v4 }
   0xc   : > { %974 = vmatprep.subr.bf16.mxu0 (!%p159_p3), %v399_v5  ;;  %1009 = vmatprep.subr.bf16.mxu1 (!%p159_p3), %v399_v5 }
   0xd   : > { %975 = vmatpush3.bf16.msra.mxu0 (!%p159_p3), %v399_v5  ;;  %1011 = vmatpush3.bf16.msra.mxu1 (!%p159_p3), %v399_v5 }
   0xe   : > { %s1347_s12 = smov (!%p191_p4, %s1069_s12), 1 }
   0xf   : > { %s952_s20 = sshll.u32 %s1347_s12, 7  ;;  %s953_s30 = sshll.u32 %s1347_s12, 5 }
  0x10   : > { %s1130_s23 = scalar_lea.vmem %s1338_s0, %s952_s20  ;;  %s1255_s6 = scalar_lea.vmem %s1341_s3, %s953_s30 }
  0x11   : > { %v1039_v6 = vld [vmem:[%s1130_s23] sm:$0xff]   ;;  %v1041_v8 = vld [vmem:[%s1130_s23 + $0x8] sm:$0xff]   ;;  %v1043_v10 = vld [vmem:[%s1130_s23 + $0x10] sm:$0xff]  }
  0x12   : > { %v1040_v7 = vld [vmem:[%s1130_s23 + $0x40] sm:$0xff]   ;;  %976 = vmatprep.mubr.msk.bf16.mxu0 %vm345_vm2, %v1039_v6  ;;  %v1042_v9 = vld [vmem:[%s1130_s23 + $0x48] sm:$0xff]   ;;  %v1044_v11 = vld [vmem:[%s1130_s23 + $0x50] sm:$0xff]  }
  0x13   : > { %992 = vmatprep.mubr.msk.bf16.mxu1 %vm345_vm2, %v1040_v7  ;;  %977 = vmatmul.mubr.msk.bf16.vlgmr.msra.gmra.mrb[0].mxu0 %vm345_vm2, %v1041_v8  ;;  %v1045_v12 = vld [vmem:[%s1130_s23 + $0x18] sm:$0xff]   ;;  %v1047_v14 = vld [vmem:[%s1130_s23 + $0x20] sm:$0xff]   ;;  %v1049_v16 = vld [vmem:[%s1130_s23 + $0x28] sm:$0xff]  }
  0x14   : > { %993 = vmatmul.mubr.msk.bf16.vlgmr.msra.gmra.mrb[0].mxu1 %vm345_vm2, %v1042_v9  ;;  %980 = vmatprep.mubr.msk.bf16.mxu0 %vm345_vm2, %v1043_v10  ;;  %v1046_v13 = vld [vmem:[%s1130_s23 + $0x58] sm:$0xff]   ;;  %v1048_v15 = vld [vmem:[%s1130_s23 + $0x60] sm:$0xff]   ;;  %v1050_v17 = vld [vmem:[%s1130_s23 + $0x68] sm:$0xff]  }
  0x15   : > { %996 = vmatprep.mubr.msk.bf16.mxu1 %vm345_vm2, %v1044_v11  ;;  %v1051_v18 = vld [vmem:[%s1130_s23 + $0x30] sm:$0xff]   ;;  %v1053_v20 = vld [vmem:[%s1130_s23 + $0x38] sm:$0xff]  }
  0x16   : > { %v1052_v19 = vld [vmem:[%s1130_s23 + $0x70] sm:$0xff]   ;;  %v1054_v21 = vld [vmem:[%s1130_s23 + $0x78] sm:$0xff]  }
  0x1b   : > { %981 = vmatmul.mubr.msk.bf16.gmra.mrb[4].mxu0 %vm345_vm2, %v1045_v12 }
  0x1c   : > { %997 = vmatmul.mubr.msk.bf16.gmra.mrb[4].mxu1 %vm345_vm2, %v1046_v13  ;;  %984 = vmatprep.mubr.msk.bf16.mxu0 %vm345_vm2, %v1047_v14 }
  0x1d   : > { %1000 = vmatprep.mubr.msk.bf16.mxu1 %vm345_vm2, %v1048_v15 }
  0x23   : > { %985 = vmatmul.mubr.msk.bf16.gmra.mrb[8].mxu0 %vm345_vm2, %v1049_v16 }
  0x24   : > { %1001 = vmatmul.mubr.msk.bf16.gmra.mrb[8].mxu1 %vm345_vm2, %v1050_v17  ;;  %988 = vmatprep.mubr.msk.bf16.mxu0 %vm345_vm2, %v1051_v18 }
  0x25   : > { %1004 = vmatprep.mubr.msk.bf16.mxu1 %vm345_vm2, %v1052_v19 }
  0x2b   : > { %989 = vmatmul.mubr.msk.bf16.gmra.mrb[12].mxu0 %vm345_vm2, %v1053_v20 }
  0x2c   : > { %1005 = vmatmul.mubr.msk.bf16.gmra.mrb[12].mxu1 %vm345_vm2, %v1054_v21 }
  0xe6   : > { %v978_v23 = vpop.f32.mrb[0].mxu0 }
  0xe7   : > { %v444_v24 = vadd.f32 %v978_v23, %v1167_v22  ;;  %v994_v25 = vpop.f32.mrb[0].mxu1  ;;  %v435_v26 = vpop.f32.mrb[1].mxu0 }
  0xe8   : > { %v508_v28 = vadd.f32 %v994_v25, %v1167_v22  ;;  %v436_v29 = vadd.f32 %v1167_v22, %v435_v26  ;;  %v499_v30 = vpop.f32.mrb[1].mxu1  ;;  %v979_v31 = vpop.f32.mrb[2].mxu0 }
  0xe9   : > { %v564_v32 = vmax.f32 %v444_v24, 0.0  ;;  %v500_v33 = vadd.f32 %v1167_v22, %v499_v30  ;;  %v447_v34 = vadd.f32 %v979_v31, %v1167_v22  ;;  %v995_v35 = vpop.f32.mrb[2].mxu1  ;;  %v438_v36 = vpop.f32.mrb[3].mxu0 }
  0xea   : > { %v580_v38 = vmax.f32 %v508_v28, 0.0  ;;  %v562_v39 = vmax.f32 %v436_v29, 0.0  ;;  %v511_v40 = vadd.f32 %v995_v35, %v1167_v22  ;;  %v439_v41 = vadd.f32 %v1167_v22, %v438_v36  ;;  %v502_v42 = vpop.f32.mrb[3].mxu1 }
  0xeb   : > { %v600_v43 = vmul.f32 %v1173_v27, %v564_v32  ;;  %v578_v44 = vmax.f32 %v500_v33, 0.0  ;;  %v565_v45 = vmax.f32 %v447_v34, 0.0  ;;  %v503_v46 = vadd.f32 %v1167_v22, %v502_v42 }
  0xec   : > { %v616_v47 = vmul.f32 %v1173_v27, %v580_v38  ;;  %v598_v48 = vmul.f32 %v1173_v27, %v562_v39  ;;  %v581_v49 = vmax.f32 %v511_v40, 0.0  ;;  %v563_v50 = vmax.f32 %v439_v41, 0.0 }
  0xed   : > { %v636_v51 = vadd.f32 %v1182_v37, %v600_v43  ;;  %v614_v52 = vmul.f32 %v1173_v27, %v578_v44  ;;  %v601_v53 = vmul.f32 %v1173_v27, %v565_v45  ;;  %v579_v54 = vmax.f32 %v503_v46, 0.0 }
  0xee   : > { %v652_v55 = vadd.f32 %v1182_v37, %v616_v47  ;;  %v634_v56 = vadd.f32 %v1182_v37, %v598_v48  ;;  %v617_v57 = vmul.f32 %v1173_v27, %v581_v49  ;;  %v599_v58 = vmul.f32 %v1173_v27, %v563_v50  ;;  %v982_v59 = vpop.f32.mrb[4].mxu0 }
  0xef   : > { %669 = vst.msk [vmem:[#allocation2 + $0x10] sm:$0xff] %vm666_vm3, %v636_v51  ;;  %v650_v60 = vadd.f32 %v1182_v37, %v614_v52  ;;  %v637_v61 = vadd.f32 %v1182_v37, %v601_v53  ;;  %v615_v62 = vmul.f32 %v1173_v27, %v579_v54  ;;  %v460_v63 = vadd.f32 %v982_v59, %v1167_v22  ;;  %v998_v0 = vpop.f32.mrb[4].mxu1  ;;  %v451_v1 = vpop.f32.mrb[5].mxu0 }
  0xf0   : > { %685 = vst.msk [vmem:[#allocation2 + $0x90] sm:$0xff] %vm666_vm3, %v652_v55  ;;  %667 = vst.msk [vmem:[#allocation2] sm:$0xff] %vm666_vm3, %v634_v56  ;;  %v653_v2 = vadd.f32 %v1182_v37, %v617_v57  ;;  %v635_v3 = vadd.f32 %v1182_v37, %v599_v58  ;;  %v524_v4 = vadd.f32 %v998_v0, %v1167_v22  ;;  %v515_v6 = vpop.f32.mrb[5].mxu1  ;;  %v983_v7 = vpop.f32.mrb[6].mxu0 }
  0xf1   : > { %v452_v5 = vadd.f32 %v1167_v22, %v451_v1  ;;  %683 = vst.msk [vmem:[#allocation2 + $0x80] sm:$0xff] %vm666_vm3, %v650_v60  ;;  %670 = vst.msk [vmem:[#allocation2 + $0x18] sm:$0xff] %vm666_vm3, %v637_v61  ;;  %v651_v8 = vadd.f32 %v1182_v37, %v615_v62  ;;  %v568_v9 = vmax.f32 %v460_v63, 0.0  ;;  %v516_v10 = vadd.f32 %v1167_v22, %v515_v6  ;;  %v999_v12 = vpop.f32.mrb[6].mxu1  ;;  %v454_v13 = vpop.f32.mrb[7].mxu0 }
  0xf2   : > { %v463_v11 = vadd.f32 %v983_v7, %v1167_v22  ;;  %686 = vst.msk [vmem:[#allocation2 + $0x98] sm:$0xff] %vm666_vm3, %v653_v2  ;;  %668 = vst.msk [vmem:[#allocation2 + $0x8] sm:$0xff] %vm666_vm3, %v635_v3  ;;  %v584_v14 = vmax.f32 %v524_v4, 0.0  ;;  %v527_v16 = vadd.f32 %v999_v12, %v1167_v22  ;;  %v455_v17 = vadd.f32 %v1167_v22, %v454_v13  ;;  %v518_v18 = vpop.f32.mrb[7].mxu1 }
  0xf3   : > { %v566_v15 = vmax.f32 %v452_v5, 0.0  ;;  %684 = vst.msk [vmem:[#allocation2 + $0x88] sm:$0xff] %vm666_vm3, %v651_v8  ;;  %v604_v19 = vmul.f32 %v1173_v27, %v568_v9  ;;  %v582_v20 = vmax.f32 %v516_v10, 0.0  ;;  %v519_v23 = vadd.f32 %v1167_v22, %v518_v18 }
  0xf4   : > { %v569_v21 = vmax.f32 %v463_v11, 0.0  ;;  %v620_v24 = vmul.f32 %v1173_v27, %v584_v14  ;;  %v585_v26 = vmax.f32 %v527_v16, 0.0  ;;  %v567_v28 = vmax.f32 %v455_v17, 0.0 }
  0xf5   : > { %v602_v25 = vmul.f32 %v1173_v27, %v566_v15  ;;  %v640_v29 = vadd.f32 %v1182_v37, %v604_v19  ;;  %v618_v30 = vmul.f32 %v1173_v27, %v582_v20  ;;  %v583_v32 = vmax.f32 %v519_v23, 0.0 }
  0xf6   : > { %v605_v31 = vmul.f32 %v1173_v27, %v569_v21  ;;  %v656_v33 = vadd.f32 %v1182_v37, %v620_v24  ;;  %v621_v35 = vmul.f32 %v1173_v27, %v585_v26  ;;  %v603_v36 = vmul.f32 %v1173_v27, %v567_v28  ;;  %v986_v38 = vpop.f32.mrb[8].mxu0 }
  0xf7   : > { %v638_v34 = vadd.f32 %v1182_v37, %v602_v25  ;;  %673 = vst.msk [vmem:[#allocation2 + $0x30] sm:$0xff] %vm666_vm3, %v640_v29  ;;  %v654_v39 = vadd.f32 %v1182_v37, %v618_v30  ;;  %v619_v41 = vmul.f32 %v1173_v27, %v583_v32  ;;  %v476_v42 = vadd.f32 %v986_v38, %v1167_v22  ;;  %v1002_v43 = vpop.f32.mrb[8].mxu1  ;;  %v467_v44 = vpop.f32.mrb[9].mxu0 }
  0xf8   : > { %v641_v40 = vadd.f32 %v1182_v37, %v605_v31  ;;  %v703_v45 = vld [vmem:[#allocation2 + $0x10] ss:$2 sm:$0xff]  ;;  %v705_v46 = vld [vmem:[#allocation2 + $0x11] ss:$2 sm:$0xff]  ;;  %689 = vst.msk [vmem:[#allocation2 + $0xb0] sm:$0xff] %vm666_vm3, %v656_v33  ;;  %v657_v47 = vadd.f32 %v1182_v37, %v621_v35  ;;  %v639_v48 = vadd.f32 %v1182_v37, %v603_v36  ;;  %v540_v49 = vadd.f32 %v1002_v43, %v1167_v22  ;;  %v531_v51 = vpop.f32.mrb[9].mxu1 }
  0xf9   : > { %671 = vst.msk [vmem:[#allocation2 + $0x20] sm:$0xff] %vm666_vm3, %v638_v34  ;;  %v468_v50 = vadd.f32 %v1167_v22, %v467_v44  ;;  %v987_v52 = vpop.f32.mrb[10].mxu0  ;;  %v707_v53 = vmax.f32 %v703_v45, %v705_v46  ;;  %v759_v54 = vld [vmem:[#allocation2 + $0x90] ss:$2 sm:$0xff]  ;;  %v761_v55 = vld [vmem:[#allocation2 + $0x91] ss:$2 sm:$0xff]  ;;  %v655_v57 = vadd.f32 %v1182_v37, %v619_v41  ;;  %v532_v58 = vadd.f32 %v1167_v22, %v531_v51 }
  0xfa   : > { %v699_v56 = vld [vmem:[#allocation2] ss:$2 sm:$0xff]  ;;  %687 = vst.msk [vmem:[#allocation2 + $0xa0] sm:$0xff] %vm666_vm3, %v654_v39  ;;  %674 = vst.msk [vmem:[#allocation2 + $0x38] sm:$0xff] %vm666_vm3, %v641_v40  ;;  %v479_v59 = vadd.f32 %v987_v52, %v1167_v22  ;;  %v763_v60 = vmax.f32 %v759_v54, %v761_v55  ;;  %v701_v61 = vld [vmem:[#allocation2 + $0x1] ss:$2 sm:$0xff] }
  0xfb   : > { %v755_v62 = vld [vmem:[#allocation2 + $0x80] ss:$2 sm:$0xff]  ;;  %v757_v63 = vld [vmem:[#allocation2 + $0x81] ss:$2 sm:$0xff]  ;;  %690 = vst.msk [vmem:[#allocation2 + $0xb8] sm:$0xff] %vm666_vm3, %v657_v47  ;;  %672 = vst.msk [vmem:[#allocation2 + $0x28] sm:$0xff] %vm666_vm3, %v639_v48  ;;  %v706_v0 = vmax.f32 %v699_v56, %v701_v61 }
  0xfc   : > { %v762_v1 = vmax.f32 %v755_v62, %v757_v63  ;;  %688 = vst.msk [vmem:[#allocation2 + $0xa8] sm:$0xff] %vm666_vm3, %v655_v57  ;;  %v572_v2 = vmax.f32 %v476_v42, 0.0  ;;  %v588_v3 = vmax.f32 %v540_v49, 0.0  ;;  %v1003_v4 = vpop.f32.mrb[10].mxu1  ;;  %v470_v5 = vpop.f32.mrb[11].mxu0  ;;  %v570_v6 = vmax.f32 %v468_v50, 0.0 }
  0xfd   : > { %v586_v7 = vmax.f32 %v532_v58, 0.0  ;;  %v573_v8 = vmax.f32 %v479_v59, 0.0  ;;  %v543_v9 = vadd.f32 %v1003_v4, %v1167_v22  ;;  %v534_v10 = vpop.f32.mrb[11].mxu1  ;;  %v708_v11 = vmax.f32 %v706_v0, %v707_v53 }
  0xfe   : > { %v764_v12 = vmax.f32 %v762_v1, %v763_v60  ;;  %v608_v13 = vmul.f32 %v1173_v27, %v572_v2  ;;  %v624_v14 = vmul.f32 %v1173_v27, %v588_v3  ;;  %v606_v15 = vmul.f32 %v1173_v27, %v570_v6  ;;  %v990_v19 = vpop.f32.mrb[12].mxu0 }
  0xff   : > { %v622_v16 = vmul.f32 %v1173_v27, %v586_v7  ;;  %v609_v17 = vmul.f32 %v1173_v27, %v573_v8  ;;  %v589_v18 = vmax.f32 %v543_v9, 0.0  ;;  %v709_v20 = vpack.c.bf16 %v708_v11, %v708_v11  ;;  %v1006_v25 = vpop.f32.mrb[12].mxu1  ;;  %v483_v26 = vpop.f32.mrb[13].mxu0 }
 0x100   : > { %v765_v21 = vpack.c.bf16 %v764_v12, %v764_v12  ;;  %v644_v23 = vadd.f32 %v1182_v37, %v608_v13  ;;  %v660_v24 = vadd.f32 %v1182_v37, %v624_v14  ;;  %v642_v30 = vadd.f32 %v1182_v37, %v606_v15  ;;  %v547_v34 = vpop.f32.mrb[13].mxu1  ;;  %v991_v35 = vpop.f32.mrb[14].mxu0 }
 0x101   : > { %v717_v28 = vld [vmem:[#allocation2 + $0x30] ss:$2 sm:$0xff]  ;;  %v719_v29 = vld [vmem:[#allocation2 + $0x31] ss:$2 sm:$0xff]  ;;  %v658_v31 = vadd.f32 %v1182_v37, %v622_v16  ;;  %v645_v32 = vadd.f32 %v1182_v37, %v609_v17  ;;  %v625_v33 = vmul.f32 %v1173_v27, %v589_v18  ;;  %711 = vst.msk [vmem:[%s1255_s6] sm:$0xf] %vm710_vm4, %v709_v20  ;;  %v471_v41 = vadd.f32 %v1167_v22, %v470_v5 }
 0x102   : > { %946 = vst.msk [vmem:[%s1255_s6 + $0x10] sm:$0xf] %vm710_vm4, %v765_v21  ;;  %v721_v36 = vmax.f32 %v717_v28, %v719_v29  ;;  %v773_v38 = vld [vmem:[#allocation2 + $0xb0] ss:$2 sm:$0xff]  ;;  %v775_v39 = vld [vmem:[#allocation2 + $0xb1] ss:$2 sm:$0xff]  ;;  %v535_v42 = vadd.f32 %v1167_v22, %v534_v10  ;;  %v492_v43 = vadd.f32 %v990_v19, %v1167_v22  ;;  %v556_v49 = vadd.f32 %v1006_v25, %v1167_v22 }
 0x103   : > { %v713_v40 = vld [vmem:[#allocation2 + $0x20] ss:$2 sm:$0xff]  ;;  %677 = vst.msk [vmem:[#allocation2 + $0x50] sm:$0xff] %vm666_vm3, %v644_v23  ;;  %693 = vst.msk [vmem:[#allocation2 + $0xd0] sm:$0xff] %vm666_vm3, %v660_v24  ;;  %v777_v44 = vmax.f32 %v773_v38, %v775_v39  ;;  %v715_v45 = vld [vmem:[#allocation2 + $0x21] ss:$2 sm:$0xff]  ;;  %v661_v48 = vadd.f32 %v1182_v37, %v625_v33  ;;  %v484_v50 = vadd.f32 %v1167_v22, %v483_v26 }
 0x104   : > { %v769_v46 = vld [vmem:[#allocation2 + $0xa0] ss:$2 sm:$0xff]  ;;  %v771_v47 = vld [vmem:[#allocation2 + $0xa1] ss:$2 sm:$0xff]  ;;  %675 = vst.msk [vmem:[#allocation2 + $0x40] sm:$0xff] %vm666_vm3, %v642_v30  ;;  %691 = vst.msk [vmem:[#allocation2 + $0xc0] sm:$0xff] %vm666_vm3, %v658_v31  ;;  %v720_v51 = vmax.f32 %v713_v40, %v715_v45  ;;  %v548_v60 = vadd.f32 %v1167_v22, %v547_v34  ;;  %v495_v14 = vadd.f32 %v991_v35, %v1167_v22 }
 0x105   : > { %678 = vst.msk [vmem:[#allocation2 + $0x58] sm:$0xff] %vm666_vm3, %v645_v32  ;;  %v776_v52 = vmax.f32 %v769_v46, %v771_v47  ;;  %v571_v53 = vmax.f32 %v471_v41, 0.0  ;;  %v587_v54 = vmax.f32 %v535_v42, 0.0  ;;  %v1007_v55 = vpop.f32.mrb[14].mxu1  ;;  %v486_v56 = vpop.f32.mrb[15].mxu0  ;;  %694 = vst.msk [vmem:[#allocation2 + $0xd8] sm:$0xff] %vm666_vm3, %v661_v48 }
 0x106   : > { %v576_v57 = vmax.f32 %v492_v43, 0.0  ;;  %v592_v58 = vmax.f32 %v556_v49, 0.0  ;;  %v574_v59 = vmax.f32 %v484_v50, 0.0  ;;  %v550_v61 = vpop.f32.mrb[15].mxu1  ;;  %v722_v62 = vmax.f32 %v720_v51, %v721_v36 }
 0x107   : > { %v778_v63 = vmax.f32 %v776_v52, %v777_v44  ;;  %v607_v0 = vmul.f32 %v1173_v27, %v571_v53  ;;  %v623_v1 = vmul.f32 %v1173_v27, %v587_v54  ;;  %v590_v5 = vmax.f32 %v548_v60, 0.0 }
 0x108   : > { %v612_v2 = vmul.f32 %v1173_v27, %v576_v57  ;;  %v628_v3 = vmul.f32 %v1173_v27, %v592_v58  ;;  %v610_v4 = vmul.f32 %v1173_v27, %v574_v59  ;;  %v723_v6 = vpack.c.bf16 %v722_v62, %v722_v62 }
 0x109   : > { %v779_v7 = vpack.c.bf16 %v778_v63, %v778_v63  ;;  %v643_v8 = vadd.f32 %v1182_v37, %v607_v0  ;;  %v659_v9 = vadd.f32 %v1182_v37, %v623_v1  ;;  %v626_v13 = vmul.f32 %v1173_v27, %v590_v5 }
 0x10a   : > { %v648_v10 = vadd.f32 %v1182_v37, %v612_v2  ;;  %v664_v11 = vadd.f32 %v1182_v37, %v628_v3  ;;  %v646_v12 = vadd.f32 %v1182_v37, %v610_v4  ;;  %943 = vst.msk [vmem:[%s1255_s6 + $0x4] sm:$0xf] %vm710_vm4, %v723_v6  ;;  %v559_v15 = vadd.f32 %v1007_v55, %v1167_v22 }
 0x10b   : > { %947 = vst.msk [vmem:[%s1255_s6 + $0x14] sm:$0xf] %vm710_vm4, %v779_v7  ;;  %v487_v16 = vadd.f32 %v1167_v22, %v486_v56  ;;  %v551_v17 = vadd.f32 %v1167_v22, %v550_v61  ;;  %v662_v18 = vadd.f32 %v1182_v37, %v626_v13  ;;  %v577_v19 = vmax.f32 %v495_v14, 0.0 }
 0x10c   : > { %676 = vst.msk [vmem:[#allocation2 + $0x48] sm:$0xff] %vm666_vm3, %v643_v8  ;;  %692 = vst.msk [vmem:[#allocation2 + $0xc8] sm:$0xff] %vm666_vm3, %v659_v9  ;;  %v593_v20 = vmax.f32 %v559_v15, 0.0  ;;  %v731_v21 = vld [vmem:[#allocation2 + $0x50] ss:$2 sm:$0xff] }
 0x10d   : > { %681 = vst.msk [vmem:[#allocation2 + $0x70] sm:$0xff] %vm666_vm3, %v648_v10  ;;  %697 = vst.msk [vmem:[#allocation2 + $0xf0] sm:$0xff] %vm666_vm3, %v664_v11  ;;  %v733_v23 = vld [vmem:[#allocation2 + $0x51] ss:$2 sm:$0xff]  ;;  %v575_v24 = vmax.f32 %v487_v16, 0.0  ;;  %v591_v25 = vmax.f32 %v551_v17, 0.0  ;;  %v613_v22 = vmul.f32 %v1173_v27, %v577_v19 }
 0x10e   : > { %679 = vst.msk [vmem:[#allocation2 + $0x60] sm:$0xff] %vm666_vm3, %v646_v12  ;;  %695 = vst.msk [vmem:[#allocation2 + $0xe0] sm:$0xff] %vm666_vm3, %v662_v18  ;;  %v787_v26 = vld [vmem:[#allocation2 + $0xd0] ss:$2 sm:$0xff]  ;;  %v789_v28 = vld [vmem:[#allocation2 + $0xd1] ss:$2 sm:$0xff]  ;;  %v629_v29 = vmul.f32 %v1173_v27, %v593_v20  ;;  %v735_v32 = vmax.f32 %v731_v21, %v733_v23 }
 0x10f   : > { %v611_v30 = vmul.f32 %v1173_v27, %v575_v24  ;;  %v627_v31 = vmul.f32 %v1173_v27, %v591_v25  ;;  %v649_v33 = vadd.f32 %v1182_v37, %v613_v22  ;;  %v791_v35 = vmax.f32 %v787_v26, %v789_v28 }
 0x110   : > { %v665_v34 = vadd.f32 %v1182_v37, %v629_v29 }
 0x111   : > { %v647_v40 = vadd.f32 %v1182_v37, %v611_v30  ;;  %v663_v41 = vadd.f32 %v1182_v37, %v627_v31  ;;  %682 = vst.msk [vmem:[#allocation2 + $0x78] sm:$0xff] %vm666_vm3, %v649_v33 }
 0x112   : > { %698 = vst.msk [vmem:[#allocation2 + $0xf8] sm:$0xff] %vm666_vm3, %v665_v34 }
 0x113   : > { %v727_v36 = vld [vmem:[#allocation2 + $0x40] ss:$2 sm:$0xff]  ;;  %v729_v38 = vld [vmem:[#allocation2 + $0x41] ss:$2 sm:$0xff]  ;;  %680 = vst.msk [vmem:[#allocation2 + $0x68] sm:$0xff] %vm666_vm3, %v647_v40  ;;  %696 = vst.msk [vmem:[#allocation2 + $0xe8] sm:$0xff] %vm666_vm3, %v663_v41 }
 0x114   : > { %v783_v39 = vld [vmem:[#allocation2 + $0xc0] ss:$2 sm:$0xff]  ;;  %v734_v42 = vmax.f32 %v727_v36, %v729_v38  ;;  %v785_v43 = vld [vmem:[#allocation2 + $0xc1] ss:$2 sm:$0xff] }
 0x115   : > { %v790_v27 = vmax.f32 %v783_v39, %v785_v43 }
 0x116   : > { %v736_v44 = vmax.f32 %v734_v42, %v735_v32 }
 0x117   : > { %v792_v45 = vmax.f32 %v790_v27, %v791_v35 }
 0x118   : > { %v737_v46 = vpack.c.bf16 %v736_v44, %v736_v44  ;;  %v745_v37 = vld [vmem:[#allocation2 + $0x70] ss:$2 sm:$0xff]  ;;  %v747_v48 = vld [vmem:[#allocation2 + $0x71] ss:$2 sm:$0xff] }
 0x119   : > { %v793_v47 = vpack.c.bf16 %v792_v45, %v792_v45  ;;  %v801_v49 = vld [vmem:[#allocation2 + $0xf0] ss:$2 sm:$0xff]  ;;  %v749_v50 = vmax.f32 %v745_v37, %v747_v48  ;;  %v803_v51 = vld [vmem:[#allocation2 + $0xf1] ss:$2 sm:$0xff] }
 0x11a   : > { %944 = vst.msk [vmem:[%s1255_s6 + $0x8] sm:$0xf] %vm710_vm4, %v737_v46  ;;  %v741_v52 = vld [vmem:[#allocation2 + $0x60] ss:$2 sm:$0xff]  ;;  %v743_v53 = vld [vmem:[#allocation2 + $0x61] ss:$2 sm:$0xff]  ;;  %v805_v54 = vmax.f32 %v801_v49, %v803_v51 }
 0x11b   : > { %948 = vst.msk [vmem:[%s1255_s6 + $0x18] sm:$0xf] %vm710_vm4, %v793_v47  ;;  %v748_v55 = vmax.f32 %v741_v52, %v743_v53  ;;  %v797_v56 = vld [vmem:[#allocation2 + $0xe0] ss:$2 sm:$0xff]  ;;  %v799_v57 = vld [vmem:[#allocation2 + $0xe1] ss:$2 sm:$0xff] }
 0x11c   : > { %v804_v58 = vmax.f32 %v797_v56, %v799_v57 }
 0x11d   : > { %v750_v59 = vmax.f32 %v748_v55, %v749_v50 }
 0x11e   : > { %v806_v60 = vmax.f32 %v804_v58, %v805_v54 }
 0x11f   : > { %v751_v61 = vpack.c.bf16 %v750_v59, %v750_v59 }
 0x120   : > { %v807_v62 = vpack.c.bf16 %v806_v60, %v806_v60 }
 0x121   : > { %945 = vst.msk [vmem:[%s1255_s6 + $0xc] sm:$0xf] %vm710_vm4, %v751_v61 }
 0x122   : > { %949 = vst.msk [vmem:[%s1255_s6 + $0x1c] sm:$0xf] %vm710_vm4, %v807_v62 }
 0x123 PF: > { %s13_s14 = sadd.s32 1, %s1077_s14   ;;  %s1342_s12 = smov %s1073_s13 }
 0x124   : > { %p10_p5 = scmp.ge.s32.totalorder %s13_s14, 4   ;;  %s1343_s13 = smov %s1345_s15 }
 0x126   :  { %12 = sbr.rel (!%p10_p5) target bundleno = 2 (0x2), region = 100 }

// kernel: pointnet_forward.4
= control target key start
LH: loop header
LB: loop body
LE: loop exit
PB: predicated region body
PF: predicated region fallthrough
CT: control target
= control target key end

     0   :  { %s998_s12 = smov 0   ;;  %s1000_s13 = smov 0   ;;  %s1148_s0 = inlined_call_operand.vmem [shape: bf16[2,64,288], index: 0, kind: input, shape index: {}]   ;;  %s1149_s1 = inlined_call_operand.vmem [shape: bf16[288,64], index: 1, kind: input, shape index: {}]   ;;  %s1150_s2 = inlined_call_operand.vmem [shape: f32[3,64], index: 2, kind: input, shape index: {}]   ;;  %s1151_s3 = inlined_call_operand.vmem [shape: bf16[2,4,4,64], index: 3, kind: output, shape index: {}]  }
   0x1   :  { %s1002_s14 = smov 0  }
   0x2 LB: > { %s25_s15 = sadd.s32 1, %s972_s13  ;;  %p774_p0 = scmp.ge.s32.totalorder %s976_s14, 1  ;;  %s976_s14 = sphi %s1002_s14, %s13_s14   ;;  %s972_s13 = sphi %s1000_s13, %s1153_s13   ;;  %s968_s12 = sphi %s998_s12, %s1152_s12  }
   0x3   : > { %p27_p1 = scmp.ge.s32.totalorder %s25_s15, 2  ;;  %p159_p2 = scmp.lt.s32.totalorder %s976_s14, 3 }
   0x5   : > { %s1155_s15 = smov (%p27_p1, %s25_s15), 0  ;;  %p160_p3 = pnand %p774_p0, %p159_p2 }
   0x6   : > { %v920_v0 = vld [vmem:[%s1149_s1 + $0x40] sm:$0xff] (!%p160_p3)   ;;  %v922_v2 = vld [vmem:[%s1149_s1 + $0x48] sm:$0xff] (!%p160_p3)   ;;  %p193_p4 = scmp.lt.s32.totalorder (!%p160_p3), %s968_s12, 1  ;;  %v924_v4 = vld [vmem:[%s1149_s1 + $0x50] sm:$0xff] (!%p160_p3)   ;;  %vm441_vm0 = vcmask (!%p160_p3), 261120   ;;  %vm616_vm1 = vcmask (!%p160_p3), 523264  }
   0x7   : > { %163 = sbr.rel (%p160_p3) target bundleno = 297 (0x129), region = 32  ;;  %v921_v1 = vld [vmem:[%s1149_s1] sm:$0xff] (!%p160_p3)   ;;  %821 = vmatprep.subr.bf16.mxu0 (!%p160_p3), %v920_v0  ;;  %879 = vmatprep.subr.bf16.mxu1 (!%p160_p3), %v920_v0  ;;  %v923_v3 = vld [vmem:[%s1149_s1 + $0x8] sm:$0xff] (!%p160_p3)   ;;  %v925_v5 = vld [vmem:[%s1149_s1 + $0x10] sm:$0xff] (!%p160_p3)   ;;  %vm636_vm2 = vcmask (!%p160_p3), 517120  }
   0x8   : > { %822 = vmatpush3.bf16.msra.mxu0 (!%p160_p3), %v921_v1  ;;  %887 = vmatpush3.bf16.msra.mxu1 (!%p160_p3), %v921_v1  ;;  %v926_v6 = vld [vmem:[%s1149_s1 + $0x58] sm:$0xff] (!%p160_p3)   ;;  %v928_v8 = vld [vmem:[%s1149_s1 + $0x60] sm:$0xff] (!%p160_p3)   ;;  %v930_v10 = vld [vmem:[%s1149_s1 + $0x68] sm:$0xff] (!%p160_p3)  }
   0x9   : > { %823 = vmatprep.subr.bf16.mxu0 (!%p160_p3), %v922_v2  ;;  %880 = vmatprep.subr.bf16.mxu1 (!%p160_p3), %v922_v2  ;;  %v927_v7 = vld [vmem:[%s1149_s1 + $0x18] sm:$0xff] (!%p160_p3)   ;;  %v929_v9 = vld [vmem:[%s1149_s1 + $0x20] sm:$0xff] (!%p160_p3)   ;;  %v931_v13 = vld [vmem:[%s1149_s1 + $0x28] sm:$0xff] (!%p160_p3)  }
   0xa   : > { %v932_v14 = vld [vmem:[%s1149_s1 + $0x70] sm:$0xff] (!%p160_p3)   ;;  %v934_v16 = vld [vmem:[%s1149_s1 + $0x78] sm:$0xff] (!%p160_p3)   ;;  %v942_v18 = vld [vmem:[%s1149_s1 + $0x80] sm:$0xff] (!%p160_p3)  }
   0xb   : > { %v933_v15 = vld [vmem:[%s1149_s1 + $0x30] sm:$0xff] (!%p160_p3)   ;;  %v935_v17 = vld [vmem:[%s1149_s1 + $0x38] sm:$0xff] (!%p160_p3)   ;;  %v943_v22 = vld [vmem:[%s1149_s1 + $0x88] sm:$0xff] (!%p160_p3)  }
   0xc   : > { %824 = vmatpush3.bf16.msra.mxu0 (!%p160_p3), %v923_v3  ;;  %888 = vmatpush3.bf16.msra.mxu1 (!%p160_p3), %v923_v3  ;;  %v778_v42 = vld [vmem:[%s1150_s2] ss:$0 sm:$0xff] (!%p160_p3)  ;;  %v1100_v53 = vld [vmem:[%s1150_s2 + $0x1] ss:$0 sm:$0xff] (!%p160_p3)  ;;  %v1105_v60 = vld [vmem:[%s1150_s2 + $0x2] ss:$0 sm:$0xff] (!%p160_p3) }
   0xd   : > { %825 = vmatprep.subr.bf16.mxu0 (!%p160_p3), %v924_v4  ;;  %881 = vmatprep.subr.bf16.mxu1 (!%p160_p3), %v924_v4 }
   0xe   : > { %s1157_s12 = smov (!%p193_p4, %s968_s12), 1 }
   0xf   : > { %s895_s30 = smul.u32 96, %s1157_s12  ;;  %s820_s16 = sshll.u32 %s1157_s12, 3 }
  0x10   : > { %826 = vmatpush3.bf16.msra.mxu0 %v925_v5  ;;  %889 = vmatpush3.bf16.msra.mxu1 %v925_v5  ;;  %s211_s19 = scalar_lea.vmem %s1151_s3, %s820_s16 }
  0x11   : > { %827 = vmatprep.subr.bf16.mxu0 %v926_v6  ;;  %882 = vmatprep.subr.bf16.mxu1 %v926_v6  ;;  %s1049_s10 = scalar_lea.vmem %s1148_s0, %s895_s30 }
  0x12   : > { %v938_v11 = vld [vmem:[%s1049_s10 + $0x4] ss:$12 sps:$4 sm:$0xff]   ;;  %v941_v12 = vld [vmem:[%s1049_s10 + $0x4c] ss:$12 sps:$4 sm:$0xff]   ;;  %v939_v20 = vld [vmem:[%s1049_s10 + $0x48] ss:$12 sps:$4 sm:$0xff]  }
  0x13   : > { %486 = vmatprep.mubr.bf16.mxu0 %v938_v11  ;;  %510 = vmatprep.mubr.bf16.mxu1 %v941_v12  ;;  %v936_v19 = vld [vmem:[%s1049_s10] ss:$12 sps:$4 sm:$0xff]   ;;  %v944_v21 = vld [vmem:[%s1049_s10 + $0x1c] ss:$12 sps:$4 sm:$0xff]   ;;  %v947_v24 = vld [vmem:[%s1049_s10 + $0x18] ss:$12 sps:$4 sm:$0xff]  }
  0x14   : > { %828 = vmatpush3.bf16.msra.mxu0 %v927_v7  ;;  %890 = vmatpush3.bf16.msra.mxu1 %v927_v7  ;;  %v946_v23 = vld [vmem:[%s1049_s10 + $0x8] ss:$12 sps:$4 sm:$0xff]   ;;  %v948_v25 = vld [vmem:[%s1049_s10 + $0x20] ss:$12 sps:$4 sm:$0xff]   ;;  %v951_v27 = vld [vmem:[%s1049_s10 + $0x38] ss:$12 sps:$4 sm:$0xff]  }
  0x15   : > { %829 = vmatprep.subr.bf16.mxu0 %v928_v8  ;;  %883 = vmatprep.subr.bf16.mxu1 %v928_v8  ;;  %v949_v26 = vld [vmem:[%s1049_s10 + $0x34] ss:$12 sps:$4 sm:$0xff]   ;;  %v952_v28 = vld [vmem:[%s1049_s10 + $0x30] ss:$12 sps:$4 sm:$0xff]  }
  0x16   : > { %v953_v29 = vld [vmem:[%s1049_s10 + $0x50] ss:$12 sps:$4 sm:$0xff]  }
  0x18   : > { %830 = vmatpush3.bf16.msra.mxu0 %v929_v9  ;;  %891 = vmatpush3.bf16.msra.mxu1 %v929_v9 }
  0x19   : > { %831 = vmatprep.subr.bf16.mxu0 %v930_v10  ;;  %884 = vmatprep.subr.bf16.mxu1 %v930_v10 }
  0x1c   : > { %832 = vmatpush3.bf16.msra.mxu0 %v931_v13  ;;  %892 = vmatpush3.bf16.msra.mxu1 %v931_v13 }
  0x1d   : > { %833 = vmatprep.subr.bf16.mxu0 %v932_v14  ;;  %885 = vmatprep.subr.bf16.mxu1 %v932_v14 }
  0x20   : > { %834 = vmatpush3.bf16.msra.mxu0 %v933_v15  ;;  %893 = vmatpush3.bf16.msra.mxu1 %v933_v15 }
  0x21   : > { %835 = vmatprep.subr.bf16.mxu0 %v934_v16  ;;  %886 = vmatprep.subr.bf16.mxu1 %v934_v16 }
  0x24   : > { %836 = vmatpush3.bf16.msra.mxu0 %v935_v17  ;;  %894 = vmatpush3.bf16.msra.mxu1 %v935_v17 }
  0x25   : > { %867 = vmatprep.subr.bf16.mxu1 %v942_v18 }
  0x27   : > { %487 = vmatmul.mubr.bf16.vlgmr.msra.gmra.mrb[0].mxu0 %v936_v19  ;;  %511 = vmatmul.mubr.bf16.vlgmr.msra.gmra.mrb[0].mxu1 %v939_v20 }
  0x28   : > { %868 = vmatpush3.bf16.msra.mxu1 %v942_v18  ;;  %494 = vmatprep.mubr.bf16.mxu0 %v944_v21 }
  0x29   : > { %869 = vmatprep.subr.bf16.mxu1 %v943_v22  ;;  %871 = vmatprep.mubr.msk.bf16.mxu1 %vm441_vm0, %v946_v23 }
  0x2c   : > { %870 = vmatpush3.bf16.msra.mxu1 %v943_v22 }
  0x2f   : > { %495 = vmatmul.mubr.bf16.gmra.mrb[4].mxu0 %v947_v24  ;;  %872 = vmatmul.mubr.msk.bf16.vlgmr.msra.gmra.mrb[4].mxu1 %vm441_vm0, %v948_v25 }
  0x30   : > { %502 = vmatprep.mubr.bf16.mxu0 %v949_v26  ;;  %875 = vmatprep.mubr.msk.bf16.mxu1 %vm441_vm0, %v951_v27 }
  0x37   : > { %503 = vmatmul.mubr.bf16.gmra.mrb[8].mxu0 %v952_v28  ;;  %876 = vmatmul.mubr.msk.bf16.gmra.mrb[8].mxu1 %vm441_vm0, %v953_v29 }
  0xfa   : > { %v837_v30 = vpop.f32.mrb[0].mxu0  ;;  %v855_v31 = vpop.f32.mrb[0].mxu1 }
  0xfb   : > { %v838_v32 = vpop.f32.mrb[1].mxu0  ;;  %v856_v33 = vpop.f32.mrb[1].mxu1 }
  0xfc   : > { %v839_v34 = vadd.f32 %v838_v32, %v837_v30  ;;  %v840_v35 = vpop.f32.mrb[2].mxu0  ;;  %v857_v36 = vadd.f32 %v856_v33, %v855_v31  ;;  %v858_v37 = vpop.f32.mrb[2].mxu1 }
  0xfd   : > { %v841_v38 = vpop.f32.mrb[3].mxu0  ;;  %v859_v39 = vpop.f32.mrb[3].mxu1 }
  0xfe   : > { %v842_v40 = vadd.f32 %v841_v38, %v840_v35  ;;  %v860_v41 = vadd.f32 %v859_v39, %v858_v37  ;;  %v489_v45 = vadd.f32 %v839_v34, %v778_v42  ;;  %v513_v1 = vadd.f32 %v857_v36, %v778_v42 }
 0x100   : > { %v492_v52 = vadd.f32 %v842_v40, %v778_v42  ;;  %v516_v11 = vadd.f32 %v860_v41, %v778_v42 }
 0x102   : > { %v843_v43 = vpop.f32.mrb[4].mxu0  ;;  %v873_v44 = vpop.f32.mrb[4].mxu1 }
 0x103   : > { %v844_v46 = vpop.f32.mrb[5].mxu0  ;;  %v553_v47 = vpop.f32.mrb[5].mxu1 }
 0x104   : > { %v845_v48 = vadd.f32 %v844_v46, %v843_v43  ;;  %v554_v49 = vadd.f32 %v553_v47, %v489_v45  ;;  %v846_v50 = vpop.f32.mrb[6].mxu0  ;;  %v874_v51 = vpop.f32.mrb[6].mxu1 }
 0x105   : > { %v847_v54 = vpop.f32.mrb[7].mxu0  ;;  %v556_v55 = vpop.f32.mrb[7].mxu1 }
 0x106   : > { %v497_v56 = vadd.f32 %v845_v48, %v778_v42  ;;  %v584_v57 = vmax.f32 %v554_v49, 0.0  ;;  %v848_v58 = vadd.f32 %v847_v54, %v846_v50  ;;  %v557_v59 = vadd.f32 %v556_v55, %v492_v52 }
 0x108   : > { %v562_v61 = vadd.f32 %v873_v44, %v497_v56  ;;  %v596_v62 = vmul.f32 %v1100_v53, %v584_v57  ;;  %v500_v63 = vadd.f32 %v848_v58, %v778_v42  ;;  %v585_v0 = vmax.f32 %v557_v59, 0.0 }
 0x10a   : > { %v586_v2 = vmax.f32 %v562_v61, 0.0  ;;  %v608_v3 = vadd.f32 %v1105_v60, %v596_v62  ;;  %v565_v4 = vadd.f32 %v874_v51, %v500_v63  ;;  %v597_v5 = vmul.f32 %v1100_v53, %v585_v0  ;;  %v849_v6 = vpop.f32.mrb[8].mxu0  ;;  %v877_v7 = vpop.f32.mrb[8].mxu1 }
 0x10b   : > { %v578_v8 = vadd.f32 %v877_v7, %v513_v1  ;;  %v850_v9 = vpop.f32.mrb[9].mxu0  ;;  %v569_v10 = vpop.f32.mrb[9].mxu1 }
 0x10c   : > { %v598_v12 = vmul.f32 %v1100_v53, %v586_v2  ;;  %617 = vst.msk [vmem:[#allocation2] sm:$0xff] %vm616_vm1, %v608_v3  ;;  %v587_v13 = vmax.f32 %v565_v4, 0.0  ;;  %v609_v14 = vadd.f32 %v1105_v60, %v597_v5  ;;  %v851_v15 = vadd.f32 %v850_v9, %v849_v6  ;;  %v852_v16 = vpop.f32.mrb[10].mxu0  ;;  %v878_v17 = vpop.f32.mrb[10].mxu1 }
 0x10d   : > { %v590_v18 = vmax.f32 %v578_v8, 0.0  ;;  %v581_v19 = vadd.f32 %v878_v17, %v516_v11  ;;  %v853_v20 = vpop.f32.mrb[11].mxu0  ;;  %v572_v21 = vpop.f32.mrb[11].mxu1 }
 0x10e   : > { %v610_v22 = vadd.f32 %v1105_v60, %v598_v12  ;;  %v599_v23 = vmul.f32 %v1100_v53, %v587_v13  ;;  %618 = vst.msk [vmem:[#allocation2 + $0x8] sm:$0xff] %vm616_vm1, %v609_v14  ;;  %v505_v24 = vadd.f32 %v851_v15, %v778_v42  ;;  %v854_v25 = vadd.f32 %v853_v20, %v852_v16 }
 0x10f   : > { %v602_v26 = vmul.f32 %v1100_v53, %v590_v18  ;;  %v591_v27 = vmax.f32 %v581_v19, 0.0 }
 0x110   : > { %619 = vst.msk [vmem:[#allocation2 + $0x10] sm:$0xff] %vm616_vm1, %v610_v22  ;;  %v611_v28 = vadd.f32 %v1105_v60, %v599_v23  ;;  %v570_v29 = vadd.f32 %v569_v10, %v505_v24  ;;  %v508_v30 = vadd.f32 %v854_v25, %v778_v42 }
 0x111   : > { %v614_v31 = vadd.f32 %v1105_v60, %v602_v26  ;;  %v603_v32 = vmul.f32 %v1100_v53, %v591_v27 }
 0x112   : > { %620 = vst.msk [vmem:[#allocation2 + $0x18] sm:$0xff] %vm616_vm1, %v611_v28  ;;  %v588_v33 = vmax.f32 %v570_v29, 0.0  ;;  %v573_v34 = vadd.f32 %v572_v21, %v508_v30 }
 0x113   : > { %v625_v35 = vld [vmem:[#allocation2] ss:$2 sm:$0xf]  ;;  %v627_v36 = vld [vmem:[#allocation2 + $0x1] ss:$2 sm:$0xf]  ;;  %v615_v37 = vadd.f32 %v1105_v60, %v603_v32 }
 0x114   : > { %623 = vst.msk [vmem:[#allocation2 + $0x30] sm:$0xff] %vm616_vm1, %v614_v31  ;;  %v600_v38 = vmul.f32 %v1100_v53, %v588_v33  ;;  %v589_v39 = vmax.f32 %v573_v34, 0.0  ;;  %v632_v42 = vmax.f32 %v625_v35, %v627_v36 }
 0x115   : > { %v629_v40 = vld [vmem:[#allocation2 + $0x8] ss:$2 sm:$0xf]  ;;  %v631_v41 = vld [vmem:[#allocation2 + $0x9] ss:$2 sm:$0xf] }
 0x116   : > { %624 = vst.msk [vmem:[#allocation2 + $0x38] sm:$0xff] %vm616_vm1, %v615_v37  ;;  %v633_v43 = vmax.f32 %v629_v40, %v631_v41  ;;  %v612_v44 = vadd.f32 %v1105_v60, %v600_v38  ;;  %v601_v45 = vmul.f32 %v1100_v53, %v589_v39 }
 0x117   : > { %v639_v46 = vld [vmem:[#allocation2 + $0x10] ss:$2 sm:$0xf]  ;;  %v641_v47 = vld [vmem:[#allocation2 + $0x11] ss:$2 sm:$0xf] }
 0x118   : > { %v634_v48 = vmax.f32 %v632_v42, %v633_v43  ;;  %621 = vst.msk [vmem:[#allocation2 + $0x20] sm:$0xff] %vm616_vm1, %v612_v44  ;;  %v613_v49 = vadd.f32 %v1105_v60, %v601_v45  ;;  %v646_v52 = vmax.f32 %v639_v46, %v641_v47 }
 0x119   : > { %v643_v50 = vld [vmem:[#allocation2 + $0x18] ss:$2 sm:$0xf]  ;;  %v645_v51 = vld [vmem:[#allocation2 + $0x19] ss:$2 sm:$0xf] }
 0x11a   : > { %v647_v54 = vmax.f32 %v643_v50, %v645_v51  ;;  %v635_v55 = vpack.c.bf16 %v634_v48, %v634_v48  ;;  %622 = vst.msk [vmem:[#allocation2 + $0x28] sm:$0xff] %vm616_vm1, %v613_v49 }
 0x11b   : > { %v667_v56 = vld [vmem:[#allocation2 + $0x30] ss:$2 sm:$0xf]  ;;  %v669_v57 = vld [vmem:[#allocation2 + $0x31] ss:$2 sm:$0xf] }
 0x11c   : > { %v648_v53 = vmax.f32 %v646_v52, %v647_v54  ;;  %637 = vst.msk [vmem:[%s211_s19] sm:$0x3] %vm636_vm2, %v635_v55  ;;  %v674_v61 = vmax.f32 %v667_v56, %v669_v57 }
 0x11d   : > { %v671_v58 = vld [vmem:[#allocation2 + $0x38] ss:$2 sm:$0xf]  ;;  %v673_v59 = vld [vmem:[#allocation2 + $0x39] ss:$2 sm:$0xf] }
 0x11e   : > { %v675_v60 = vmax.f32 %v671_v58, %v673_v59  ;;  %v649_v62 = vpack.c.bf16 %v648_v53, %v648_v53 }
 0x11f   : > { %v653_v63 = vld [vmem:[#allocation2 + $0x20] ss:$2 sm:$0xf]  ;;  %v655_v0 = vld [vmem:[#allocation2 + $0x21] ss:$2 sm:$0xf] }
 0x120   : > { %v676_v1 = vmax.f32 %v674_v61, %v675_v60  ;;  %815 = vst.msk [vmem:[%s211_s19 + $0x2] sm:$0x3] %vm636_vm2, %v649_v62  ;;  %v660_v5 = vmax.f32 %v653_v63, %v655_v0 }
 0x121   : > { %v657_v3 = vld [vmem:[#allocation2 + $0x28] ss:$2 sm:$0xf]  ;;  %v659_v4 = vld [vmem:[#allocation2 + $0x29] ss:$2 sm:$0xf] }
 0x122   : > { %v677_v2 = vpack.c.bf16 %v676_v1, %v676_v1  ;;  %v661_v6 = vmax.f32 %v657_v3, %v659_v4 }
 0x124   : > { %817 = vst.msk [vmem:[%s211_s19 + $0x6] sm:$0x3] %vm636_vm2, %v677_v2  ;;  %v662_v7 = vmax.f32 %v660_v5, %v661_v6 }
 0x126   : > { %v663_v8 = vpack.c.bf16 %v662_v7, %v662_v7 }
 0x128   : > { %816 = vst.msk [vmem:[%s211_s19 + $0x4] sm:$0x3] %vm636_vm2, %v663_v8 }
 0x129 PF: > { %s13_s14 = sadd.s32 1, %s976_s14   ;;  %s1152_s12 = smov %s972_s13 }
 0x12a   : > { %p10_p5 = scmp.ge.s32.totalorder %s13_s14, 4   ;;  %s1153_s13 = smov %s1155_s15 }
 0x12c   :  { %12 = sbr.rel (!%p10_p5) target bundleno = 2 (0x2), region = 80 }

// kernel: pointnet_forward.5
= control target key start
LH: loop header
LB: loop body
LE: loop exit
PB: predicated region body
PF: predicated region fallthrough
CT: control target
= control target key end

     0   :  { %16 = vsyncpa [#allocation6], 0  ;;  %s4601_s0 = inlined_call_operand.vmem [shape: bf16[2,42,64], index: 0, kind: input, shape index: {}]   ;;  %s4602_s1 = inlined_call_operand.vmem [shape: bf16[9,64,128], index: 1, kind: input, shape index: {}]   ;;  %s4603_s2 = inlined_call_operand.vmem [shape: f32[3,128], index: 2, kind: input, shape index: {}]   ;;  %s4604_s3 = inlined_call_operand.vmem [shape: bf16[9,128,128], index: 3, kind: input, shape index: {}]   ;;  %s4605_s4 = inlined_call_operand.vmem [shape: f32[3,128], index: 4, kind: input, shape index: {}]   ;;  %s4606_s5 = inlined_call_operand.vmem [shape: bf16[128,128], index: 5, kind: input, shape index: {}]   ;;  %s4607_s6 = inlined_call_operand.vmem [shape: f32[1,128], index: 6, kind: input, shape index: {}]   ;;  %s4608_s7 = inlined_call_operand.vmem [shape: bf16[128,64], index: 7, kind: input, shape index: {}]   ;;  %s4609_s8 = inlined_call_operand.vmem [shape: f32[1,64], index: 8, kind: input, shape index: {}]   ;;  %s4610_s9 = inlined_call_operand.vmem [shape: bf16[64,18], index: 9, kind: input, shape index: {}]   ;;  %s4611_s10 = inlined_call_operand.vmem [shape: f32[1,18], index: 10, kind: input, shape index: {}]   ;;  %s4612_s11 = inlined_call_operand.hbm [shape: f32[2,1,18], index: 11, kind: output, shape index: {}]  }
   0x1   :  { %18 = vsyncpa [#allocation6 + $0x1], 0  ;;  %s3901_s17 = smov 0   ;;  %s3903_s18 = smov 0  }
   0x2   :  { %s3905_s19 = smov 0   ;;  %s3907_s20 = smov 0  }
   0x3 LB: > { %s3922_s21 = sadd.s32 4294967295, %s3836_s20   ;;  %s2727_s22 = sadd.s32 4294967294, %s3836_s20   ;;  %s3836_s20 = sphi %s3907_s20, %s4620_s20   ;;  %s3832_s19 = sphi %s3905_s19, %s4619_s19   ;;  %s3828_s18 = sphi %s3903_s18, %s4618_s18   ;;  %s3824_s17 = sphi %s3901_s17, %s4617_s17  }
   0x4   : > { %s3926_s23 = sadd.s32 1, %s3836_s20   ;;  %s267_s24 = sadd.s32 1, %s3832_s19 }
   0x5   : > { %s264_s25 = ssub.s32 %s3836_s20, %s3926_s23  ;;  %p277_p0 = scmp.ne.s32.totalorder %s3832_s19, %s3828_s18 }
   0x6   : > { %p265_p1 = scmp.eq.s32.totalorder %s264_s25, 0  ;;  %p278_p2 = scmp.eq.s32.totalorder %s3922_s21, 1 }
   0x7   : > { %p283_p3 = scmp.ne.s32.totalorder %s3828_s18, %s3824_s17  ;;  %p284_p4 = scmp.eq.s32.totalorder %s2727_s22, 1 }
   0x8   : > { %s3937_s26 = scalar_select %p265_p1, %s3832_s19, %s267_s24  }
   0x9   : > { %p3939_p5 = por %p278_p2, %p277_p0  ;;  %p3943_p6 = por %p284_p4, %p283_p3 }
   0xa   : > { %4613 = sst [smem:[#allocation8_spill]] %s3937_s26  ;;  %p2730_p7 = scmp.ge.s32.totalorder %s3836_s20, 1 }
   0xb   : > { %p340_p8 = scmp.lt.s32.totalorder %s3836_s20, 3 }
   0xd   : > { %p341_p9 = pnand %p2730_p7, %p340_p8 }
   0xe   : > { %v3633_v0 = vld [vmem:[%s4602_s1 + $0x20] sm:$0xff] (!%p341_p9)   ;;  %p379_p10 = scmp.lt.s32.totalorder (!%p341_p9), %s3922_s21, 1  ;;  %v3635_v2 = vld [vmem:[%s4602_s1 + $0x28] sm:$0xff] (!%p341_p9)   ;;  %v3637_v4 = vld [vmem:[%s4602_s1 + $0x30] sm:$0xff] (!%p341_p9)   ;;  %vm456_vm0 = vcmask (!%p341_p9), 523264   ;;  %vm602_vm2 = vcmask (!%p341_p9), 1046528  }
   0xf   : > { %344 = sbr.rel (%p341_p9) target bundleno = 1378 (0x562), region = 64  ;;  %v3634_v1 = vld [vmem:[%s4602_s1] sm:$0xff] (!%p341_p9)   ;;  %3251 = vmatprep.subr.bf16.mxu0 (!%p341_p9), %v3633_v0  ;;  %v3636_v3 = vld [vmem:[%s4602_s1 + $0x8] sm:$0xff] (!%p341_p9)   ;;  %v3638_v5 = vld [vmem:[%s4602_s1 + $0x10] sm:$0xff] (!%p341_p9)   ;;  %vm416_vm1 = vsmask.f32 (!%p341_p9), 7424 }
  0x10   : > { %3263 = vmatprep.subr.bf16.mxu1 (!%p341_p9), %v3634_v1  ;;  %3252 = vmatpush3.bf16.msra.mxu0 (!%p341_p9), %v3633_v0  ;;  %v3639_v6 = vld [vmem:[%s4602_s1 + $0x38] sm:$0xff] (!%p341_p9)   ;;  %v3644_v16 = vld [vmem:[%s4602_s1 + $0x40] sm:$0xff] (!%p341_p9)   ;;  %v3646_v25 = vld [vmem:[%s4602_s1 + $0x48] sm:$0xff] (!%p341_p9)   ;;  %vm704_vm3 = vcmask (!%p341_p9), 1044480   ;;  %vm802_vm4 = vsmask.f32 (!%p341_p9), 4352 }
  0x11   : > { %3264 = vmatpush3.bf16.msra.mxu1 (!%p341_p9), %v3634_v1  ;;  %3253 = vmatprep.subr.bf16.mxu0 (!%p341_p9), %v3635_v2  ;;  %v3640_v10 = vld [vmem:[%s4602_s1 + $0x18] sm:$0xff] (!%p341_p9)   ;;  %v3645_v20 = vld [vmem:[%s4602_s1 + $0x60] sm:$0xff] (!%p341_p9)   ;;  %v3647_v27 = vld [vmem:[%s4602_s1 + $0x68] sm:$0xff] (!%p341_p9)   ;;  %vm1016_vm5 = vcmask (!%p341_p9), 1045504   ;;  %vm1114_vm6 = vsmask.f32 (!%p341_p9), 5376 }
  0x12   : > { %3265 = vmatprep.subr.bf16.mxu1 (!%p341_p9), %v3636_v3  ;;  %v3648_v33 = vld [vmem:[%s4602_s1 + $0x50] sm:$0xff] (!%p341_p9)   ;;  %v3650_v42 = vld [vmem:[%s4602_s1 + $0x58] sm:$0xff] (!%p341_p9)   ;;  %v3653_v46 = vld [vmem:[%s4602_s1 + $0x80] sm:$0xff] (!%p341_p9)   ;;  %vm3839_vm7 = vmmov (!%p341_p9), 0   ;;  %vm2657_vm8 = vcmask (!%p341_p9), 139264   ;;  %s3840_s15 = smov (!%p341_p9), [#allocation5]  }
  0x13   : > { %v3649_v36 = vld [vmem:[%s4602_s1 + $0x70] sm:$0xff] (!%p341_p9)   ;;  %v3651_v45 = vld [vmem:[%s4602_s1 + $0x78] sm:$0xff] (!%p341_p9)   ;;  %v3656_v51 = vld [vmem:[%s4602_s1 + $0xa0] sm:$0xff] (!%p341_p9)   ;;  %s3778_s22 = sshll.u32 (!%p341_p9), %s3840_s15, 4  ;;  %s3779_s22 = int_to_ptr.vmem [resolvable:$false] %s3778_s22 }
  0x14   : > { %3254 = vmatpush3.bf16.msra.mxu0 (!%p341_p9), %v3635_v2  ;;  %v3657_v54 = vld [vmem:[%s4602_s1 + $0x88] sm:$0xff] (!%p341_p9)   ;;  %v3659_v61 = vld [vmem:[%s4602_s1 + $0x90] sm:$0xff] (!%p341_p9)   ;;  %s3780_s24 = scalar_lea.vmem (!%p341_p9), %s3779_s22, 32 }
  0x15   : > { %3266 = vmatpush3.bf16.msra.mxu1 (!%p341_p9), %v3636_v3  ;;  %3255 = vmatprep.subr.bf16.mxu0 (!%p341_p9), %v3637_v4  ;;  %v3658_v55 = vld [vmem:[%s4602_s1 + $0xa8] sm:$0xff] (!%p341_p9)   ;;  %v3660_v62 = vld [vmem:[%s4602_s1 + $0xb0] sm:$0xff] (!%p341_p9)  }
  0x16   : > { %s380_s16 = scalar_select %p379_p10, %s3922_s21, 1  ;;  %3267 = vmatprep.subr.bf16.mxu1 %v3638_v5 }
  0x18   : > { %s3591_s30 = smul.u32 24, %s380_s16  ;;  %3256 = vmatpush3.bf16.msra.mxu0 %v3637_v4  ;;  %s3090_s16 = sshll.u32 %s3922_s21, 4 }
  0x19   : > { %3268 = vmatpush3.bf16.msra.mxu1 %v3638_v5  ;;  %3257 = vmatprep.subr.bf16.mxu0 %v3639_v6  ;;  %s4559_s13 = scalar_lea.hbm %s4612_s11, %s3090_s16 }
  0x1a   : > { %s3972_s26 = scalar_lea.vmem %s4601_s0, %s3591_s30  ;;  %3269 = vmatprep.subr.bf16.mxu1 %v3640_v10 }
  0x1b   : > { %v385_v7 = vld [vmem:[%s3972_s26] sm:$0xf]  ;;  %v3979_v8 = vld [vmem:[%s3972_s26 + $0x4] sm:$0xf]  ;;  %v3982_v9 = vld [vmem:[%s3972_s26 + $0x8] sm:$0xf] }
  0x1c   : > { %v396_v11 = vld [vmem:[%s3972_s26 + $0xc] sm:$0x1]  ;;  %v2740_v12 = vcombine.low %v385_v7, %v3979_v8  ;;  %3258 = vmatpush3.bf16.msra.mxu0 %v3639_v6  ;;  %v2748_v23 = vcombine.low %v3982_v9, %v3982_v9  ;;  %v589_v28 = vld [vmem:[%s3972_s26] sm:$0xe]  ;;  %v2809_v60 = vcombine.low %v3979_v8, %v3982_v9  ;;  %v993_v63 = vld [vmem:[%s3972_s26 + $0x4] sm:$0xc] }
  0x1d   : > { %v3990_v13 = vcombine.low %v3982_v9, %v396_v11  ;;  %3270 = vmatpush3.bf16.msra.mxu1 %v3640_v10  ;;  %3275 = vmatprep.subr.bf16.mxu0 %v3644_v16  ;;  %v2763_v29 = vcombine.low %v589_v28, %v3979_v8  ;;  %v687_v31 = vld [vmem:[%s3972_s26] sm:$0x8]  ;;  %v688_v32 = vld [vmem:[%s3972_s26 + $0xc] sm:$0x7]  ;;  %v994_v1 = vld [vmem:[%s3972_s26 + $0x8] sm:$0xf] }
  0x1e   : > { %v418_v14 = vshrl.u32 %v2740_v12, 16  ;;  %v420_v15 = vshll.u32 %v2740_v12, 16  ;;  %3271 = vmatprep.mubr.msk.bf16.mxu1 %vm456_vm0, %v2740_v12  ;;  %3287 = vmatprep.subr.bf16.mxu1 %v3645_v20  ;;  %v2778_v34 = vcombine.low %v687_v31, %v3979_v8  ;;  %v2779_v35 = vcombine.low %v3982_v9, %v688_v32  ;;  %v4040_v47 = vld [vmem:[%s3972_s26 + $0xc] sm:$0xf]  ;;  %v996_v3 = vld [vmem:[%s3972_s26 + $0x10] sm:$0x3] }
  0x1f   : > { %v425_v17 = vshll.u32 %v3990_v13, 16  ;;  %v429_v18 = vshrl.u32 %v3990_v13, 16  ;;  %v604_v30 = vrot.slane %v3990_v13, 1  ;;  %v603_v37 = vrot.slane %v2763_v29, 1  ;;  %v995_v2 = vld [vmem:[%s3972_s26 + $0xc] sm:$0xf] }
  0x20   : > { %v422_v19 = vrot.slane %v420_v15, 1  ;;  %3272 = vmatmul.mubr.msk.bf16.vlgmr.msra.gmra.mrb[0].mxu1 %vm456_vm0, %v2748_v23  ;;  %v705_v38 = vrot.slane %v2778_v34, 3  ;;  %v706_v39 = vrot.slane %v2779_v35, 3  ;;  %v804_v41 = vshrl.u32 %v2778_v34, 16  ;;  %v1101_v6 = vld [vmem:[%s3972_s26 + $0x10] sm:$0x7] }
  0x21   : > { %v427_v21 = vrot.slane %v425_v17, 1  ;;  %3288 = vmatpush3.bf16.msra.mxu1 %v3645_v20  ;;  %v605_v40 = vsel %vm602_vm2, %v603_v37, %v604_v30  ;;  %v807_v44 = vshll.u32 %v2778_v34, 16  ;;  %v2794_v50 = vcombine.low %v3982_v9, %v4040_v47  ;;  %v3661_v8 = vld [vmem:[%s4602_s1 + $0x98] sm:$0xff]   ;;  %v3667_v20 = vld [vmem:[%s4602_s1 + $0xe0] sm:$0xff]   ;;  %v3669_v28 = vld [vmem:[%s4602_s1 + $0xe8] sm:$0xff]  }
  0x22   : > { %v423_v22 = vor.u32 %v422_v19, %v418_v14  ;;  %3289 = vmatprep.subr.bf16.mxu1 %v3647_v27  ;;  %v707_v43 = vsel %vm704_vm3, %v705_v38, %v706_v39  ;;  %v806_v48 = vrot.slane %v804_v41, 3  ;;  %v2825_v4 = vcombine.low %v993_v63, %v994_v1  ;;  %v3662_v9 = vld [vmem:[%s4602_s1 + $0xb8] sm:$0xff]   ;;  %v3664_v19 = vld [vmem:[%s4602_s1 + $0xc0] sm:$0xff]   ;;  %v3670_v31 = vld [vmem:[%s4602_s1 + $0xd0] sm:$0xff]  }
  0x23   : > { %v431_v24 = vor.u32 %v429_v18, %v427_v21  ;;  %3295 = vmatprep.mubr.msk.bf16.mxu1 %vm456_vm0, %v707_v43  ;;  %v809_v49 = vrot.slane %v807_v44, 4  ;;  %v812_v52 = vshrl.u32 %v2794_v50, 16  ;;  %v815_v53 = vshll.u32 %v2794_v50, 16  ;;  %v1213_v18 = vld [vmem:[%s3972_s26 + $0x4] sm:$0x8]  ;;  %v3671_v32 = vld [vmem:[%s4602_s1 + $0xf0] sm:$0xff]  }
  0x24   : > { %v428_v26 = vsel %vm416_vm1, %v423_v22, %v427_v21  ;;  %v2826_v5 = vcombine.low %v995_v2, %v996_v3  ;;  %v4070_v7 = vcombine.low %v995_v2, %v1101_v6  ;;  %v1116_v10 = vshrl.u32 %v2825_v4, 16  ;;  %v3672_v35 = vld [vmem:[%s4602_s1 + $0xd8] sm:$0xff]   ;;  %v3677_v37 = vld [vmem:[%s4602_s1 + $0x100] sm:$0xff]   ;;  %v3678_v38 = vld [vmem:[%s4602_s1 + $0x108] sm:$0xff]   ;;  %s377_s26 = sand.u32 1, %s3828_s18  }
  0x25   : > { %3259 = vmatprep.mubr.msk.bf16.mxu0 %vm456_vm0, %v428_v26  ;;  %3290 = vmatpush3.bf16.msra.mxu1 %v3647_v27  ;;  %v810_v56 = vor.u32 %v809_v49, %v806_v48  ;;  %v814_v57 = vrot.slane %v812_v52, 3  ;;  %v817_v58 = vrot.slane %v815_v53, 4  ;;  %v1119_v11 = vshll.u32 %v2825_v4, 16  ;;  %v3668_v27 = vld [vmem:[%s4602_s1 + $0xc8] sm:$0xff]   ;;  %v3680_v41 = vld [vmem:[%s4602_s1 + $0x118] sm:$0xff]   ;;  %v3683_v43 = vld [vmem:[%s4604_s3] sm:$0xff]  }
  0x26   : > { %3260 = vmatmul.mubr.msk.bf16.vlgmr.msra.gmra.mrb[0].mxu0 %vm456_vm0, %v431_v24  ;;  %3291 = vmatprep.subr.bf16.mxu1 %v3649_v36  ;;  %v1124_v12 = vshrl.u32 %v4070_v7, 16  ;;  %v1127_v13 = vshll.u32 %v4070_v7, 16  ;;  %v1017_v14 = vrot.slane %v2825_v4, 2  ;;  %v1018_v15 = vrot.slane %v2826_v5, 2  ;;  %v3687_v48 = vld [vmem:[%s4604_s3 + $0x10] sm:$0xff]   ;;  %v3688_v49 = vld [vmem:[%s4604_s3 + $0x58] sm:$0xff]  }
  0x27   : > { %3276 = vmatpush3.bf16.msra.mxu0 %v3644_v16  ;;  %3283 = vmatprep.mubr.msk.bf16.mxu0 %vm456_vm0, %v605_v40  ;;  %v818_v59 = vor.u32 %v817_v58, %v814_v57  ;;  %v1118_v16 = vrot.slane %v1116_v10, 2  ;;  %v1121_v17 = vrot.slane %v1119_v11, 3  ;;  %v2856_v23 = vcombine.low %v1213_v18, %v994_v1  ;;  %v3679_v40 = vld [vmem:[%s4602_s1 + $0x110] sm:$0xff]   ;;  %v3689_v50 = vld [vmem:[%s4604_s3 + $0x18] sm:$0xff]   ;;  %v3691_v52 = vld [vmem:[%s4604_s3 + $0x20] sm:$0xff]   ;;  %s378_s25 = scalar_lea.vmem [#allocation5], %s377_s26 }
  0x28   : > { %3277 = vmatprep.subr.bf16.mxu0 %v3646_v25  ;;  %v1126_v21 = vrot.slane %v1124_v12, 2  ;;  %v1129_v22 = vrot.slane %v1127_v13, 3  ;;  %v2810_v26 = vcombine.low %v4040_v47, %v4040_v47  ;;  %v3838_v44 = vmov 0.0   ;;  %v3686_v47 = vld [vmem:[%s4604_s3 + $0x50] sm:$0xff]   ;;  %v3692_v53 = vld [vmem:[%s4604_s3 + $0x68] sm:$0xff]   ;;  %v3696_v57 = vld [vmem:[%s4604_s3 + $0x78] sm:$0xff]  }
  0x29   : > { %3292 = vmatpush3.bf16.msra.mxu1 %v3649_v36  ;;  %v819_v0 = vsel %vm802_vm4, %v810_v56, %v818_v59  ;;  %v1226_v24 = vrot.slane %v2856_v23, 3  ;;  %v1122_v29 = vor.u32 %v1121_v17, %v1118_v16  ;;  %v3673_v36 = vld [vmem:[%s4602_s1 + $0xf8] sm:$0xff]   ;;  %1340 = vst [vmem:[#allocation3] sm:$0xff] %v3838_v44  ;;  %1341 = vst [vmem:[#allocation3 + $0x8] sm:$0xff] %v3838_v44  ;;  %v3695_v56 = vld [vmem:[%s4604_s3 + $0x30] sm:$0xff]   ;;  %s2672_s29 = sshll.u32 %s378_s25, 4  ;;  %s4561_s29 = int_to_ptr.vmem [resolvable:$true] %s2672_s29 }
  0x2a   : > { %3293 = vmatprep.subr.bf16.mxu1 %v3651_v45  ;;  %1342 = vst [vmem:[#allocation3 + $0x10] sm:$0xf] %v3838_v44  ;;  %v3697_v58 = vld [vmem:[%s4604_s3 + $0x38] sm:$0xff]   ;;  %s2660_s21 = scalar_lea.sflag [#allocation6], %s377_s26  ;;  %s3774_s14 = scalar_lea.vmem %s4561_s29, 16 }
  0x2b   : > { %3278 = vmatpush3.bf16.msra.mxu0 %v3646_v25  ;;  %v1227_v25 = vrot.slane %v4070_v7, 3  ;;  %p3775_p11 = scmp.ne.s32.totalorder %s4561_s29, %s3774_s14  ;;  %p3781_p0 = scmp.lt.s32.totalorder %s4561_s29, %s3779_s22 }
  0x2c   : > { %3279 = vmatprep.subr.bf16.mxu0 %v3648_v33  ;;  %p3782_p1 = scmp.lt.s32.totalorder %s3780_s24, %s3774_s14 }
  0x2d   : > { %3294 = vmatpush3.bf16.msra.mxu1 %v3651_v45  ;;  %v3684_v45 = vld [vmem:[%s4604_s3 + $0x48] sm:$0xff]   ;;  %p3776_p12 = pnand %p3775_p11, %p3939_p5 }
  0x2e   : > { %3311 = vmatprep.subr.bf16.mxu1 %v3656_v51  ;;  %p3783_p2 = por %p3782_p1, %p3781_p0 }
  0x2f   : > { %3280 = vmatpush3.bf16.msra.mxu0 %v3648_v33  ;;  %v1019_v33 = vsel %vm1016_vm5, %v1017_v14, %v1018_v15  ;;  %p3777_p13 = pneg %p3776_p12 }
  0x30   : > { %3281 = vmatprep.subr.bf16.mxu0 %v3650_v42  ;;  %3296 = vmatmul.mubr.msk.bf16.vlgmr.msra.gmra.mrb[4].mxu1 %vm456_vm0, %v706_v39  ;;  %v1228_v39 = vsel %vm704_vm3, %v1226_v24, %v1227_v25 }
  0x31   : > { %3312 = vmatpush3.bf16.msra.mxu1 %v3656_v51  ;;  %3319 = vmatprep.mubr.msk.bf16.mxu1 %vm456_vm0, %v2809_v60  ;;  %v3690_v51 = vld [vmem:[%s4604_s3 + $0x60] sm:$0xff]   ;;  %p3784_p3 = pnand %p3783_p2, %p3777_p13 }
  0x32   : > { %3313 = vmatprep.subr.bf16.mxu1 %v3658_v55 }
  0x33   : > { %3282 = vmatpush3.bf16.msra.mxu0 %v3650_v42  ;;  %v3682_v42 = vld [vmem:[%s4604_s3 + $0x40] sm:$0xff]  }
  0x34   : > { %3299 = vmatprep.subr.bf16.mxu0 %v3653_v46 }
  0x35   : > { %3314 = vmatpush3.bf16.msra.mxu1 %v3658_v55  ;;  %v3694_v55 = vld [vmem:[%s4604_s3 + $0x70] sm:$0xff]  }
  0x36   : > { %3284 = vmatmul.mubr.msk.bf16.vlgmr.msra.gmra.mrb[4].mxu0 %vm456_vm0, %v604_v30  ;;  %3315 = vmatprep.subr.bf16.mxu1 %v3660_v62  ;;  %v1130_v30 = vor.u32 %v1129_v22, %v1126_v21 }
  0x37   : > { %3300 = vmatpush3.bf16.msra.mxu0 %v3653_v46  ;;  %3307 = vmatprep.mubr.msk.bf16.mxu0 %vm456_vm0, %v819_v0  ;;  %v3685_v46 = vld [vmem:[%s4604_s3 + $0x8] sm:$0xff]  }
  0x38   : > { %3301 = vmatprep.subr.bf16.mxu0 %v3657_v54  ;;  %v1131_v34 = vsel %vm1114_vm6, %v1122_v29, %v1130_v30 }
  0x39   : > { %3316 = vmatpush3.bf16.msra.mxu1 %v3660_v62 }
  0x3a   : > { %3317 = vmatprep.subr.bf16.mxu1 %v3662_v9 }
  0x3b   : > { %3302 = vmatpush3.bf16.msra.mxu0 %v3657_v54  ;;  %v3693_v54 = vld [vmem:[%s4604_s3 + $0x28] sm:$0xff]  }
  0x3c   : > { %3303 = vmatprep.subr.bf16.mxu0 %v3659_v61 }
  0x3d   : > { %3318 = vmatpush3.bf16.msra.mxu1 %v3662_v9 }
  0x3e   : > { %3335 = vmatprep.subr.bf16.mxu1 %v3667_v20 }
  0x3f   : > { %3304 = vmatpush3.bf16.msra.mxu0 %v3659_v61 }
  0x40   : > { %3305 = vmatprep.subr.bf16.mxu0 %v3661_v8  ;;  %3320 = vmatmul.mubr.msk.bf16.vlgmr.msra.gmra.mrb[8].mxu1 %vm456_vm0, %v2810_v26 }
  0x41   : > { %3336 = vmatpush3.bf16.msra.mxu1 %v3667_v20  ;;  %3343 = vmatprep.mubr.msk.bf16.mxu1 %vm456_vm0, %v1131_v34 }
  0x42   : > { %3337 = vmatprep.subr.bf16.mxu1 %v3669_v28 }
  0x43   : > { %3306 = vmatpush3.bf16.msra.mxu0 %v3661_v8 }
  0x44   : > { %3323 = vmatprep.subr.bf16.mxu0 %v3664_v19 }
  0x45   : > { %3338 = vmatpush3.bf16.msra.mxu1 %v3669_v28 }
  0x46   : > { %3308 = vmatmul.mubr.msk.bf16.vlgmr.msra.gmra.mrb[8].mxu0 %vm456_vm0, %v818_v59  ;;  %3339 = vmatprep.subr.bf16.mxu1 %v3671_v32 }
  0x47   : > { %3324 = vmatpush3.bf16.msra.mxu0 %v3664_v19  ;;  %3331 = vmatprep.mubr.msk.bf16.mxu0 %vm456_vm0, %v1019_v33 }
  0x48   : > { %3325 = vmatprep.subr.bf16.mxu0 %v3668_v27 }
  0x49   : > { %3340 = vmatpush3.bf16.msra.mxu1 %v3671_v32 }
  0x4a   : > { %3341 = vmatprep.subr.bf16.mxu1 %v3673_v36 }
  0x4b   : > { %3326 = vmatpush3.bf16.msra.mxu0 %v3668_v27 }
  0x4c   : > { %3327 = vmatprep.subr.bf16.mxu0 %v3670_v31 }
  0x4d   : > { %3342 = vmatpush3.bf16.msra.mxu1 %v3673_v36 }
  0x4e   : > { %3359 = vmatprep.subr.bf16.mxu1 %v3838_v44 }
  0x4f   : > { %3328 = vmatpush3.bf16.msra.mxu0 %v3670_v31 }
  0x50   : > { %3329 = vmatprep.subr.bf16.mxu0 %v3672_v35  ;;  %3344 = vmatmul.mubr.msk.bf16.vlgmr.msra.gmra.mrb[12].mxu1 %vm456_vm0, %v1130_v30 }
  0x51   : > { %3360 = vmatpush3.bf16.msra.mxu1 %v3682_v42  ;;  %3375 = vmatprep.mubr.msk.bf16.mxu1 %vm3839_vm7, %v3838_v44 }
  0x52   : > { %3361 = vmatprep.subr.bf16.mxu1 %v3838_v44 }
  0x53   : > { %3330 = vmatpush3.bf16.msra.mxu0 %v3672_v35 }
  0x54   : > { %3347 = vmatprep.subr.bf16.mxu0 %v3677_v37 }
  0x55   : > { %3362 = vmatpush3.bf16.msra.mxu1 %v3684_v45 }
  0x56   : > { %3332 = vmatmul.mubr.msk.bf16.vlgmr.msra.gmra.mrb[12].mxu0 %vm456_vm0, %v1018_v15  ;;  %3363 = vmatprep.subr.bf16.mxu1 %v3838_v44 }
  0x57   : > { %3348 = vmatpush3.bf16.msra.mxu0 %v3677_v37  ;;  %3355 = vmatprep.mubr.msk.bf16.mxu0 %vm456_vm0, %v1228_v39 }
  0x58   : > { %3349 = vmatprep.subr.bf16.mxu0 %v3678_v38 }
  0x59   : > { %3364 = vmatpush3.bf16.msra.mxu1 %v3686_v47 }
  0x5a   : > { %3365 = vmatprep.subr.bf16.mxu1 %v3838_v44 }
  0x5b   : > { %3350 = vmatpush3.bf16.msra.mxu0 %v3678_v38 }
  0x5c   : > { %3351 = vmatprep.subr.bf16.mxu0 %v3679_v40 }
  0x5d   : > { %3366 = vmatpush3.bf16.msra.mxu1 %v3688_v49 }
  0x5e   : > { %3367 = vmatprep.subr.bf16.mxu1 %v3838_v44 }
  0x5f   : > { %3352 = vmatpush3.bf16.msra.mxu0 %v3679_v40 }
  0x60   : > { %3353 = vmatprep.subr.bf16.mxu0 %v3680_v41 }
  0x61   : > { %3368 = vmatpush3.bf16.msra.mxu1 %v3690_v51 }
  0x62   : > { %3369 = vmatprep.subr.bf16.mxu1 %v3838_v44 }
  0x63   : > { %3354 = vmatpush3.bf16.msra.mxu0 %v3680_v41 }
  0x64   : > { %3379 = vmatprep.subr.bf16.mxu0 %v3838_v44 }
  0x65   : > { %3370 = vmatpush3.bf16.msra.mxu1 %v3692_v53 }
  0x66   : > { %3356 = vmatmul.mubr.msk.bf16.vlgmr.msra.gmra.mrb[16].mxu0 %vm456_vm0, %v1227_v25  ;;  %3371 = vmatprep.subr.bf16.mxu1 %v3838_v44 }
  0x67   : > { %3380 = vmatpush3.bf16.msra.mxu0 %v3683_v43  ;;  %3395 = vmatprep.mubr.msk.bf16.mxu0 %vm3839_vm7, %v3838_v44 }
  0x68   : > { %3381 = vmatprep.subr.bf16.mxu0 %v3838_v44 }
  0x69   : > { %3372 = vmatpush3.bf16.msra.mxu1 %v3694_v55 }
  0x6a   : > { %3373 = vmatprep.subr.bf16.mxu1 %v3838_v44 }
  0x6b   : > { %3382 = vmatpush3.bf16.msra.mxu0 %v3685_v46 }
  0x6c   : > { %3383 = vmatprep.subr.bf16.mxu0 %v3838_v44 }
  0x6d   : > { %3374 = vmatpush3.bf16.msra.mxu1 %v3696_v57  ;;  %v2864_v57 = vld [vmem:[%s4603_s2 + $0x1] ss:$0 sm:$0xff] }
  0x6e   : > { %3399 = vmatprep.subr.bf16.mxu1 %v3838_v44 }
  0x6f   : > { %3384 = vmatpush3.bf16.msra.mxu0 %v3687_v48 }
  0x70   : > { %3385 = vmatprep.subr.bf16.mxu0 %v3838_v44 }
  0x73   : > { %3386 = vmatpush3.bf16.msra.mxu0 %v3689_v50  ;;  %v2863_v50 = vld [vmem:[%s4603_s2] ss:$0 sm:$0xff] }
  0x74   : > { %3387 = vmatprep.subr.bf16.mxu0 %v3838_v44 }
  0x77   : > { %3388 = vmatpush3.bf16.msra.mxu0 %v3691_v52 }
  0x78   : > { %3389 = vmatprep.subr.bf16.mxu0 %v3838_v44 }
  0x7b   : > { %3390 = vmatpush3.bf16.msra.mxu0 %v3693_v54 }
  0x7c   : > { %3391 = vmatprep.subr.bf16.mxu0 %v3838_v44 }
  0x7f   : > { %3392 = vmatpush3.bf16.msra.mxu0 %v3695_v56 }
  0x80   : > { %3393 = vmatprep.subr.bf16.mxu0 %v3838_v44 }
  0x83   : > { %3394 = vmatpush3.bf16.msra.mxu0 %v3697_v58 }
  0x84   : > { %3419 = vmatprep.subr.bf16.mxu0 %v3838_v44 }
  0xf3   : > { %v3273_v60 = vpop.f32.mrb[0].mxu1 }
  0xf4   : > { %v575_v63 = vpop.f32.mrb[1].mxu1 }
  0xf5   : > { %v3274_v2 = vpop.f32.mrb[2].mxu1 }
  0xf6   : > { %v578_v4 = vpop.f32.mrb[3].mxu1 }
  0xf9   : > { %v3261_v59 = vpop.f32.mrb[0].mxu0 }
  0xfa   : > { %v584_v61 = vadd.f32 %v3273_v60, %v3261_v59  ;;  %v497_v62 = vpop.f32.mrb[1].mxu0 }
  0xfb   : > { %v576_v0 = vadd.f32 %v575_v63, %v497_v62  ;;  %v3262_v1 = vpop.f32.mrb[2].mxu0 }
  0xfc   : > { %v500_v3 = vpop.f32.mrb[3].mxu0 }
  0xfd   : > { %v579_v5 = vadd.f32 %v578_v4, %v500_v3 }
 0x103   : > { %v3297_v7 = vpop.f32.mrb[4].mxu1 }
 0x104   : > { %v772_v10 = vpop.f32.mrb[5].mxu1 }
 0x105   : > { %v3298_v13 = vpop.f32.mrb[6].mxu1 }
 0x106   : > { %v775_v16 = vpop.f32.mrb[7].mxu1 }
 0x109   : > { %v3285_v6 = vpop.f32.mrb[4].mxu0 }
 0x10a   : > { %v686_v8 = vadd.f32 %v3285_v6, %v584_v61  ;;  %v670_v9 = vpop.f32.mrb[5].mxu0  ;;  %v2865_v61 = vld [vmem:[%s4603_s2 + $0x2] ss:$0 sm:$0xff] }
 0x10b   : > { %v684_v11 = vadd.f32 %v670_v9, %v576_v0  ;;  %v3286_v12 = vpop.f32.mrb[6].mxu0 }
 0x10c   : > { %v788_v14 = vadd.f32 %v3297_v7, %v686_v8  ;;  %v673_v15 = vpop.f32.mrb[7].mxu0 }
 0x10d   : > { %v685_v17 = vadd.f32 %v673_v15, %v579_v5  ;;  %v786_v18 = vadd.f32 %v772_v10, %v684_v11 }
 0x10f   : > { %v787_v19 = vadd.f32 %v775_v16, %v685_v17 }
 0x113   : > { %v3321_v21 = vpop.f32.mrb[8].mxu1 }
 0x114   : > { %v976_v24 = vpop.f32.mrb[9].mxu1 }
 0x115   : > { %v3322_v27 = vpop.f32.mrb[10].mxu1 }
 0x116   : > { %v979_v30 = vpop.f32.mrb[11].mxu1  ;;  %v3700_v27 = vld [vmem:[%s4604_s3 + $0x88] sm:$0xff]  }
 0x119   : > { %v3309_v20 = vpop.f32.mrb[8].mxu0 }
 0x11a   : > { %v900_v22 = vadd.f32 %v3309_v20, %v788_v14  ;;  %v884_v23 = vpop.f32.mrb[9].mxu0 }
 0x11b   : > { %v898_v25 = vadd.f32 %v884_v23, %v786_v18  ;;  %v3310_v26 = vpop.f32.mrb[10].mxu0 }
 0x11c   : > { %v992_v28 = vadd.f32 %v3321_v21, %v900_v22  ;;  %v887_v29 = vpop.f32.mrb[11].mxu0  ;;  %v3698_v21 = vld [vmem:[%s4604_s3 + $0x80] sm:$0xff]  }
 0x11d   : > { %v899_v31 = vadd.f32 %v887_v29, %v787_v19  ;;  %v990_v32 = vadd.f32 %v976_v24, %v898_v25  ;;  %v3699_v24 = vld [vmem:[%s4604_s3 + $0xc0] sm:$0xff]   ;;  %v3702_v29 = vld [vmem:[%s4604_s3 + $0x90] sm:$0xff]  }
 0x11f   : > { %v991_v33 = vadd.f32 %v979_v30, %v899_v31  ;;  %v3703_v30 = vld [vmem:[%s4604_s3 + $0xd0] sm:$0xff]   ;;  %v3704_v31 = vld [vmem:[%s4604_s3 + $0x98] sm:$0xff]  }
 0x123   : > { %v3345_v35 = vpop.f32.mrb[12].mxu1 }
 0x124   : > { %v1196_v38 = vpop.f32.mrb[13].mxu1 }
 0x125   : > { %v3346_v41 = vpop.f32.mrb[14].mxu1 }
 0x126   : > { %v1199_v45 = vpop.f32.mrb[15].mxu1 }
 0x129   : > { %v3333_v34 = vpop.f32.mrb[12].mxu0 }
 0x12a   : > { %v1100_v36 = vadd.f32 %v3333_v34, %v992_v28  ;;  %v1084_v37 = vpop.f32.mrb[13].mxu0  ;;  %v3701_v28 = vld [vmem:[%s4604_s3 + $0xc8] sm:$0xff]   ;;  %v3707_v34 = vld [vmem:[%s4604_s3 + $0xe0] sm:$0xff]  }
 0x12b   : > { %v1098_v39 = vadd.f32 %v1084_v37, %v990_v32  ;;  %v3334_v40 = vpop.f32.mrb[14].mxu0  ;;  %v3705_v32 = vld [vmem:[%s4604_s3 + $0xd8] sm:$0xff]   ;;  %v3710_v37 = vld [vmem:[%s4604_s3 + $0xb0] sm:$0xff]  }
 0x12c   : > { %v1212_v42 = vadd.f32 %v3345_v35, %v1100_v36  ;;  %v1087_v43 = vpop.f32.mrb[15].mxu0  ;;  %v3708_v35 = vld [vmem:[%s4604_s3 + $0xa8] sm:$0xff]   ;;  %v3713_v40 = vld [vmem:[%s4604_s3 + $0xf8] sm:$0xff]  }
 0x12d   : > { %v1099_v46 = vadd.f32 %v1087_v43, %v991_v33  ;;  %v1210_v47 = vadd.f32 %v1196_v38, %v1098_v39  ;;  %v3706_v33 = vld [vmem:[%s4604_s3 + $0xa0] sm:$0xff]   ;;  %v3709_v36 = vld [vmem:[%s4604_s3 + $0xe8] sm:$0xff]   ;;  %v3711_v38 = vld [vmem:[%s4604_s3 + $0xf0] sm:$0xff]  }
 0x12e   : > { %v3712_v39 = vld [vmem:[%s4604_s3 + $0xb8] sm:$0xff]   ;;  %v3714_v43 = vld [vmem:[%s4604_s3 + $0x100] sm:$0xff]  }
 0x12f   : > { %v1211_v48 = vadd.f32 %v1199_v45, %v1099_v46  ;;  %v3715_v45 = vld [vmem:[%s4604_s3 + $0x140] sm:$0xff]  }
 0x139   : > { %v3357_v49 = vpop.f32.mrb[16].mxu0 }
 0x13a   : > { %v1309_v51 = vadd.f32 %v3357_v49, %v1212_v42  ;;  %v1293_v52 = vpop.f32.mrb[17].mxu0  ;;  %v3717_v49 = vld [vmem:[%s4604_s3 + $0x148] sm:$0xff]  }
 0x13b   : > { %v1307_v53 = vadd.f32 %v1293_v52, %v1210_v47  ;;  %v3358_v54 = vpop.f32.mrb[18].mxu0  ;;  %v3720_v52 = vld [vmem:[%s4604_s3 + $0x118] sm:$0xff]  }
 0x13c   : > { %v1319_v55 = vadd.f32 %v2863_v50, %v1309_v51  ;;  %v1296_v56 = vpop.f32.mrb[19].mxu0  ;;  %v3719_v51 = vld [vmem:[%s4604_s3 + $0x150] sm:$0xff]   ;;  %v3722_v54 = vld [vmem:[%s4604_s3 + $0x120] sm:$0xff]  }
 0x13d   : > { %v1317_v58 = vadd.f32 %v2863_v50, %v1307_v53  ;;  %v1308_v59 = vadd.f32 %v1296_v56, %v1211_v48  ;;  %v3716_v48 = vld [vmem:[%s4604_s3 + $0x108] sm:$0xff]   ;;  %v3721_v53 = vld [vmem:[%s4604_s3 + $0x158] sm:$0xff]  }
 0x13e   : > { %v1322_v60 = vmax.f32 %v1319_v55, 0.0  ;;  %v3723_v55 = vld [vmem:[%s4604_s3 + $0x160] sm:$0xff]   ;;  %v3724_v56 = vld [vmem:[%s4604_s3 + $0x128] sm:$0xff]  }
 0x13f   : > { %v1320_v62 = vmax.f32 %v1317_v58, 0.0  ;;  %v1318_v63 = vadd.f32 %v2863_v50, %v1308_v59  ;;  %v3718_v50 = vld [vmem:[%s4604_s3 + $0x110] sm:$0xff]  }
 0x140   : > { %v1329_v0 = vmul.f32 %v2864_v57, %v1322_v60  ;;  %v3726_v58 = vld [vmem:[%s4604_s3 + $0x130] sm:$0xff]   ;;  %v3728_v60 = vld [vmem:[%s4604_s3 + $0x138] sm:$0xff]  }
 0x141   : > { %v1327_v1 = vmul.f32 %v2864_v57, %v1320_v62  ;;  %v1321_v2 = vmax.f32 %v1318_v63, 0.0  ;;  %v3727_v59 = vld [vmem:[%s4604_s3 + $0x170] sm:$0xff]  }
 0x142   : > { %v1336_v3 = vadd.f32 %v2865_v61, %v1329_v0  ;;  %v3730_v0 = vld [vmem:[%s4604_s3 + $0x180] sm:$0xff]  }
 0x143   : > { %v1334_v4 = vadd.f32 %v2865_v61, %v1327_v1  ;;  %v1328_v5 = vmul.f32 %v2864_v57, %v1321_v2  ;;  %v3725_v57 = vld [vmem:[%s4604_s3 + $0x168] sm:$0xff]   ;;  %v3731_v1 = vld [vmem:[%s4604_s3 + $0x1c0] sm:$0xff]  }
 0x144   : > { %1339 = vst [vmem:[#allocation2 + $0x10] sm:$0xff] %v1336_v3 }
 0x145   : > { %1337 = vst [vmem:[#allocation2] sm:$0xff] %v1334_v4  ;;  %v1335_v6 = vadd.f32 %v2865_v61, %v1328_v5  ;;  %v3729_v61 = vld [vmem:[%s4604_s3 + $0x178] sm:$0xff]   ;;  %v3732_v4 = vld [vmem:[%s4604_s3 + $0x188] sm:$0xff]  }
 0x146   : > { %v3733_v5 = vld [vmem:[%s4604_s3 + $0x1c8] sm:$0xff]  }
 0x147   : > { %1338 = vst [vmem:[#allocation2 + $0x8] sm:$0xff] %v1335_v6  ;;  %v3734_v6 = vld [vmem:[%s4604_s3 + $0x190] sm:$0xff]  }
 0x14b   : > { %v1359_v9 = vld [vmem:[#allocation2 + $0x12] ss:$2 sm:$0x3]  ;;  %v1361_v10 = vld [vmem:[#allocation2 + $0x13] ss:$2 sm:$0x3] }
 0x14c   : > { %v1343_v7 = vld [vmem:[#allocation2] ss:$2 sm:$0x3]  ;;  %v1345_v8 = vld [vmem:[#allocation2 + $0x1] ss:$2 sm:$0x3]  ;;  %v1363_v17 = vmax.f32 %v1359_v9, %v1361_v10 }
 0x14d   : > { %v1350_v13 = vmax.f32 %v1343_v7, %v1345_v8  ;;  %v3735_v7 = vld [vmem:[%s4604_s3 + $0x1d0] sm:$0xff]   ;;  %v3736_v8 = vld [vmem:[%s4604_s3 + $0x198] sm:$0xff]   ;;  %v3738_v10 = vld [vmem:[%s4604_s3 + $0x1a0] sm:$0xff]  }
 0x14e   : > { %v1347_v11 = vld [vmem:[#allocation2 + $0x6] ss:$2 sm:$0x3]  ;;  %v1349_v12 = vld [vmem:[#allocation2 + $0x7] ss:$2 sm:$0x3] }
 0x14f   : > { %v1351_v14 = vmax.f32 %v1347_v11, %v1349_v12  ;;  %v1355_v15 = vld [vmem:[#allocation2 + $0xc] ss:$2 sm:$0x3]  ;;  %v1357_v16 = vld [vmem:[#allocation2 + $0xd] ss:$2 sm:$0x3] }
 0x150   : > { %v1362_v18 = vmax.f32 %v1355_v15, %v1357_v16  ;;  %v3737_v9 = vld [vmem:[%s4604_s3 + $0x1d8] sm:$0xff]   ;;  %v3739_v11 = vld [vmem:[%s4604_s3 + $0x1e0] sm:$0xff]   ;;  %v3740_v12 = vld [vmem:[%s4604_s3 + $0x1a8] sm:$0xff]  }
 0x151   : > { %v1352_v19 = vmax.f32 %v1350_v13, %v1351_v14  ;;  %v3741_v13 = vld [vmem:[%s4604_s3 + $0x1e8] sm:$0xff]   ;;  %v3742_v14 = vld [vmem:[%s4604_s3 + $0x1b0] sm:$0xff]   ;;  %v3744_v16 = vld [vmem:[%s4604_s3 + $0x1b8] sm:$0xff]  }
 0x152   : > { %v1364_v20 = vmax.f32 %v1362_v18, %v1363_v17  ;;  %v3743_v15 = vld [vmem:[%s4604_s3 + $0x1f0] sm:$0xff]   ;;  %v3745_v17 = vld [vmem:[%s4604_s3 + $0x1f8] sm:$0xff]  }
 0x153   : > { %1353 = vst [vmem:[#allocation3 + $0x5] sm:$0x3] %v1352_v19 }
 0x154   : > { %1365 = vst [vmem:[#allocation3 + $0x9] sm:$0x3] %v1364_v20  ;;  %v3746_v20 = vld [vmem:[%s4604_s3 + $0x200] sm:$0xff]  }
 0x15a   : > { %v1384_v22 = vld [vmem:[#allocation3 + $0x1] sm:$0xff] }
 0x15b   : > { %v1366_v23 = vld [vmem:[#allocation3] sm:$0xff]  ;;  %v1385_v25 = vpack.c.bf16 %v1384_v22, %v1384_v22  ;;  %v2011_v18 = vld [vmem:[#allocation3 + $0x8] sm:$0xff] }
 0x15c   : > { %v1367_v26 = vpack.c.bf16 %v1366_v23, %v1366_v23  ;;  %v1579_v41 = vld [vmem:[#allocation3 + $0x2] sm:$0xff]  ;;  %v3747_v23 = vld [vmem:[%s4604_s3 + $0x208] sm:$0xff]  }
 0x15d   : > { %3376 = vmatmul.mubr.bf16.vlgmr.msra.gmra.mrb[16].mxu1 %v1385_v25  ;;  %v1687_v42 = vld [vmem:[#allocation3 + $0x4] sm:$0xff]  ;;  %v1580_v46 = vpack.c.bf16 %v1579_v41, %v1579_v41  ;;  %v3756_v41 = vld [vmem:[%s4606_s5 + $0x10] sm:$0xff]  }
 0x15e   : > { %3396 = vmatmul.mubr.bf16.vlgmr.msra.gmra.mrb[20].mxu0 %v1367_v26  ;;  %3400 = vmatpush3.bf16.msra.mxu1 %v3698_v21  ;;  %v1688_v47 = vpack.c.bf16 %v1687_v42, %v1687_v42  ;;  %v1795_v62 = vld [vmem:[#allocation3 + $0x5] sm:$0xff]  ;;  %v2012_v21 = vpack.c.bf16 %v2011_v18, %v2011_v18 }
 0x15f   : > { %3420 = vmatpush3.bf16.msra.mxu0 %v3699_v24  ;;  %3401 = vmatprep.subr.bf16.mxu1 %v3838_v44  ;;  %v1903_v63 = vld [vmem:[#allocation3 + $0x6] sm:$0xff]  ;;  %v1796_v2 = vpack.c.bf16 %v1795_v62, %v1795_v62  ;;  %v3748_v24 = vld [vmem:[%s4604_s3 + $0x210] sm:$0xff]  }
 0x160   : > { %3421 = vmatprep.subr.bf16.mxu0 %v3838_v44  ;;  %3415 = vmatprep.mubr.msk.bf16.mxu1 %vm3839_vm7, %v3838_v44  ;;  %v1904_v3 = vpack.c.bf16 %v1903_v63, %v1903_v63  ;;  %v2119_v19 = vld [vmem:[#allocation3 + $0x9] sm:$0xff]  ;;  %v3749_v25 = vld [vmem:[%s4604_s3 + $0x218] sm:$0xff]  }
 0x161   : > { %3435 = vmatprep.mubr.msk.bf16.mxu0 %vm3839_vm7, %v3838_v44  ;;  %v2120_v22 = vpack.c.bf16 %v2119_v19, %v2119_v19  ;;  %v3750_v26 = vld [vmem:[%s4604_s3 + $0x220] sm:$0xff]   ;;  %v3765_v63 = vld [vmem:[%s4608_s7 + $0x18] sm:$0xff]  }
 0x162   : > { %3402 = vmatpush3.bf16.msra.mxu1 %v3700_v27  ;;  %v3751_v27 = vld [vmem:[%s4604_s3 + $0x228] sm:$0xff]  }
 0x163   : > { %3422 = vmatpush3.bf16.msra.mxu0 %v3701_v28  ;;  %3403 = vmatprep.subr.bf16.mxu1 %v3838_v44  ;;  %v3752_v28 = vld [vmem:[%s4604_s3 + $0x230] sm:$0xff]  }
 0x164   : > { %3423 = vmatprep.subr.bf16.mxu0 %v3838_v44 }
 0x166   : > { %3404 = vmatpush3.bf16.msra.mxu1 %v3702_v29  ;;  %v3753_v29 = vld [vmem:[%s4604_s3 + $0x238] sm:$0xff]  }
 0x167   : > { %3424 = vmatpush3.bf16.msra.mxu0 %v3703_v30  ;;  %3405 = vmatprep.subr.bf16.mxu1 %v3838_v44  ;;  %v2227_v30 = vld [vmem:[#allocation3 + $0xa] sm:$0xff] }
 0x168   : > { %3425 = vmatprep.subr.bf16.mxu0 %v3838_v44 }
 0x16a   : > { %3406 = vmatpush3.bf16.msra.mxu1 %v3704_v31  ;;  %v2228_v31 = vpack.c.bf16 %v2227_v30, %v2227_v30 }
 0x16b   : > { %3426 = vmatpush3.bf16.msra.mxu0 %v3705_v32  ;;  %3407 = vmatprep.subr.bf16.mxu1 %v3838_v44  ;;  %v3754_v32 = vld [vmem:[%s4606_s5] sm:$0xff]  }
 0x16c   : > { %3427 = vmatprep.subr.bf16.mxu0 %v3838_v44 }
 0x16e   : > { %3408 = vmatpush3.bf16.msra.mxu1 %v3706_v33  ;;  %v3755_v33 = vld [vmem:[%s4606_s5 + $0x8] sm:$0xff]  }
 0x16f   : > { %3428 = vmatpush3.bf16.msra.mxu0 %v3707_v34  ;;  %3409 = vmatprep.subr.bf16.mxu1 %v3838_v44 }
 0x170   : > { %3429 = vmatprep.subr.bf16.mxu0 %v3838_v44 }
 0x172   : > { %3410 = vmatpush3.bf16.msra.mxu1 %v3708_v35 }
 0x173   : > { %3430 = vmatpush3.bf16.msra.mxu0 %v3709_v36  ;;  %3411 = vmatprep.subr.bf16.mxu1 %v3838_v44 }
 0x174   : > { %3431 = vmatprep.subr.bf16.mxu0 %v3838_v44 }
 0x176   : > { %3412 = vmatpush3.bf16.msra.mxu1 %v3710_v37 }
 0x177   : > { %3432 = vmatpush3.bf16.msra.mxu0 %v3711_v38  ;;  %3413 = vmatprep.subr.bf16.mxu1 %v3838_v44 }
 0x178   : > { %3433 = vmatprep.subr.bf16.mxu0 %v3838_v44 }
 0x17a   : > { %3414 = vmatpush3.bf16.msra.mxu1 %v3712_v39 }
 0x17b   : > { %3434 = vmatpush3.bf16.msra.mxu0 %v3713_v40  ;;  %3439 = vmatprep.subr.bf16.mxu1 %v3838_v44 }
 0x17c   : > { %3459 = vmatprep.subr.bf16.mxu0 %v3838_v44 }
 0x17d   : > { %3416 = vmatmul.mubr.bf16.vlgmr.msra.gmra.mrb[20].mxu1 %v1580_v46  ;;  %v3758_v46 = vld [vmem:[%s4606_s5 + $0x20] sm:$0xff]  }
 0x17e   : > { %3436 = vmatmul.mubr.bf16.vlgmr.msra.gmra.mrb[24].mxu0 %v1688_v47  ;;  %3440 = vmatpush3.bf16.msra.mxu1 %v3714_v43  ;;  %v3759_v47 = vld [vmem:[%s4606_s5 + $0x28] sm:$0xff]  }
 0x17f   : > { %3460 = vmatpush3.bf16.msra.mxu0 %v3715_v45  ;;  %3441 = vmatprep.subr.bf16.mxu1 %v3838_v44  ;;  %v3757_v45 = vld [vmem:[%s4606_s5 + $0x18] sm:$0xff]  }
 0x180   : > { %3461 = vmatprep.subr.bf16.mxu0 %v3838_v44  ;;  %3455 = vmatprep.mubr.msk.bf16.mxu1 %vm3839_vm7, %v3838_v44 }
 0x181   : > { %3475 = vmatprep.mubr.msk.bf16.mxu0 %vm3839_vm7, %v3838_v44 }
 0x182   : > { %3442 = vmatpush3.bf16.msra.mxu1 %v3716_v48  ;;  %v3760_v48 = vld [vmem:[%s4606_s5 + $0x30] sm:$0xff]  }
 0x183   : > { %3462 = vmatpush3.bf16.msra.mxu0 %v3717_v49  ;;  %3443 = vmatprep.subr.bf16.mxu1 %v3838_v44  ;;  %v3761_v49 = vld [vmem:[%s4606_s5 + $0x38] sm:$0xff]  }
 0x184   : > { %3463 = vmatprep.subr.bf16.mxu0 %v3838_v44 }
 0x186   : > { %3444 = vmatpush3.bf16.msra.mxu1 %v3718_v50  ;;  %v3762_v50 = vld [vmem:[%s4608_s7] sm:$0xff]  }
 0x187   : > { %3464 = vmatpush3.bf16.msra.mxu0 %v3719_v51  ;;  %3445 = vmatprep.subr.bf16.mxu1 %v3838_v44  ;;  %v3763_v51 = vld [vmem:[%s4608_s7 + $0x8] sm:$0xff]  }
 0x188   : > { %3465 = vmatprep.subr.bf16.mxu0 %v3838_v44 }
 0x18a   : > { %3446 = vmatpush3.bf16.msra.mxu1 %v3720_v52 }
 0x18b   : > { %3466 = vmatpush3.bf16.msra.mxu0 %v3721_v53  ;;  %3447 = vmatprep.subr.bf16.mxu1 %v3838_v44 }
 0x18c   : > { %3467 = vmatprep.subr.bf16.mxu0 %v3838_v44 }
 0x18e   : > { %3448 = vmatpush3.bf16.msra.mxu1 %v3722_v54  ;;  %v3764_v54 = vld [vmem:[%s4608_s7 + $0x10] sm:$0xff]  }
 0x18f   : > { %3468 = vmatpush3.bf16.msra.mxu0 %v3723_v55  ;;  %3449 = vmatprep.subr.bf16.mxu1 %v3838_v44 }
 0x190   : > { %3469 = vmatprep.subr.bf16.mxu0 %v3838_v44 }
 0x192   : > { %3450 = vmatpush3.bf16.msra.mxu1 %v3724_v56 }
 0x193   : > { %3470 = vmatpush3.bf16.msra.mxu0 %v3725_v57  ;;  %3451 = vmatprep.subr.bf16.mxu1 %v3838_v44 }
 0x194   : > { %3471 = vmatprep.subr.bf16.mxu0 %v3838_v44 }
 0x196   : > { %3452 = vmatpush3.bf16.msra.mxu1 %v3726_v58 }
 0x197   : > { %3472 = vmatpush3.bf16.msra.mxu0 %v3727_v59  ;;  %3453 = vmatprep.subr.bf16.mxu1 %v3838_v44 }
 0x198   : > { %3473 = vmatprep.subr.bf16.mxu0 %v3838_v44 }
 0x19a   : > { %3454 = vmatpush3.bf16.msra.mxu1 %v3728_v60 }
 0x19b   : > { %3474 = vmatpush3.bf16.msra.mxu0 %v3729_v61  ;;  %3479 = vmatprep.subr.bf16.mxu1 %v3838_v44 }
 0x19c   : > { %3499 = vmatprep.subr.bf16.mxu0 %v3838_v44 }
 0x19d   : > { %3456 = vmatmul.mubr.bf16.vlgmr.msra.gmra.mrb[24].mxu1 %v1796_v2 }
 0x19e   : > { %3476 = vmatmul.mubr.bf16.vlgmr.msra.gmra.mrb[28].mxu0 %v1904_v3  ;;  %3480 = vmatpush3.bf16.msra.mxu1 %v3730_v0  ;;  %v3766_v0 = vld [vmem:[%s4608_s7 + $0x20] sm:$0xff]  }
 0x19f   : > { %3500 = vmatpush3.bf16.msra.mxu0 %v3731_v1  ;;  %3481 = vmatprep.subr.bf16.mxu1 %v3838_v44  ;;  %v3767_v1 = vld [vmem:[%s4608_s7 + $0x28] sm:$0xff]  }
 0x1a0   : > { %3501 = vmatprep.subr.bf16.mxu0 %v3838_v44  ;;  %3495 = vmatprep.mubr.msk.bf16.mxu1 %vm3839_vm7, %v3838_v44 }
 0x1a1   : > { %3515 = vmatprep.mubr.msk.bf16.mxu0 %vm3839_vm7, %v3838_v44 }
 0x1a2   : > { %3482 = vmatpush3.bf16.msra.mxu1 %v3732_v4 }
 0x1a3   : > { %3502 = vmatpush3.bf16.msra.mxu0 %v3733_v5  ;;  %3483 = vmatprep.subr.bf16.mxu1 %v3838_v44 }
 0x1a4   : > { %3503 = vmatprep.subr.bf16.mxu0 %v3838_v44 }
 0x1a6   : > { %3484 = vmatpush3.bf16.msra.mxu1 %v3734_v6 }
 0x1a7   : > { %3504 = vmatpush3.bf16.msra.mxu0 %v3735_v7  ;;  %3485 = vmatprep.subr.bf16.mxu1 %v3838_v44 }
 0x1a8   : > { %3505 = vmatprep.subr.bf16.mxu0 %v3838_v44 }
 0x1aa   : > { %3486 = vmatpush3.bf16.msra.mxu1 %v3736_v8 }
 0x1ab   : > { %3506 = vmatpush3.bf16.msra.mxu0 %v3737_v9  ;;  %3487 = vmatprep.subr.bf16.mxu1 %v3838_v44 }
 0x1ac   : > { %3507 = vmatprep.subr.bf16.mxu0 %v3838_v44 }
 0x1ae   : > { %3488 = vmatpush3.bf16.msra.mxu1 %v3738_v10 }
 0x1af   : > { %3508 = vmatpush3.bf16.msra.mxu0 %v3739_v11  ;;  %3489 = vmatprep.subr.bf16.mxu1 %v3838_v44 }
 0x1b0   : > { %3509 = vmatprep.subr.bf16.mxu0 %v3838_v44 }
 0x1b2   : > { %3490 = vmatpush3.bf16.msra.mxu1 %v3740_v12 }
 0x1b3   : > { %3510 = vmatpush3.bf16.msra.mxu0 %v3741_v13  ;;  %3491 = vmatprep.subr.bf16.mxu1 %v3838_v44 }
 0x1b4   : > { %3511 = vmatprep.subr.bf16.mxu0 %v3838_v44 }
 0x1b6   : > { %3492 = vmatpush3.bf16.msra.mxu1 %v3742_v14 }
 0x1b7   : > { %3512 = vmatpush3.bf16.msra.mxu0 %v3743_v15  ;;  %3493 = vmatprep.subr.bf16.mxu1 %v3838_v44 }
 0x1b8   : > { %3513 = vmatprep.subr.bf16.mxu0 %v3838_v44 }
 0x1ba   : > { %3494 = vmatpush3.bf16.msra.mxu1 %v3744_v16 }
 0x1bb   : > { %3514 = vmatpush3.bf16.msra.mxu0 %v3745_v17  ;;  %3519 = vmatprep.subr.bf16.mxu1 %v3838_v44 }
 0x1bc   : > { %3539 = vmatprep.subr.bf16.mxu0 %v3838_v44 }
 0x1bd   : > { %3496 = vmatmul.mubr.bf16.vlgmr.msra.gmra.mrb[28].mxu1 %v2012_v21 }
 0x1be   : > { %3516 = vmatmul.mubr.bf16.vlgmr.msra.gmra.mrb[32].mxu0 %v2120_v22  ;;  %3520 = vmatpush3.bf16.msra.mxu1 %v3746_v20 }
 0x1bf   : > { %3535 = vmatprep.mubr.msk.bf16.mxu1 %vm3839_vm7, %v3838_v44  ;;  %3521 = vmatprep.subr.bf16.mxu1 %v3838_v44 }
 0x1c0   : > { %3555 = vmatprep.mubr.msk.bf16.mxu0 %vm3839_vm7, %v3838_v44  ;;  %3540 = vmatpush3.bf16.msra.mxu0 %v3754_v32 }
 0x1c1   : > { %3541 = vmatprep.subr.bf16.mxu0 %v3838_v44 }
 0x1c2   : > { %3522 = vmatpush3.bf16.msra.mxu1 %v3747_v23  ;;  %v3066_v23 = vld [vmem:[%s4605_s4] ss:$0 sm:$0xff] }
 0x1c3   : > { %3523 = vmatprep.subr.bf16.mxu1 %v3838_v44 }
 0x1c4   : > { %3542 = vmatpush3.bf16.msra.mxu0 %v3755_v33 }
 0x1c5   : > { %3543 = vmatprep.subr.bf16.mxu0 %v3838_v44 }
 0x1c6   : > { %3524 = vmatpush3.bf16.msra.mxu1 %v3748_v24 }
 0x1c7   : > { %3525 = vmatprep.subr.bf16.mxu1 %v3838_v44 }
 0x1c8   : > { %3544 = vmatpush3.bf16.msra.mxu0 %v3756_v41 }
 0x1c9   : > { %3545 = vmatprep.subr.bf16.mxu0 %v3838_v44 }
 0x1ca   : > { %3526 = vmatpush3.bf16.msra.mxu1 %v3749_v25 }
 0x1cb   : > { %3527 = vmatprep.subr.bf16.mxu1 %v3838_v44 }
 0x1cc   : > { %3546 = vmatpush3.bf16.msra.mxu0 %v3757_v45  ;;  %v3770_v45 = vld [vmem:[%s4610_s9] sm:$0xff]  }
 0x1cd   : > { %3547 = vmatprep.subr.bf16.mxu0 %v3838_v44 }
 0x1ce   : > { %3528 = vmatpush3.bf16.msra.mxu1 %v3750_v26 }
 0x1cf   : > { %3529 = vmatprep.subr.bf16.mxu1 %v3838_v44 }
 0x1d0   : > { %3548 = vmatpush3.bf16.msra.mxu0 %v3758_v46  ;;  %v3771_v46 = vld [vmem:[%s4610_s9 + $0x8] sm:$0xff]  }
 0x1d1   : > { %3549 = vmatprep.subr.bf16.mxu0 %v3838_v44 }
 0x1d2   : > { %3530 = vmatpush3.bf16.msra.mxu1 %v3751_v27 }
 0x1d3   : > { %3531 = vmatprep.subr.bf16.mxu1 %v3838_v44 }
 0x1d4   : > { %3550 = vmatpush3.bf16.msra.mxu0 %v3759_v47  ;;  %v2355_v47 = vld [vmem:[%s4607_s6] sm:$0x1] }
 0x1d5   : > { %3551 = vmatprep.subr.bf16.mxu0 %v3838_v44 }
 0x1d6   : > { %3532 = vmatpush3.bf16.msra.mxu1 %v3752_v28 }
 0x1d7   : > { %3533 = vmatprep.subr.bf16.mxu1 %v3838_v44 }
 0x1d8   : > { %3552 = vmatpush3.bf16.msra.mxu0 %v3760_v48 }
 0x1d9   : > { %3553 = vmatprep.subr.bf16.mxu0 %v3838_v44 }
 0x1da   : > { %3534 = vmatpush3.bf16.msra.mxu1 %v3753_v29  ;;  %v3067_v29 = vld [vmem:[%s4605_s4 + $0x1] ss:$0 sm:$0xff] }
 0x1db   : > { %3559 = vmatprep.subr.bf16.mxu1 %v3838_v44 }
 0x1dc   : > { %3554 = vmatpush3.bf16.msra.mxu0 %v3761_v49 }
 0x1dd   : > { %3536 = vmatmul.mubr.bf16.vlgmr.msra.gmra.mrb[32].mxu1 %v2228_v31  ;;  %3579 = vmatprep.subr.bf16.mxu0 %v3838_v44  ;;  %v3068_v31 = vld [vmem:[%s4605_s4 + $0x2] ss:$0 sm:$0xff] }
 0x1de   : > { %3575 = vmatprep.mubr.msk.bf16.mxu1 %vm3839_vm7, %v3838_v44  ;;  %3560 = vmatpush3.bf16.msra.mxu1 %v3762_v50 }
 0x1df   : > { %3561 = vmatprep.subr.bf16.mxu1 %v3838_v44 }
 0x1e2   : > { %3562 = vmatpush3.bf16.msra.mxu1 %v3763_v51 }
 0x1e3   : > { %3563 = vmatprep.subr.bf16.mxu1 %v3838_v44 }
 0x1e6   : > { %3564 = vmatpush3.bf16.msra.mxu1 %v3764_v54 }
 0x1e7   : > { %3565 = vmatprep.subr.bf16.mxu1 %v3838_v44 }
 0x1ea   : > { %3566 = vmatpush3.bf16.msra.mxu1 %v3765_v63 }
 0x1eb   : > { %3567 = vmatprep.subr.bf16.mxu1 %v3838_v44 }
 0x1ee   : > { %3568 = vmatpush3.bf16.msra.mxu1 %v3766_v0 }
 0x1ef   : > { %3569 = vmatprep.subr.bf16.mxu1 %v3838_v44 }
 0x1f2   : > { %3570 = vmatpush3.bf16.msra.mxu1 %v3767_v1 }
 0x1f3   : > { %3571 = vmatprep.subr.bf16.mxu1 %v3838_v44 }
 0x230   : > { %v1485_v34 = vpop.f32.mrb[16].mxu1 }
 0x231   : > { %v1573_v35 = vpop.f32.mrb[20].mxu0  ;;  %v3377_v37 = vpop.f32.mrb[17].mxu1 }
 0x232   : > { %v1574_v36 = vadd.f32 %v1573_v35, %v1485_v34  ;;  %v3397_v38 = vpop.f32.mrb[21].mxu0  ;;  %v1488_v39 = vpop.f32.mrb[18].mxu1 }
 0x233   : > { %v1576_v40 = vpop.f32.mrb[22].mxu0  ;;  %v3378_v42 = vpop.f32.mrb[19].mxu1 }
 0x234   : > { %v3398_v43 = vpop.f32.mrb[23].mxu0  ;;  %v3768_v42 = vld [vmem:[%s4608_s7 + $0x30] sm:$0xff]  }
 0x235   : > { %3572 = vmatpush3.bf16.msra.mxu1 %v3768_v42  ;;  %v3769_v43 = vld [vmem:[%s4608_s7 + $0x38] sm:$0xff]  }
 0x236   : > { %3573 = vmatprep.subr.bf16.mxu1 %v3838_v44 }
 0x239   : > { %3574 = vmatpush3.bf16.msra.mxu1 %v3769_v43 }
 0x250   : > { %v1680_v52 = vpop.f32.mrb[20].mxu1 }
 0x251   : > { %v1788_v53 = vpop.f32.mrb[24].mxu0  ;;  %v1686_v55 = vadd.f32 %v1680_v52, %v1574_v36  ;;  %v3417_v56 = vpop.f32.mrb[21].mxu1 }
 0x252   : > { %v3437_v57 = vpop.f32.mrb[25].mxu0  ;;  %v1683_v58 = vpop.f32.mrb[22].mxu1  ;;  %v3773_v56 = vld [vmem:[%s4610_s9 + $0x18] sm:$0xff]  }
 0x253   : > { %v1791_v59 = vpop.f32.mrb[26].mxu0  ;;  %v1794_v60 = vadd.f32 %v1788_v53, %v1686_v55  ;;  %v3418_v61 = vpop.f32.mrb[23].mxu1  ;;  %v3772_v55 = vld [vmem:[%s4610_s9 + $0x10] sm:$0xff]   ;;  %v2490_v57 = vld [vmem:[%s4609_s8] sm:$0x1] }
 0x254   : > { %v3438_v62 = vpop.f32.mrb[27].mxu0 }
 0x270   : > { %v1896_v2 = vpop.f32.mrb[24].mxu1 }
 0x271   : > { %v2004_v3 = vpop.f32.mrb[28].mxu0  ;;  %v1902_v4 = vadd.f32 %v1896_v2, %v1794_v60  ;;  %v3457_v5 = vpop.f32.mrb[25].mxu1 }
 0x272   : > { %v3477_v6 = vpop.f32.mrb[29].mxu0  ;;  %v1899_v7 = vpop.f32.mrb[26].mxu1 }
 0x273   : > { %v2007_v8 = vpop.f32.mrb[30].mxu0  ;;  %v2010_v9 = vadd.f32 %v2004_v3, %v1902_v4  ;;  %v3458_v10 = vpop.f32.mrb[27].mxu1 }
 0x274   : > { %v3478_v11 = vpop.f32.mrb[31].mxu0 }
 0x290   : > { %v2112_v12 = vpop.f32.mrb[28].mxu1 }
 0x291   : > { %v2220_v13 = vpop.f32.mrb[32].mxu0  ;;  %v2118_v14 = vadd.f32 %v2112_v12, %v2010_v9  ;;  %v3497_v15 = vpop.f32.mrb[29].mxu1 }
 0x292   : > { %v3517_v16 = vpop.f32.mrb[33].mxu0  ;;  %v2115_v17 = vpop.f32.mrb[30].mxu1 }
 0x293   : > { %v2223_v18 = vpop.f32.mrb[34].mxu0  ;;  %v2226_v19 = vadd.f32 %v2220_v13, %v2118_v14  ;;  %v3498_v20 = vpop.f32.mrb[31].mxu1 }
 0x294   : > { %v3518_v21 = vpop.f32.mrb[35].mxu0 }
 0x2b0   : > { %v2328_v22 = vpop.f32.mrb[32].mxu1 }
 0x2b1   : > { %v2334_v24 = vadd.f32 %v2328_v22, %v2226_v19  ;;  %v3537_v25 = vpop.f32.mrb[33].mxu1 }
 0x2b2   : > { %v2331_v26 = vpop.f32.mrb[34].mxu1 }
 0x2b3   : > { %v2342_v27 = vadd.f32 %v3066_v23, %v2334_v24  ;;  %v3538_v28 = vpop.f32.mrb[35].mxu1 }
 0x2b5   : > { %v2343_v30 = vmax.f32 %v2342_v27, 0.0 }
 0x2b7   : > { %v2348_v32 = vmul.f32 %v3067_v29, %v2343_v30 }
 0x2b9   : > { %v2353_v33 = vadd.f32 %v3068_v31, %v2348_v32 }
 0x2bb   : > { %2354 = vst [vmem:[#allocation4] sm:$0xff] %v2353_v33 }
 0x2c2   : > { %v2356_v34 = vld [vmem:[#allocation4] ss:$2 sm:$0x1]  ;;  %v2358_v35 = vld [vmem:[#allocation4 + $0x1] ss:$2 sm:$0x1] }
 0x2c3   : > { %v2360_v36 = vld [vmem:[#allocation4 + $0x4] ss:$2 sm:$0x1]  ;;  %v2362_v37 = vld [vmem:[#allocation4 + $0x5] ss:$2 sm:$0x1]  ;;  %v2363_v38 = vmax.f32 %v2356_v34, %v2358_v35 }
 0x2c4   : > { %v2364_v39 = vmax.f32 %v2360_v36, %v2362_v37 }
 0x2c6   : > { %v2365_v40 = vmax.f32 %v2363_v38, %v2364_v39 }
 0x2c8   : > { %v2366_v41 = vpack.c.bf16 %v2365_v40, %v2365_v40 }
 0x2ca   : > { %3556 = vmatmul.mubr.bf16.vlgmr.msra.gmra.mrb[36].mxu0 %v2366_v41 }
 0x2cb   : > { %3587 = vmatprep.mubr.msk.bf16.mxu0 %vm3839_vm7, %v3838_v44  ;;  %3580 = vmatpush3.bf16.msra.mxu0 %v3770_v45 }
 0x2cc   : > { %3581 = vmatprep.subr.bf16.mxu0 %v3838_v44 }
 0x2cf   : > { %3582 = vmatpush3.bf16.msra.mxu0 %v3771_v46 }
 0x2d0   : > { %3583 = vmatprep.subr.bf16.mxu0 %v3838_v44 }
 0x2d3   : > { %3584 = vmatpush3.bf16.msra.mxu0 %v3772_v55 }
 0x2d4   : > { %3585 = vmatprep.subr.bf16.mxu0 %v3838_v44  ;;  %v2589_v44 = vld [vmem:[%s4611_s10] sm:$0x1] }
 0x2d7   : > { %3586 = vmatpush3.bf16.msra.mxu0 %v3773_v56 }
 0x39d   : > { %v2465_v48 = vpop.f32.mrb[36].mxu0 }
 0x39e   : > { %v2471_v49 = vadd.f32 %v2465_v48, %v2355_v47  ;;  %v3557_v50 = vpop.f32.mrb[37].mxu0 }
 0x39f   : > { %v2468_v51 = vpop.f32.mrb[38].mxu0 }
 0x3a0   : > { %v2472_v52 = vmax.f32 %v2471_v49, 0.0  ;;  %v3558_v53 = vpop.f32.mrb[39].mxu0 }
 0x3a2   : > { %v2473_v54 = vpack.c.bf16 %v2472_v52, %v2472_v52 }
 0x3a4   : > { %3576 = vmatmul.mubr.bf16.vlgmr.msra.gmra.mrb[36].mxu1 %v2473_v54 }
 0x477   : > { %v2573_v58 = vpop.f32.mrb[36].mxu1 }
 0x478   : > { %v2574_v59 = vadd.f32 %v2573_v58, %v2490_v57  ;;  %v3577_v60 = vpop.f32.mrb[37].mxu1 }
 0x479   : > { %v2576_v61 = vpop.f32.mrb[38].mxu1 }
 0x47a   : > { %v2579_v62 = vmax.f32 %v2574_v59, 0.0  ;;  %v3578_v63 = vpop.f32.mrb[39].mxu1 }
 0x47c   : > { %v2580_v0 = vpack.c.bf16 %v2579_v62, %v2579_v62 }
 0x47e   : > { %3588 = vmatmul.mubr.msk.bf16.vlgmr.msra.gmra.mrb[40].mxu0 %vm456_vm0, %v2580_v0 }
 0x551   : > { %v2651_v1 = vpop.f32.mrb[40].mxu0 }
 0x552   : > { %v2652_v2 = vadd.f32 %v2651_v1, %v2589_v44  ;;  %v3589_v3 = vpop.f32.mrb[41].mxu0 }
 0x553   : > { %v2654_v4 = vpop.f32.mrb[42].mxu0 }
 0x554   : > { %v3590_v5 = vpop.f32.mrb[43].mxu0  ;;  %2658 = vst.msk [vmem:[%s378_s25] sm:$0x1] %vm2657_vm8, %v2652_v2 }
 0x555   : > { %3787 = shalt.err (!%p3784_p3)
}
 0x556   : > { %s3788_s26 = scalar_lea.hbm %s4559_s13, 16  ;;  %s3792_s30 = scalar_lea.hbm %s4612_s11, 32 }
 0x557   : > { %p3789_p4 = scmp.ne.s32.totalorder %s4559_s13, %s3788_s26  ;;  %p3793_p9 = scmp.lt.u32.totalorder %s4559_s13, %s4612_s11 }
 0x558   : > { %p3794_p10 = scmp.lt.u32.totalorder %s3792_s30, %s3788_s26  ;;  %p3796_p12 = scmp.lt.u32.totalorder %s3788_s26, %s4559_s13 }
 0x559   : > { %p3790_p7 = pnand %p3789_p4, %p3939_p5 }
 0x55a   : > { %p3795_p11 = por %p3794_p10, %p3793_p9 }
 0x55b   : > { %p3791_p8 = pneg %p3790_p7 }
 0x55c   : > { %p3797_p13 = por %p3796_p12, %p3795_p11 }
 0x55e   : > { %p3798_p0 = pnand %p3797_p13, %p3791_p8 }
 0x560   : > { %3801 = shalt.err (!%p3798_p0)
}
 0x561   : > { %3592 = dma.vmem_to_hbm [thread:$0]  (%p3939_p5), %s4561_s29, 16, %s4559_s13, %s2660_s21  }
 0x562 PF: > { %p3598_p1 = scmp.ge.s32.totalorder %s3836_s20, 2  ;;  %s2684_s14 = sand.u32 1, %s3824_s17  }
 0x563   : > { %s2685_s22 = scalar_lea.sflag [#allocation6], %s2684_s14 }
 0x564   : > { %p3595_p2 = pnand %p3598_p1, %p3943_p6 }
 0x566   : > { %3819 = dma.done.wait (!%p3595_p2), %s2685_s22, 16  }
 0x567   : > { %3821 = vsyncadd (!%p3595_p2), %s2685_s22, 4294967280  ;;  %s4616_s24 = sld [smem:[#allocation8_spill]]  ;;  %p21_p3 = scmp.ge.s32.totalorder %s3926_s23, 4  }
 0x568   : > { %s4617_s17 = smov %s3828_s18  ;;  %s4618_s18 = smov %s3832_s19 }
 0x569   : > { %s4620_s20 = smov %s3926_s23  ;;  %23 = sbr.rel (!%p21_p3) target bundleno = 3 (0x3), region = 125 }
 0x56d   : > { %s4619_s19 = smov %s4616_s24 }
 0x570   :  { %2689 = vsyncpa [#allocation6], 1 }
 0x571   :  { %2691 = vsyncpa [#allocation6 + $0x1], 1 }

</bundles_post_ra>
